<compile_context>
chip_gen: v5e
topology: v5e:2x2
jax: 0.10.0
libtpu: 0.0.40
codegen_flags: <defaults>
</compile_context>

<pallas_src>
import functools

import jax
import jax.numpy as jnp
from jax.experimental import pallas as pl
from jax.experimental.pallas import tpu as pltpu

K_NEIGHBORS = 8  # `k` hard-coded in get_graph_feature


# ----------------------------- in-kernel helpers (pure jnp) -----------------------------

def _layer_norm(x, g, b, eps=1e-5):
    # x: (R, C) f32, g/b: (1, C).  torch LayerNorm: biased variance, eps=1e-5.
    mu = jnp.mean(x, axis=-1, keepdims=True)
    var = jnp.mean((x - mu) ** 2, axis=-1, keepdims=True)
    return (x - mu) * jax.lax.rsqrt(var + eps) * g + b


def _softmax(x):
    # approx reciprocal runs on the EUP slot; ~1e-3-level deviation vs exact division.
    m = jnp.max(x, axis=-1, keepdims=True)
    e = jnp.exp(x - m)
    return e * pl.reciprocal(jnp.sum(e, axis=-1, keepdims=True), approx=True)


def _mha(xq_bf, xkv_bf, w_q, w_k, w_v, w_p, b_p, o_scr, num_heads, hd, scale):
    """Multi-head attention including the output projection.

    Per-head attention outputs are written into the (tN, C) bf16 VMEM scratch at their
    static lane slice, then the output projection runs as a single (tN,C)@(C,C) matmul
    (full MXU contraction depth) instead of H dots with K=hd plus H-1 f32 adds.
    The 1/sqrt(hd) scale is applied to the f32 q projection (equivalent to torch's
    score * scale up to bf16 rounding of the score-matmul inputs).
    """
    qp = jnp.dot(xq_bf, w_q, preferred_element_type=jnp.float32) * scale   # (tN, C) f32
    kp = jnp.dot(xkv_bf, w_k, preferred_element_type=jnp.float32)          # (M,  C) f32
    vp = jnp.dot(xkv_bf, w_v, preferred_element_type=jnp.float32)          # (M,  C) f32
    # TODO(synk): for very large tN*M move heads onto a grid axis (or fori_loop) to bound
    # live ranges; with query-axis tiling the per-head (tN, M) scores are already small.
    for h in range(num_heads):
        sl = slice(h * hd, (h + 1) * hd)
        s = jax.lax.dot_general(qp[:, sl].astype(jnp.bfloat16),
                                kp[:, sl].astype(jnp.bfloat16),
                                (((1,), (1,)), ((), ())),
                                preferred_element_type=jnp.float32)        # (tN, M)
        p = _softmax(s)
        o = jnp.dot(p.astype(jnp.bfloat16), vp[:, sl].astype(jnp.bfloat16),
                    preferred_element_type=jnp.float32)                    # (tN, hd)
        o_scr[:, sl] = o.astype(jnp.bfloat16)
    return jnp.dot(o_scr[...], w_p, preferred_element_type=jnp.float32) + b_p


def _knn_branch(feat_bf, xq_bf, w_a, w_d, b):
    """knn_map(cat(feature - x, x)) -> LeakyReLU(0.2) -> max over k, with the channel
    concat removed algebraically: cat(f - x, x) @ W = f @ W[:C] + x @ (W[C:] - W[:C]).

    feat_bf: (k*tN, C) bf16 (already LayerNorm'ed, k-major), xq_bf: (tN, C) bf16.
    """
    tn = xq_bf.shape[0]
    base = jnp.dot(xq_bf, w_d, preferred_element_type=jnp.float32) + b     # (tN, C)
    y = jnp.dot(feat_bf, w_a, preferred_element_type=jnp.float32)          # (k*tN, C)
    y = y.reshape(K_NEIGHBORS, tn, -1) + base[None, :, :]
    y = jnp.maximum(y, 0.2 * y)              # LeakyReLU(0.2): single max, no cmp+select
    return jnp.max(y, axis=0)                                              # (tN, C)


# --------------------------------------- kernel ---------------------------------------

def decoder_kernel(
    q_ref, qf_ref, v_ref, qg_ref, vg_ref,
    ln1_g, ln1_b,
    w_q, w_k, w_v, w_sap, b_sap,
    lnq_g, lnq_b, lnv_g, lnv_b,
    w_qm, w_km, w_vm, w_cap, b_cap,
    ln2_g, ln2_b,
    w_fc1, b_fc1, w_fc2, b_fc2,
    w_knn_a, w_knn_d, b_knn,
    w_mrg_a, w_mrg_b, b_mrg,
    w_knnx_a, w_knnx_d, b_knnx,
    w_mrgx_a, w_mrgx_b, b_mrgx,
    out_ref, o_scr, *, num_heads, scale):
    q = q_ref[0]            # (tN, C) f32 — query tile (residual stream)
    qf = qf_ref[0]          # (N,  C) f32 — full q (self-attention keys/values)
    v = v_ref[0]            # (NK, C) f32 — full v (cross-attention keys/values)
    tn, C = q.shape
    hd = C // num_heads

    # ---------------- self-attention + self-kNN branch ----------------
    xq = _layer_norm(q, ln1_g[...], ln1_b[...])                 # norm1(q): query tile
    xf = _layer_norm(qf, ln1_g[...], ln1_b[...])                # norm1(q): full (K/V)
    xq_b = xq.astype(jnp.bfloat16)
    attn1 = _mha(xq_b, xf.astype(jnp.bfloat16),
                 w_q[...], w_k[...], w_v[...], w_sap[...], b_sap[...],
                 o_scr, num_heads, hd, scale)

    # gathered raw q rows (bf16, k-major) -> norm1 -> decomposed knn_map + max over k.
    # LayerNorm is row-wise, so gather(raw) + in-kernel norm == gather(normed).
    feat = _layer_norm(qg_ref[0].reshape(K_NEIGHBORS * tn, C).astype(jnp.float32),
                       ln1_g[...], ln1_b[...])
    knn_f = _knn_branch(feat.astype(jnp.bfloat16), xq_b,
                        w_knn_a[...], w_knn_d[...], b_knn[...])

    q1 = (jnp.dot(attn1.astype(jnp.bfloat16), w_mrg_a[...],
                  preferred_element_type=jnp.float32)
          + jnp.dot(knn_f.astype(jnp.bfloat16), w_mrg_b[...],
                    preferred_element_type=jnp.float32)
          + b_mrg[...])                                         # merge_map(cat(attn, knn))
    q = q + q1                                                  # drop_path = Identity

    # ---------------- cross-attention + cross-kNN branch ----------------
    x2 = _layer_norm(q, lnq_g[...], lnq_b[...])                 # norm_q(q)
    nv = _layer_norm(v, lnv_g[...], lnv_b[...])                 # norm_v(v)
    x2_b = x2.astype(jnp.bfloat16)
    attn2 = _mha(x2_b, nv.astype(jnp.bfloat16),
                 w_qm[...], w_km[...], w_vm[...], w_cap[...], b_cap[...],
                 o_scr, num_heads, hd, scale)

    featx = _layer_norm(vg_ref[0].reshape(K_NEIGHBORS * tn, C).astype(jnp.float32),
                        lnv_g[...], lnv_b[...])
    knn_fx = _knn_branch(featx.astype(jnp.bfloat16), x2_b,
                         w_knnx_a[...], w_knnx_d[...], b_knnx[...])

    q2 = (jnp.dot(attn2.astype(jnp.bfloat16), w_mrgx_a[...],
                  preferred_element_type=jnp.float32)
          + jnp.dot(knn_fx.astype(jnp.bfloat16), w_mrgx_b[...],
                    preferred_element_type=jnp.float32)
          + b_mrgx[...])
    q = q + q2

    # ---------------- MLP ----------------
    n2 = _layer_norm(q, ln2_g[...], ln2_b[...])
    h = jnp.dot(n2.astype(jnp.bfloat16), w_fc1[...],
                preferred_element_type=jnp.float32) + b_fc1[...]
    # TODO(synk): torch nn.GELU defaults to exact erf GELU; tanh approximation used
    # (erf lowering is not guaranteed in Mosaic; difference ~1e-3).
    h = jax.nn.gelu(h, approximate=True)
    h = jnp.dot(h.astype(jnp.bfloat16), w_fc2[...],
                preferred_element_type=jnp.float32) + b_fc2[...]
    q = q + h

    out_ref[0] = q


# ------------------------------ wrapper-side helpers ------------------------------

def _buffered_probe_kernel(w_ref, o_ref):
    o_ref[...] = w_ref[...] + 1.0


@functools.lru_cache(maxsize=None)
def _single_buffered_weight_kwargs():
    """Feature-probe: pipeline_mode=pl.Buffered(1) single-buffers grid-invariant blocks
    (constant-index-map weights), halving weight VMEM — this matters on v7x's 64 MiB.
    Falls back to default double-buffered specs if this jax/libtpu doesn't support it."""
    try:
        kw = dict(pipeline_mode=pl.Buffered(1))
        f = pl.pallas_call(
            _buffered_probe_kernel,
            grid=(2,),
            in_specs=[pl.BlockSpec((8, 128), lambda i: (0, 0), **kw)],
            out_specs=pl.BlockSpec((8, 128), lambda i: (0, 0)),
            out_shape=jax.ShapeDtypeStruct((8, 128), jnp.float32),
        )
        out = jax.block_until_ready(f(jnp.zeros((8, 128), jnp.float32)))
        return kw if bool(jnp.all(out == 1.0)) else {}
    except Exception:  # any failure -> default double buffering
        return {}


def _vmem_limit_bytes():
    """Generation-aware VMEM budget: ~56 MiB on v7x (64 MiB physical), ~100 MiB on
    v5e/v6e (128 MiB physical); conservative 56 MiB if the query fails."""
    cap = 64 * 1024 * 1024
    try:
        cap = int(getattr(pltpu.get_tpu_info(), "vmem_capacity_bytes", cap))
    except Exception:
        pass
    return max(32 * 1024 * 1024, min(cap - 8 * 1024 * 1024, 100 * 1024 * 1024))


def _query_tile(n):
    """Query-axis tile: full N for small decoder stages; <=256 rows at production sizes
    so the per-step working set ((17*tN + N + NK) * C bytes-ish) fits v7x's 64 MiB and
    both grid axes give the TensorCores parallel work."""
    if n <= 256:
        return n
    for t in (256, 128, 64, 32, 16, 8):
        if n % t == 0:
            return t
    return n


# --------------------------------------- wrapper ---------------------------------------

def decoder_forward(q, v, self_knn_index, cross_knn_index, params, num_heads):
    (ln1_g, ln1_b, w_qkv, w_sap, b_sap,
     lnq_g, lnq_b, lnv_g, lnv_b,
     w_qm, w_km, w_vm, w_cap, b_cap,
     ln2_g, ln2_b,
     w_fc1, b_fc1, w_fc2, b_fc2,
     w_knn, b_knn, w_mrg, b_mrg,
     w_knnx, b_knnx, w_mrgx, b_mrgx) = params

    q = q.astype(jnp.float32)
    v = v.astype(jnp.float32)
    B, N, C = q.shape
    NK = v.shape[1]
    hd = C // num_heads
    scale = float(hd) ** -0.5
    tn = _query_tile(N)
    bf = lambda x: x.astype(jnp.bfloat16)

    # --- trace-time weight preprocessing (column split of qkv, concat elimination, bf16) ---
    w_q_s = bf(w_qkv[:, :C])
    w_k_s = bf(w_qkv[:, C:2 * C])
    w_v_s = bf(w_qkv[:, 2 * C:])
    w_knn_a = bf(w_knn[:C]);   w_knn_d = bf(w_knn[C:] - w_knn[:C])
    w_knnx_a = bf(w_knnx[:C]); w_knnx_d = bf(w_knnx[C:] - w_knnx[:C])
    w_mrg_a = bf(w_mrg[:C]);   w_mrg_b = bf(w_mrg[C:])
    w_mrgx_a = bf(w_mrgx[:C]); w_mrgx_b = bf(w_mrgx[C:])

    # --- gather the raw rows used by get_graph_feature, k-major (B, K, N, C), shipped as
    # bf16 (LayerNorm is row-wise, so gather(raw)+in-kernel norm == gather(normed)).
    # The flat kNN index is assumed batch-major then k-major (row = b*K*N + k*N + n),
    # exactly as PyTorch's x.view(B*num_points, C)[knn_index].view(B, k, num_query, C).
    # TODO(synk): replace with an in-kernel DMA row gather (scalar-prefetched indices).
    sidx = self_knn_index.reshape(-1).astype(jnp.int32)
    cidx = cross_knn_index.reshape(-1).astype(jnp.int32)
    q_rows = bf(jnp.take(q.reshape(B * N, C), sidx, axis=0)).reshape(B, K_NEIGHBORS, N, C)
    v_rows = bf(jnp.take(v.reshape(B * NK, C), cidx, axis=0)).reshape(B, K_NEIGHBORS, N, C)

    data = [q, q, v, q_rows, v_rows]
    weights = [
        ln1_g, ln1_b,
        w_q_s, w_k_s, w_v_s, bf(w_sap), b_sap,
        lnq_g, lnq_b, lnv_g, lnv_b,
        bf(w_qm), bf(w_km), bf(w_vm), bf(w_cap), b_cap,
        ln2_g, ln2_b,
        bf(w_fc1), b_fc1, bf(w_fc2), b_fc2,
        w_knn_a, w_knn_d, b_knn,
        w_mrg_a, w_mrg_b, b_mrg,
        w_knnx_a, w_knnx_d, b_knnx,
        w_mrgx_a, w_mrgx_b, b_mrgx,
    ]

    data_specs = [
        pl.BlockSpec((1, tn, C), lambda b, n: (b, n, 0)),                  # q tile
        pl.BlockSpec((1, N, C), lambda b, n: (b, 0, 0)),                   # q full (self K/V)
        pl.BlockSpec((1, NK, C), lambda b, n: (b, 0, 0)),                  # v full (cross K/V)
        pl.BlockSpec((1, K_NEIGHBORS, tn, C), lambda b, n: (b, 0, n, 0)),  # self kNN rows bf16
        pl.BlockSpec((1, K_NEIGHBORS, tn, C), lambda b, n: (b, 0, n, 0)),  # cross kNN rows bf16
    ]
    # Weights: full-array blocks, constant index maps -> fetched once, VMEM-resident;
    # single-buffered via pipeline_mode=pl.Buffered(1) where supported.
    wkw = _single_buffered_weight_kwargs()
    w_specs = [pl.BlockSpec(w.shape, lambda b, n, nd=w.ndim: (0,) * nd, **wkw)
               for w in weights]

    kernel = functools.partial(decoder_kernel, num_heads=num_heads, scale=scale)
    # NOTE: no input_output_aliases — with query tiling the full-q block is re-read at
    # later grid steps, so in-place output writes would corrupt it.
    return pl.pallas_call(
        kernel,
        grid=(B, N // tn),
        out_shape=jax.ShapeDtypeStruct((B, N, C), jnp.float32),
        in_specs=data_specs + w_specs,
        out_specs=pl.BlockSpec((1, tn, C), lambda b, n: (b, n, 0)),
        scratch_shapes=[pltpu.VMEM((tn, C), jnp.bfloat16)],   # head-concat buffer
        compiler_params=pltpu.CompilerParams(
            dimension_semantics=("parallel", "parallel"),
            vmem_limit_bytes=_vmem_limit_bytes()),
    )(*data, *weights)


def init_params(key, dim, mlp_ratio=4.0):
    C = dim
    Hm = int(dim * mlp_ratio)
    keys = jax.random.split(key, 32)
    it = iter(range(32))
    s = 0.05

    def w(shape):
        return jax.random.normal(keys[next(it)], shape, jnp.float32) * s

    ones = lambda c: jnp.ones((1, c), jnp.float32)
    zeros = lambda c: jnp.zeros((1, c), jnp.float32)

    return [
        ones(C), zeros(C),                         # norm1 gamma/beta
        w((C, 3 * C)),                             # self_attn.qkv (qkv_bias=False)
        w((C, C)), w((1, C)),                      # self_attn.proj w, b
        ones(C), zeros(C),                         # norm_q
        ones(C), zeros(C),                         # norm_v
        w((C, C)), w((C, C)), w((C, C)),           # q_map, k_map, v_map (no bias)
        w((C, C)), w((1, C)),                      # cross proj w, b
        ones(C), zeros(C),                         # norm2
        w((C, Hm)), w((1, Hm)),                    # mlp.fc1 w, b
        w((Hm, C)), w((1, C)),                     # mlp.fc2 w, b
        w((2 * C, C)), w((1, C)),                  # knn_map
        w((2 * C, C)), w((1, C)),                  # merge_map
        w((2 * C, C)), w((1, C)),                  # knn_map_cross
        w((2 * C, C)), w((1, C)),                  # merge_map_cross
    ]


if __name__ == "__main__":
    B, N, NK, C, H = 2, 16, 16, 32, 4
    key = jax.random.PRNGKey(0)
    kq, kv, ks, kc, kp = jax.random.split(key, 5)

    q = jax.random.normal(kq, (B, N, C), jnp.float32)
    v = jax.random.normal(kv, (B, NK, C), jnp.float32)
    # flat kNN indices, exactly as PyTorch get_graph_feature expects (global row ids)
    self_knn = jax.random.randint(ks, (B * K_NEIGHBORS * N,), 0, B * N, jnp.int32)
    cross_knn = jax.random.randint(kc, (B * K_NEIGHBORS * N,), 0, B * NK, jnp.int32)

    params = init_params(kp, C)

    fwd = jax.jit(functools.partial(decoder_forward, num_heads=H))
    out = fwd(q, v, self_knn, cross_knn, params)
    out = jax.block_until_ready(out)
    assert out.shape == (B, N, C) and out.dtype == jnp.float32
    assert bool(jnp.all(jnp.isfinite(out)))
    print("KERNEL_OK")
</pallas_src>

<mosaic_0001>
module attributes {stable_mosaic.version = 11 : i64} {
  func.func @decoder_kernel(%arg0: i32, %arg1: i32, %arg2: memref<1x16x32xf32, #tpu.memory_space<vmem>>, %arg3: memref<1x16x32xf32, #tpu.memory_space<vmem>>, %arg4: memref<1x16x32xf32, #tpu.memory_space<vmem>>, %arg5: memref<1x8x16x32xbf16, #tpu.memory_space<vmem>>, %arg6: memref<1x8x16x32xbf16, #tpu.memory_space<vmem>>, %arg7: memref<1x32xf32, #tpu.memory_space<vmem>>, %arg8: memref<1x32xf32, #tpu.memory_space<vmem>>, %arg9: memref<32x32xbf16, #tpu.memory_space<vmem>>, %arg10: memref<32x32xbf16, #tpu.memory_space<vmem>>, %arg11: memref<32x32xbf16, #tpu.memory_space<vmem>>, %arg12: memref<32x32xbf16, #tpu.memory_space<vmem>>, %arg13: memref<1x32xf32, #tpu.memory_space<vmem>>, %arg14: memref<1x32xf32, #tpu.memory_space<vmem>>, %arg15: memref<1x32xf32, #tpu.memory_space<vmem>>, %arg16: memref<1x32xf32, #tpu.memory_space<vmem>>, %arg17: memref<1x32xf32, #tpu.memory_space<vmem>>, %arg18: memref<32x32xbf16, #tpu.memory_space<vmem>>, %arg19: memref<32x32xbf16, #tpu.memory_space<vmem>>, %arg20: memref<32x32xbf16, #tpu.memory_space<vmem>>, %arg21: memref<32x32xbf16, #tpu.memory_space<vmem>>, %arg22: memref<1x32xf32, #tpu.memory_space<vmem>>, %arg23: memref<1x32xf32, #tpu.memory_space<vmem>>, %arg24: memref<1x32xf32, #tpu.memory_space<vmem>>, %arg25: memref<32x128xbf16, #tpu.memory_space<vmem>>, %arg26: memref<1x128xf32, #tpu.memory_space<vmem>>, %arg27: memref<128x32xbf16, #tpu.memory_space<vmem>>, %arg28: memref<1x32xf32, #tpu.memory_space<vmem>>, %arg29: memref<32x32xbf16, #tpu.memory_space<vmem>>, %arg30: memref<32x32xbf16, #tpu.memory_space<vmem>>, %arg31: memref<1x32xf32, #tpu.memory_space<vmem>>, %arg32: memref<32x32xbf16, #tpu.memory_space<vmem>>, %arg33: memref<32x32xbf16, #tpu.memory_space<vmem>>, %arg34: memref<1x32xf32, #tpu.memory_space<vmem>>, %arg35: memref<32x32xbf16, #tpu.memory_space<vmem>>, %arg36: memref<32x32xbf16, #tpu.memory_space<vmem>>, %arg37: memref<1x32xf32, #tpu.memory_space<vmem>>, %arg38: memref<32x32xbf16, #tpu.memory_space<vmem>>, %arg39: memref<32x32xbf16, #tpu.memory_space<vmem>>, %arg40: memref<1x32xf32, #tpu.memory_space<vmem>>, %arg41: memref<1x16x32xf32, #tpu.memory_space<vmem>>, %arg42: memref<16x32xbf16, #tpu.memory_space<vmem>>) attributes {dimension_semantics = [#tpu.dimension_semantics<parallel>, #tpu.dimension_semantics<parallel>], iteration_bounds = array<i64: 2, 1>, scalar_prefetch = 0 : i64, scratch_operands = 1 : i64, tpu.core_type = #tpu.core_type<tc>, window_params = [{transform_indices = @transform_0, window_bounds = array<i64: 1, 16, 32>}, {transform_indices = @transform_1, window_bounds = array<i64: 1, 16, 32>}, {transform_indices = @transform_2, window_bounds = array<i64: 1, 16, 32>}, {transform_indices = @transform_3, window_bounds = array<i64: 1, 8, 16, 32>}, {transform_indices = @transform_4, window_bounds = array<i64: 1, 8, 16, 32>}, {pipeline_mode = #tpu.pipeline_mode<synchronous>, transform_indices = @transform_5, window_bounds = array<i64: 1, 32>}, {pipeline_mode = #tpu.pipeline_mode<synchronous>, transform_indices = @transform_6, window_bounds = array<i64: 1, 32>}, {pipeline_mode = #tpu.pipeline_mode<synchronous>, transform_indices = @transform_7, window_bounds = array<i64: 32, 32>}, {pipeline_mode = #tpu.pipeline_mode<synchronous>, transform_indices = @transform_8, window_bounds = array<i64: 32, 32>}, {pipeline_mode = #tpu.pipeline_mode<synchronous>, transform_indices = @transform_9, window_bounds = array<i64: 32, 32>}, {pipeline_mode = #tpu.pipeline_mode<synchronous>, transform_indices = @transform_10, window_bounds = array<i64: 32, 32>}, {pipeline_mode = #tpu.pipeline_mode<synchronous>, transform_indices = @transform_11, window_bounds = array<i64: 1, 32>}, {pipeline_mode = #tpu.pipeline_mode<synchronous>, transform_indices = @transform_12, window_bounds = array<i64: 1, 32>}, {pipeline_mode = #tpu.pipeline_mode<synchronous>, transform_indices = @transform_13, window_bounds = array<i64: 1, 32>}, {pipeline_mode = #tpu.pipeline_mode<synchronous>, transform_indices = @transform_14, window_bounds = array<i64: 1, 32>}, {pipeline_mode = #tpu.pipeline_mode<synchronous>, transform_indices = @transform_15, window_bounds = array<i64: 1, 32>}, {pipeline_mode = #tpu.pipeline_mode<synchronous>, transform_indices = @transform_16, window_bounds = array<i64: 32, 32>}, {pipeline_mode = #tpu.pipeline_mode<synchronous>, transform_indices = @transform_17, window_bounds = array<i64: 32, 32>}, {pipeline_mode = #tpu.pipeline_mode<synchronous>, transform_indices = @transform_18, window_bounds = array<i64: 32, 32>}, {pipeline_mode = #tpu.pipeline_mode<synchronous>, transform_indices = @transform_19, window_bounds = array<i64: 32, 32>}, {pipeline_mode = #tpu.pipeline_mode<synchronous>, transform_indices = @transform_20, window_bounds = array<i64: 1, 32>}, {pipeline_mode = #tpu.pipeline_mode<synchronous>, transform_indices = @transform_21, window_bounds = array<i64: 1, 32>}, {pipeline_mode = #tpu.pipeline_mode<synchronous>, transform_indices = @transform_22, window_bounds = array<i64: 1, 32>}, {pipeline_mode = #tpu.pipeline_mode<synchronous>, transform_indices = @transform_23, window_bounds = array<i64: 32, 128>}, {pipeline_mode = #tpu.pipeline_mode<synchronous>, transform_indices = @transform_24, window_bounds = array<i64: 1, 128>}, {pipeline_mode = #tpu.pipeline_mode<synchronous>, transform_indices = @transform_25, window_bounds = array<i64: 128, 32>}, {pipeline_mode = #tpu.pipeline_mode<synchronous>, transform_indices = @transform_26, window_bounds = array<i64: 1, 32>}, {pipeline_mode = #tpu.pipeline_mode<synchronous>, transform_indices = @transform_27, window_bounds = array<i64: 32, 32>}, {pipeline_mode = #tpu.pipeline_mode<synchronous>, transform_indices = @transform_28, window_bounds = array<i64: 32, 32>}, {pipeline_mode = #tpu.pipeline_mode<synchronous>, transform_indices = @transform_29, window_bounds = array<i64: 1, 32>}, {pipeline_mode = #tpu.pipeline_mode<synchronous>, transform_indices = @transform_30, window_bounds = array<i64: 32, 32>}, {pipeline_mode = #tpu.pipeline_mode<synchronous>, transform_indices = @transform_31, window_bounds = array<i64: 32, 32>}, {pipeline_mode = #tpu.pipeline_mode<synchronous>, transform_indices = @transform_32, window_bounds = array<i64: 1, 32>}, {pipeline_mode = #tpu.pipeline_mode<synchronous>, transform_indices = @transform_33, window_bounds = array<i64: 32, 32>}, {pipeline_mode = #tpu.pipeline_mode<synchronous>, transform_indices = @transform_34, window_bounds = array<i64: 32, 32>}, {pipeline_mode = #tpu.pipeline_mode<synchronous>, transform_indices = @transform_35, window_bounds = array<i64: 1, 32>}, {pipeline_mode = #tpu.pipeline_mode<synchronous>, transform_indices = @transform_36, window_bounds = array<i64: 32, 32>}, {pipeline_mode = #tpu.pipeline_mode<synchronous>, transform_indices = @transform_37, window_bounds = array<i64: 32, 32>}, {pipeline_mode = #tpu.pipeline_mode<synchronous>, transform_indices = @transform_38, window_bounds = array<i64: 1, 32>}, {transform_indices = @transform_39, window_bounds = array<i64: 1, 16, 32>}]} {
    %c0 = arith.constant 0 : index
    %c0_0 = arith.constant 0 : index
    %c0_1 = arith.constant 0 : index
    %0 = vector.load %arg2[%c0, %c0_0, %c0_1] : memref<1x16x32xf32, #tpu.memory_space<vmem>>, vector<1x16x32xf32>
    %1 = vector.shape_cast %0 : vector<1x16x32xf32> to vector<16x32xf32>
    %c0_2 = arith.constant 0 : index
    %c0_3 = arith.constant 0 : index
    %c0_4 = arith.constant 0 : index
    %2 = vector.load %arg3[%c0_2, %c0_3, %c0_4] : memref<1x16x32xf32, #tpu.memory_space<vmem>>, vector<1x16x32xf32>
    %3 = vector.shape_cast %2 : vector<1x16x32xf32> to vector<16x32xf32>
    %c0_5 = arith.constant 0 : index
    %c0_6 = arith.constant 0 : index
    %c0_7 = arith.constant 0 : index
    %4 = vector.load %arg4[%c0_5, %c0_6, %c0_7] : memref<1x16x32xf32, #tpu.memory_space<vmem>>, vector<1x16x32xf32>
    %5 = vector.shape_cast %4 : vector<1x16x32xf32> to vector<16x32xf32>
    %c0_8 = arith.constant 0 : index
    %c0_9 = arith.constant 0 : index
    %6 = vector.load %arg7[%c0_8, %c0_9] : memref<1x32xf32, #tpu.memory_space<vmem>>, vector<1x32xf32>
    %c0_10 = arith.constant 0 : index
    %c0_11 = arith.constant 0 : index
    %7 = vector.load %arg8[%c0_10, %c0_11] : memref<1x32xf32, #tpu.memory_space<vmem>>, vector<1x32xf32>
    %cst = arith.constant dense<0.000000e+00> : vector<16xf32>
    %8 = vector.multi_reduction <add>, %1, %cst [1] : vector<16x32xf32> to vector<16xf32>
    %9 = vector.shape_cast %8 : vector<16xf32> to vector<16x1xf32>
    %cst_12 = arith.constant 3.200000e+01 : f32
    %10 = vector.broadcast %cst_12 : f32 to vector<16x1xf32>
    %11 = arith.divf %9, %10 : vector<16x1xf32>
    %12 = vector.broadcast %11 : vector<16x1xf32> to vector<16x32xf32>
    %13 = arith.subf %1, %12 : vector<16x32xf32>
    %14 = arith.mulf %13, %13 : vector<16x32xf32>
    %cst_13 = arith.constant dense<0.000000e+00> : vector<16xf32>
    %15 = vector.multi_reduction <add>, %14, %cst_13 [1] : vector<16x32xf32> to vector<16xf32>
    %16 = vector.shape_cast %15 : vector<16xf32> to vector<16x1xf32>
    %cst_14 = arith.constant 3.200000e+01 : f32
    %17 = vector.broadcast %cst_14 : f32 to vector<16x1xf32>
    %18 = arith.divf %16, %17 : vector<16x1xf32>
    %19 = vector.broadcast %11 : vector<16x1xf32> to vector<16x32xf32>
    %20 = arith.subf %1, %19 : vector<16x32xf32>
    %cst_15 = arith.constant 9.99999974E-6 : f32
    %21 = vector.broadcast %cst_15 : f32 to vector<16x1xf32>
    %22 = arith.addf %18, %21 : vector<16x1xf32>
    %23 = math.rsqrt %22 : vector<16x1xf32>
    %24 = vector.broadcast %23 : vector<16x1xf32> to vector<16x32xf32>
    %25 = arith.mulf %20, %24 : vector<16x32xf32>
    %26 = vector.broadcast %6 : vector<1x32xf32> to vector<16x32xf32>
    %27 = arith.mulf %25, %26 : vector<16x32xf32>
    %28 = vector.broadcast %7 : vector<1x32xf32> to vector<16x32xf32>
    %29 = arith.addf %27, %28 : vector<16x32xf32>
    %c0_16 = arith.constant 0 : index
    %c0_17 = arith.constant 0 : index
    %30 = vector.load %arg7[%c0_16, %c0_17] : memref<1x32xf32, #tpu.memory_space<vmem>>, vector<1x32xf32>
    %c0_18 = arith.constant 0 : index
    %c0_19 = arith.constant 0 : index
    %31 = vector.load %arg8[%c0_18, %c0_19] : memref<1x32xf32, #tpu.memory_space<vmem>>, vector<1x32xf32>
    %cst_20 = arith.constant dense<0.000000e+00> : vector<16xf32>
    %32 = vector.multi_reduction <add>, %3, %cst_20 [1] : vector<16x32xf32> to vector<16xf32>
    %33 = vector.shape_cast %32 : vector<16xf32> to vector<16x1xf32>
    %cst_21 = arith.constant 3.200000e+01 : f32
    %34 = vector.broadcast %cst_21 : f32 to vector<16x1xf32>
    %35 = arith.divf %33, %34 : vector<16x1xf32>
    %36 = vector.broadcast %35 : vector<16x1xf32> to vector<16x32xf32>
    %37 = arith.subf %3, %36 : vector<16x32xf32>
    %38 = arith.mulf %37, %37 : vector<16x32xf32>
    %cst_22 = arith.constant dense<0.000000e+00> : vector<16xf32>
    %39 = vector.multi_reduction <add>, %38, %cst_22 [1] : vector<16x32xf32> to vector<16xf32>
    %40 = vector.shape_cast %39 : vector<16xf32> to vector<16x1xf32>
    %cst_23 = arith.constant 3.200000e+01 : f32
    %41 = vector.broadcast %cst_23 : f32 to vector<16x1xf32>
    %42 = arith.divf %40, %41 : vector<16x1xf32>
    %43 = vector.broadcast %35 : vector<16x1xf32> to vector<16x32xf32>
    %44 = arith.subf %3, %43 : vector<16x32xf32>
    %cst_24 = arith.constant 9.99999974E-6 : f32
    %45 = vector.broadcast %cst_24 : f32 to vector<16x1xf32>
    %46 = arith.addf %42, %45 : vector<16x1xf32>
    %47 = math.rsqrt %46 : vector<16x1xf32>
    %48 = vector.broadcast %47 : vector<16x1xf32> to vector<16x32xf32>
    %49 = arith.mulf %44, %48 : vector<16x32xf32>
    %50 = vector.broadcast %30 : vector<1x32xf32> to vector<16x32xf32>
    %51 = arith.mulf %49, %50 : vector<16x32xf32>
    %52 = vector.broadcast %31 : vector<1x32xf32> to vector<16x32xf32>
    %53 = arith.addf %51, %52 : vector<16x32xf32>
    %54 = arith.truncf %29 : vector<16x32xf32> to vector<16x32xbf16>
    %55 = arith.truncf %53 : vector<16x32xf32> to vector<16x32xbf16>
    %c0_25 = arith.constant 0 : index
    %c0_26 = arith.constant 0 : index
    %56 = vector.load %arg9[%c0_25, %c0_26] : memref<32x32xbf16, #tpu.memory_space<vmem>>, vector<32x32xbf16>
    %c0_27 = arith.constant 0 : index
    %c0_28 = arith.constant 0 : index
    %57 = vector.load %arg10[%c0_27, %c0_28] : memref<32x32xbf16, #tpu.memory_space<vmem>>, vector<32x32xbf16>
    %c0_29 = arith.constant 0 : index
    %c0_30 = arith.constant 0 : index
    %58 = vector.load %arg11[%c0_29, %c0_30] : memref<32x32xbf16, #tpu.memory_space<vmem>>, vector<32x32xbf16>
    %c0_31 = arith.constant 0 : index
    %c0_32 = arith.constant 0 : index
    %59 = vector.load %arg12[%c0_31, %c0_32] : memref<32x32xbf16, #tpu.memory_space<vmem>>, vector<32x32xbf16>
    %c0_33 = arith.constant 0 : index
    %c0_34 = arith.constant 0 : index
    %60 = vector.load %arg13[%c0_33, %c0_34] : memref<1x32xf32, #tpu.memory_space<vmem>>, vector<1x32xf32>
    %cst_35 = arith.constant dense<0.000000e+00> : vector<16x32xf32>
    %61 = tpu.matmul %54, %56, %cst_35 {dimension_numbers = #tpu.dot_dimension_numbers<[1], [0], [0], [1], [0, 0, 1, 1], [], []>} : vector<16x32xbf16>, vector<32x32xbf16>, vector<16x32xf32> -> vector<16x32xf32>
    %cst_36 = arith.constant 0.353553385 : f32
    %62 = vector.broadcast %cst_36 : f32 to vector<16x32xf32>
    %63 = arith.mulf %61, %62 : vector<16x32xf32>
    %cst_37 = arith.constant dense<0.000000e+00> : vector<16x32xf32>
    %64 = tpu.matmul %55, %57, %cst_37 {dimension_numbers = #tpu.dot_dimension_numbers<[1], [0], [0], [1], [0, 0, 1, 1], [], []>} : vector<16x32xbf16>, vector<32x32xbf16>, vector<16x32xf32> -> vector<16x32xf32>
    %cst_38 = arith.constant dense<0.000000e+00> : vector<16x32xf32>
    %65 = tpu.matmul %55, %58, %cst_38 {dimension_numbers = #tpu.dot_dimension_numbers<[1], [0], [0], [1], [0, 0, 1, 1], [], []>} : vector<16x32xbf16>, vector<32x32xbf16>, vector<16x32xf32> -> vector<16x32xf32>
    %66 = vector.extract_strided_slice %63 {offsets = [0, 0], sizes = [16, 8], strides = [1, 1]} : vector<16x32xf32> to vector<16x8xf32>
    %67 = arith.truncf %66 : vector<16x8xf32> to vector<16x8xbf16>
    %68 = vector.extract_strided_slice %64 {offsets = [0, 0], sizes = [16, 8], strides = [1, 1]} : vector<16x32xf32> to vector<16x8xf32>
    %69 = arith.truncf %68 : vector<16x8xf32> to vector<16x8xbf16>
    %cst_39 = arith.constant dense<0.000000e+00> : vector<16x16xf32>
    %70 = tpu.matmul %67, %69, %cst_39 {dimension_numbers = #tpu.dot_dimension_numbers<[1], [1], [0], [0], [0, 0, 1, 0], [], []>} : vector<16x8xbf16>, vector<16x8xbf16>, vector<16x16xf32> -> vector<16x16xf32>
    %cst_40 = arith.constant dense<0xFF800000> : vector<16xf32>
    %71 = vector.multi_reduction <maximumf>, %70, %cst_40 [1] : vector<16x16xf32> to vector<16xf32>
    %72 = vector.shape_cast %71 : vector<16xf32> to vector<16x1xf32>
    %73 = vector.broadcast %72 : vector<16x1xf32> to vector<16x16xf32>
    %74 = arith.subf %70, %73 : vector<16x16xf32>
    %75 = math.exp %74 : vector<16x16xf32>
    %cst_41 = arith.constant dense<0.000000e+00> : vector<16xf32>
    %76 = vector.multi_reduction <add>, %75, %cst_41 [1] : vector<16x16xf32> to vector<16xf32>
    %77 = vector.shape_cast %76 : vector<16xf32> to vector<16x1xf32>
    %78 = tpu.reciprocal %77 {approx = true} : vector<16x1xf32> -> vector<16x1xf32>
    %79 = vector.broadcast %78 : vector<16x1xf32> to vector<16x16xf32>
    %80 = arith.mulf %75, %79 : vector<16x16xf32>
    %81 = arith.truncf %80 : vector<16x16xf32> to vector<16x16xbf16>
    %82 = vector.extract_strided_slice %65 {offsets = [0, 0], sizes = [16, 8], strides = [1, 1]} : vector<16x32xf32> to vector<16x8xf32>
    %83 = arith.truncf %82 : vector<16x8xf32> to vector<16x8xbf16>
    %cst_42 = arith.constant dense<0.000000e+00> : vector<16x8xf32>
    %84 = tpu.matmul %81, %83, %cst_42 {dimension_numbers = #tpu.dot_dimension_numbers<[1], [0], [0], [1], [0, 0, 1, 1], [], []>} : vector<16x16xbf16>, vector<16x8xbf16>, vector<16x8xf32> -> vector<16x8xf32>
    %85 = arith.truncf %84 : vector<16x8xf32> to vector<16x8xbf16>
    %c0_43 = arith.constant 0 : index
    %c0_44 = arith.constant 0 : index
    %86 = vector.load %arg42[%c0_43, %c0_44] : memref<16x32xbf16, #tpu.memory_space<vmem>>, vector<16x8xbf16>
    tpu.vector_store %arg42[%c0_43, %c0_44], %85 {strides = array<i32>} : memref<16x32xbf16, #tpu.memory_space<vmem>>, vector<16x8xbf16>,
    %87 = vector.extract_strided_slice %63 {offsets = [0, 8], sizes = [16, 8], strides = [1, 1]} : vector<16x32xf32> to vector<16x8xf32>
    %88 = arith.truncf %87 : vector<16x8xf32> to vector<16x8xbf16>
    %89 = vector.extract_strided_slice %64 {offsets = [0, 8], sizes = [16, 8], strides = [1, 1]} : vector<16x32xf32> to vector<16x8xf32>
    %90 = arith.truncf %89 : vector<16x8xf32> to vector<16x8xbf16>
    %cst_45 = arith.constant dense<0.000000e+00> : vector<16x16xf32>
    %91 = tpu.matmul %88, %90, %cst_45 {dimension_numbers = #tpu.dot_dimension_numbers<[1], [1], [0], [0], [0, 0, 1, 0], [], []>} : vector<16x8xbf16>, vector<16x8xbf16>, vector<16x16xf32> -> vector<16x16xf32>
    %cst_46 = arith.constant dense<0xFF800000> : vector<16xf32>
    %92 = vector.multi_reduction <maximumf>, %91, %cst_46 [1] : vector<16x16xf32> to vector<16xf32>
    %93 = vector.shape_cast %92 : vector<16xf32> to vector<16x1xf32>
    %94 = vector.broadcast %93 : vector<16x1xf32> to vector<16x16xf32>
    %95 = arith.subf %91, %94 : vector<16x16xf32>
    %96 = math.exp %95 : vector<16x16xf32>
    %cst_47 = arith.constant dense<0.000000e+00> : vector<16xf32>
    %97 = vector.multi_reduction <add>, %96, %cst_47 [1] : vector<16x16xf32> to vector<16xf32>
    %98 = vector.shape_cast %97 : vector<16xf32> to vector<16x1xf32>
    %99 = tpu.reciprocal %98 {approx = true} : vector<16x1xf32> -> vector<16x1xf32>
    %100 = vector.broadcast %99 : vector<16x1xf32> to vector<16x16xf32>
    %101 = arith.mulf %96, %100 : vector<16x16xf32>
    %102 = arith.truncf %101 : vector<16x16xf32> to vector<16x16xbf16>
    %103 = vector.extract_strided_slice %65 {offsets = [0, 8], sizes = [16, 8], strides = [1, 1]} : vector<16x32xf32> to vector<16x8xf32>
    %104 = arith.truncf %103 : vector<16x8xf32> to vector<16x8xbf16>
    %cst_48 = arith.constant dense<0.000000e+00> : vector<16x8xf32>
    %105 = tpu.matmul %102, %104, %cst_48 {dimension_numbers = #tpu.dot_dimension_numbers<[1], [0], [0], [1], [0, 0, 1, 1], [], []>} : vector<16x16xbf16>, vector<16x8xbf16>, vector<16x8xf32> -> vector<16x8xf32>
    %106 = arith.truncf %105 : vector<16x8xf32> to vector<16x8xbf16>
    %c0_49 = arith.constant 0 : index
    %c8 = arith.constant 8 : index
    %107 = vector.load %arg42[%c0_49, %c8] : memref<16x32xbf16, #tpu.memory_space<vmem>>, vector<16x8xbf16>
    tpu.vector_store %arg42[%c0_49, %c8], %106 {strides = array<i32>} : memref<16x32xbf16, #tpu.memory_space<vmem>>, vector<16x8xbf16>,
    %108 = vector.extract_strided_slice %63 {offsets = [0, 16], sizes = [16, 8], strides = [1, 1]} : vector<16x32xf32> to vector<16x8xf32>
    %109 = arith.truncf %108 : vector<16x8xf32> to vector<16x8xbf16>
    %110 = vector.extract_strided_slice %64 {offsets = [0, 16], sizes = [16, 8], strides = [1, 1]} : vector<16x32xf32> to vector<16x8xf32>
    %111 = arith.truncf %110 : vector<16x8xf32> to vector<16x8xbf16>
    %cst_50 = arith.constant dense<0.000000e+00> : vector<16x16xf32>
    %112 = tpu.matmul %109, %111, %cst_50 {dimension_numbers = #tpu.dot_dimension_numbers<[1], [1], [0], [0], [0, 0, 1, 0], [], []>} : vector<16x8xbf16>, vector<16x8xbf16>, vector<16x16xf32> -> vector<16x16xf32>
    %cst_51 = arith.constant dense<0xFF800000> : vector<16xf32>
    %113 = vector.multi_reduction <maximumf>, %112, %cst_51 [1] : vector<16x16xf32> to vector<16xf32>
    %114 = vector.shape_cast %113 : vector<16xf32> to vector<16x1xf32>
    %115 = vector.broadcast %114 : vector<16x1xf32> to vector<16x16xf32>
    %116 = arith.subf %112, %115 : vector<16x16xf32>
    %117 = math.exp %116 : vector<16x16xf32>
    %cst_52 = arith.constant dense<0.000000e+00> : vector<16xf32>
    %118 = vector.multi_reduction <add>, %117, %cst_52 [1] : vector<16x16xf32> to vector<16xf32>
    %119 = vector.shape_cast %118 : vector<16xf32> to vector<16x1xf32>
    %120 = tpu.reciprocal %119 {approx = true} : vector<16x1xf32> -> vector<16x1xf32>
    %121 = vector.broadcast %120 : vector<16x1xf32> to vector<16x16xf32>
    %122 = arith.mulf %117, %121 : vector<16x16xf32>
    %123 = arith.truncf %122 : vector<16x16xf32> to vector<16x16xbf16>
    %124 = vector.extract_strided_slice %65 {offsets = [0, 16], sizes = [16, 8], strides = [1, 1]} : vector<16x32xf32> to vector<16x8xf32>
    %125 = arith.truncf %124 : vector<16x8xf32> to vector<16x8xbf16>
    %cst_53 = arith.constant dense<0.000000e+00> : vector<16x8xf32>
    %126 = tpu.matmul %123, %125, %cst_53 {dimension_numbers = #tpu.dot_dimension_numbers<[1], [0], [0], [1], [0, 0, 1, 1], [], []>} : vector<16x16xbf16>, vector<16x8xbf16>, vector<16x8xf32> -> vector<16x8xf32>
    %127 = arith.truncf %126 : vector<16x8xf32> to vector<16x8xbf16>
    %c0_54 = arith.constant 0 : index
    %c16 = arith.constant 16 : index
    %128 = vector.load %arg42[%c0_54, %c16] : memref<16x32xbf16, #tpu.memory_space<vmem>>, vector<16x8xbf16>
    tpu.vector_store %arg42[%c0_54, %c16], %127 {strides = array<i32>} : memref<16x32xbf16, #tpu.memory_space<vmem>>, vector<16x8xbf16>,
    %129 = vector.extract_strided_slice %63 {offsets = [0, 24], sizes = [16, 8], strides = [1, 1]} : vector<16x32xf32> to vector<16x8xf32>
    %130 = arith.truncf %129 : vector<16x8xf32> to vector<16x8xbf16>
    %131 = vector.extract_strided_slice %64 {offsets = [0, 24], sizes = [16, 8], strides = [1, 1]} : vector<16x32xf32> to vector<16x8xf32>
    %132 = arith.truncf %131 : vector<16x8xf32> to vector<16x8xbf16>
    %cst_55 = arith.constant dense<0.000000e+00> : vector<16x16xf32>
    %133 = tpu.matmul %130, %132, %cst_55 {dimension_numbers = #tpu.dot_dimension_numbers<[1], [1], [0], [0], [0, 0, 1, 0], [], []>} : vector<16x8xbf16>, vector<16x8xbf16>, vector<16x16xf32> -> vector<16x16xf32>
    %cst_56 = arith.constant dense<0xFF800000> : vector<16xf32>
    %134 = vector.multi_reduction <maximumf>, %133, %cst_56 [1] : vector<16x16xf32> to vector<16xf32>
    %135 = vector.shape_cast %134 : vector<16xf32> to vector<16x1xf32>
    %136 = vector.broadcast %135 : vector<16x1xf32> to vector<16x16xf32>
    %137 = arith.subf %133, %136 : vector<16x16xf32>
    %138 = math.exp %137 : vector<16x16xf32>
    %cst_57 = arith.constant dense<0.000000e+00> : vector<16xf32>
    %139 = vector.multi_reduction <add>, %138, %cst_57 [1] : vector<16x16xf32> to vector<16xf32>
    %140 = vector.shape_cast %139 : vector<16xf32> to vector<16x1xf32>
    %141 = tpu.reciprocal %140 {approx = true} : vector<16x1xf32> -> vector<16x1xf32>
    %142 = vector.broadcast %141 : vector<16x1xf32> to vector<16x16xf32>
    %143 = arith.mulf %138, %142 : vector<16x16xf32>
    %144 = arith.truncf %143 : vector<16x16xf32> to vector<16x16xbf16>
    %145 = vector.extract_strided_slice %65 {offsets = [0, 24], sizes = [16, 8], strides = [1, 1]} : vector<16x32xf32> to vector<16x8xf32>
    %146 = arith.truncf %145 : vector<16x8xf32> to vector<16x8xbf16>
    %cst_58 = arith.constant dense<0.000000e+00> : vector<16x8xf32>
    %147 = tpu.matmul %144, %146, %cst_58 {dimension_numbers = #tpu.dot_dimension_numbers<[1], [0], [0], [1], [0, 0, 1, 1], [], []>} : vector<16x16xbf16>, vector<16x8xbf16>, vector<16x8xf32> -> vector<16x8xf32>
    %148 = arith.truncf %147 : vector<16x8xf32> to vector<16x8xbf16>
    %c0_59 = arith.constant 0 : index
    %c24 = arith.constant 24 : index
    %149 = vector.load %arg42[%c0_59, %c24] : memref<16x32xbf16, #tpu.memory_space<vmem>>, vector<16x8xbf16>
    tpu.vector_store %arg42[%c0_59, %c24], %148 {strides = array<i32>} : memref<16x32xbf16, #tpu.memory_space<vmem>>, vector<16x8xbf16>,
    %c0_60 = arith.constant 0 : index
    %c0_61 = arith.constant 0 : index
    %150 = vector.load %arg42[%c0_60, %c0_61] : memref<16x32xbf16, #tpu.memory_space<vmem>>, vector<16x32xbf16>
    %cst_62 = arith.constant dense<0.000000e+00> : vector<16x32xf32>
    %151 = tpu.matmul %150, %59, %cst_62 {dimension_numbers = #tpu.dot_dimension_numbers<[1], [0], [0], [1], [0, 0, 1, 1], [], []>} : vector<16x32xbf16>, vector<32x32xbf16>, vector<16x32xf32> -> vector<16x32xf32>
    %152 = vector.broadcast %60 : vector<1x32xf32> to vector<16x32xf32>
    %153 = arith.addf %151, %152 : vector<16x32xf32>
    %c0_63 = arith.constant 0 : index
    %c0_64 = arith.constant 0 : index
    %c0_65 = arith.constant 0 : index
    %c0_66 = arith.constant 0 : index
    %154 = vector.load %arg5[%c0_63, %c0_64, %c0_65, %c0_66] : memref<1x8x16x32xbf16, #tpu.memory_space<vmem>>, vector<1x8x16x32xbf16>
    %155 = vector.shape_cast %154 : vector<1x8x16x32xbf16> to vector<8x16x32xbf16>
    %156 = vector.shape_cast %155 : vector<8x16x32xbf16> to vector<128x32xbf16>
    %157 = arith.extf %156 : vector<128x32xbf16> to vector<128x32xf32>
    %c0_67 = arith.constant 0 : index
    %c0_68 = arith.constant 0 : index
    %158 = vector.load %arg7[%c0_67, %c0_68] : memref<1x32xf32, #tpu.memory_space<vmem>>, vector<1x32xf32>
    %c0_69 = arith.constant 0 : index
    %c0_70 = arith.constant 0 : index
    %159 = vector.load %arg8[%c0_69, %c0_70] : memref<1x32xf32, #tpu.memory_space<vmem>>, vector<1x32xf32>
    %cst_71 = arith.constant dense<0.000000e+00> : vector<128xf32>
    %160 = vector.multi_reduction <add>, %157, %cst_71 [1] : vector<128x32xf32> to vector<128xf32>
    %161 = vector.shape_cast %160 : vector<128xf32> to vector<128x1xf32>
    %cst_72 = arith.constant 3.200000e+01 : f32
    %162 = vector.broadcast %cst_72 : f32 to vector<128x1xf32>
    %163 = arith.divf %161, %162 : vector<128x1xf32>
    %164 = vector.broadcast %163 : vector<128x1xf32> to vector<128x32xf32>
    %165 = arith.subf %157, %164 : vector<128x32xf32>
    %166 = arith.mulf %165, %165 : vector<128x32xf32>
    %cst_73 = arith.constant dense<0.000000e+00> : vector<128xf32>
    %167 = vector.multi_reduction <add>, %166, %cst_73 [1] : vector<128x32xf32> to vector<128xf32>
    %168 = vector.shape_cast %167 : vector<128xf32> to vector<128x1xf32>
    %cst_74 = arith.constant 3.200000e+01 : f32
    %169 = vector.broadcast %cst_74 : f32 to vector<128x1xf32>
    %170 = arith.divf %168, %169 : vector<128x1xf32>
    %171 = vector.broadcast %163 : vector<128x1xf32> to vector<128x32xf32>
    %172 = arith.subf %157, %171 : vector<128x32xf32>
    %cst_75 = arith.constant 9.99999974E-6 : f32
    %173 = vector.broadcast %cst_75 : f32 to vector<128x1xf32>
    %174 = arith.addf %170, %173 : vector<128x1xf32>
    %175 = math.rsqrt %174 : vector<128x1xf32>
    %176 = vector.broadcast %175 : vector<128x1xf32> to vector<128x32xf32>
    %177 = arith.mulf %172, %176 : vector<128x32xf32>
    %178 = vector.broadcast %158 : vector<1x32xf32> to vector<128x32xf32>
    %179 = arith.mulf %177, %178 : vector<128x32xf32>
    %180 = vector.broadcast %159 : vector<1x32xf32> to vector<128x32xf32>
    %181 = arith.addf %179, %180 : vector<128x32xf32>
    %182 = arith.truncf %181 : vector<128x32xf32> to vector<128x32xbf16>
    %c0_76 = arith.constant 0 : index
    %c0_77 = arith.constant 0 : index
    %183 = vector.load %arg29[%c0_76, %c0_77] : memref<32x32xbf16, #tpu.memory_space<vmem>>, vector<32x32xbf16>
    %c0_78 = arith.constant 0 : index
    %c0_79 = arith.constant 0 : index
    %184 = vector.load %arg30[%c0_78, %c0_79] : memref<32x32xbf16, #tpu.memory_space<vmem>>, vector<32x32xbf16>
    %c0_80 = arith.constant 0 : index
    %c0_81 = arith.constant 0 : index
    %185 = vector.load %arg31[%c0_80, %c0_81] : memref<1x32xf32, #tpu.memory_space<vmem>>, vector<1x32xf32>
    %cst_82 = arith.constant dense<0.000000e+00> : vector<16x32xf32>
    %186 = tpu.matmul %54, %184, %cst_82 {dimension_numbers = #tpu.dot_dimension_numbers<[1], [0], [0], [1], [0, 0, 1, 1], [], []>} : vector<16x32xbf16>, vector<32x32xbf16>, vector<16x32xf32> -> vector<16x32xf32>
    %187 = vector.broadcast %185 : vector<1x32xf32> to vector<16x32xf32>
    %188 = arith.addf %186, %187 : vector<16x32xf32>
    %cst_83 = arith.constant dense<0.000000e+00> : vector<128x32xf32>
    %189 = tpu.matmul %182, %183, %cst_83 {dimension_numbers = #tpu.dot_dimension_numbers<[1], [0], [0], [1], [0, 0, 1, 1], [], []>} : vector<128x32xbf16>, vector<32x32xbf16>, vector<128x32xf32> -> vector<128x32xf32>
    %190 = vector.shape_cast %189 : vector<128x32xf32> to vector<8x16x32xf32>
    %191 = vector.shape_cast %188 : vector<16x32xf32> to vector<1x16x32xf32>
    %192 = vector.broadcast %191 : vector<1x16x32xf32> to vector<8x16x32xf32>
    %193 = arith.addf %190, %192 : vector<8x16x32xf32>
    %cst_84 = arith.constant 2.000000e-01 : f32
    %194 = vector.broadcast %cst_84 : f32 to vector<8x16x32xf32>
    %195 = arith.mulf %194, %193 : vector<8x16x32xf32>
    %196 = arith.maximumf %193, %195 : vector<8x16x32xf32>
    %cst_85 = arith.constant dense<0xFF800000> : vector<16x32xf32>
    %197 = vector.multi_reduction <maximumf>, %196, %cst_85 [0] : vector<8x16x32xf32> to vector<16x32xf32>
    %198 = arith.truncf %153 : vector<16x32xf32> to vector<16x32xbf16>
    %c0_86 = arith.constant 0 : index
    %c0_87 = arith.constant 0 : index
    %199 = vector.load %arg32[%c0_86, %c0_87] : memref<32x32xbf16, #tpu.memory_space<vmem>>, vector<32x32xbf16>
    %cst_88 = arith.constant dense<0.000000e+00> : vector<16x32xf32>
    %200 = tpu.matmul %198, %199, %cst_88 {dimension_numbers = #tpu.dot_dimension_numbers<[1], [0], [0], [1], [0, 0, 1, 1], [], []>} : vector<16x32xbf16>, vector<32x32xbf16>, vector<16x32xf32> -> vector<16x32xf32>
    %201 = arith.truncf %197 : vector<16x32xf32> to vector<16x32xbf16>
    %c0_89 = arith.constant 0 : index
    %c0_90 = arith.constant 0 : index
    %202 = vector.load %arg33[%c0_89, %c0_90] : memref<32x32xbf16, #tpu.memory_space<vmem>>, vector<32x32xbf16>
    %cst_91 = arith.constant dense<0.000000e+00> : vector<16x32xf32>
    %203 = tpu.matmul %201, %202, %cst_91 {dimension_numbers = #tpu.dot_dimension_numbers<[1], [0], [0], [1], [0, 0, 1, 1], [], []>} : vector<16x32xbf16>, vector<32x32xbf16>, vector<16x32xf32> -> vector<16x32xf32>
    %204 = arith.addf %200, %203 : vector<16x32xf32>
    %c0_92 = arith.constant 0 : index
    %c0_93 = arith.constant 0 : index
    %205 = vector.load %arg34[%c0_92, %c0_93] : memref<1x32xf32, #tpu.memory_space<vmem>>, vector<1x32xf32>
    %206 = vector.broadcast %205 : vector<1x32xf32> to vector<16x32xf32>
    %207 = arith.addf %204, %206 : vector<16x32xf32>
    %208 = arith.addf %1, %207 : vector<16x32xf32>
    %c0_94 = arith.constant 0 : index
    %c0_95 = arith.constant 0 : index
    %209 = vector.load %arg14[%c0_94, %c0_95] : memref<1x32xf32, #tpu.memory_space<vmem>>, vector<1x32xf32>
    %c0_96 = arith.constant 0 : index
    %c0_97 = arith.constant 0 : index
    %210 = vector.load %arg15[%c0_96, %c0_97] : memref<1x32xf32, #tpu.memory_space<vmem>>, vector<1x32xf32>
    %cst_98 = arith.constant dense<0.000000e+00> : vector<16xf32>
    %211 = vector.multi_reduction <add>, %208, %cst_98 [1] : vector<16x32xf32> to vector<16xf32>
    %212 = vector.shape_cast %211 : vector<16xf32> to vector<16x1xf32>
    %cst_99 = arith.constant 3.200000e+01 : f32
    %213 = vector.broadcast %cst_99 : f32 to vector<16x1xf32>
    %214 = arith.divf %212, %213 : vector<16x1xf32>
    %215 = vector.broadcast %214 : vector<16x1xf32> to vector<16x32xf32>
    %216 = arith.subf %208, %215 : vector<16x32xf32>
    %217 = arith.mulf %216, %216 : vector<16x32xf32>
    %cst_100 = arith.constant dense<0.000000e+00> : vector<16xf32>
    %218 = vector.multi_reduction <add>, %217, %cst_100 [1] : vector<16x32xf32> to vector<16xf32>
    %219 = vector.shape_cast %218 : vector<16xf32> to vector<16x1xf32>
    %cst_101 = arith.constant 3.200000e+01 : f32
    %220 = vector.broadcast %cst_101 : f32 to vector<16x1xf32>
    %221 = arith.divf %219, %220 : vector<16x1xf32>
    %222 = vector.broadcast %214 : vector<16x1xf32> to vector<16x32xf32>
    %223 = arith.subf %208, %222 : vector<16x32xf32>
    %cst_102 = arith.constant 9.99999974E-6 : f32
    %224 = vector.broadcast %cst_102 : f32 to vector<16x1xf32>
    %225 = arith.addf %221, %224 : vector<16x1xf32>
    %226 = math.rsqrt %225 : vector<16x1xf32>
    %227 = vector.broadcast %226 : vector<16x1xf32> to vector<16x32xf32>
    %228 = arith.mulf %223, %227 : vector<16x32xf32>
    %229 = vector.broadcast %209 : vector<1x32xf32> to vector<16x32xf32>
    %230 = arith.mulf %228, %229 : vector<16x32xf32>
    %231 = vector.broadcast %210 : vector<1x32xf32> to vector<16x32xf32>
    %232 = arith.addf %230, %231 : vector<16x32xf32>
    %c0_103 = arith.constant 0 : index
    %c0_104 = arith.constant 0 : index
    %233 = vector.load %arg16[%c0_103, %c0_104] : memref<1x32xf32, #tpu.memory_space<vmem>>, vector<1x32xf32>
    %c0_105 = arith.constant 0 : index
    %c0_106 = arith.constant 0 : index
    %234 = vector.load %arg17[%c0_105, %c0_106] : memref<1x32xf32, #tpu.memory_space<vmem>>, vector<1x32xf32>
    %cst_107 = arith.constant dense<0.000000e+00> : vector<16xf32>
    %235 = vector.multi_reduction <add>, %5, %cst_107 [1] : vector<16x32xf32> to vector<16xf32>
    %236 = vector.shape_cast %235 : vector<16xf32> to vector<16x1xf32>
    %cst_108 = arith.constant 3.200000e+01 : f32
    %237 = vector.broadcast %cst_108 : f32 to vector<16x1xf32>
    %238 = arith.divf %236, %237 : vector<16x1xf32>
    %239 = vector.broadcast %238 : vector<16x1xf32> to vector<16x32xf32>
    %240 = arith.subf %5, %239 : vector<16x32xf32>
    %241 = arith.mulf %240, %240 : vector<16x32xf32>
    %cst_109 = arith.constant dense<0.000000e+00> : vector<16xf32>
    %242 = vector.multi_reduction <add>, %241, %cst_109 [1] : vector<16x32xf32> to vector<16xf32>
    %243 = vector.shape_cast %242 : vector<16xf32> to vector<16x1xf32>
    %cst_110 = arith.constant 3.200000e+01 : f32
    %244 = vector.broadcast %cst_110 : f32 to vector<16x1xf32>
    %245 = arith.divf %243, %244 : vector<16x1xf32>
    %246 = vector.broadcast %238 : vector<16x1xf32> to vector<16x32xf32>
    %247 = arith.subf %5, %246 : vector<16x32xf32>
    %cst_111 = arith.constant 9.99999974E-6 : f32
    %248 = vector.broadcast %cst_111 : f32 to vector<16x1xf32>
    %249 = arith.addf %245, %248 : vector<16x1xf32>
    %250 = math.rsqrt %249 : vector<16x1xf32>
    %251 = vector.broadcast %250 : vector<16x1xf32> to vector<16x32xf32>
    %252 = arith.mulf %247, %251 : vector<16x32xf32>
    %253 = vector.broadcast %233 : vector<1x32xf32> to vector<16x32xf32>
    %254 = arith.mulf %252, %253 : vector<16x32xf32>
    %255 = vector.broadcast %234 : vector<1x32xf32> to vector<16x32xf32>
    %256 = arith.addf %254, %255 : vector<16x32xf32>
    %257 = arith.truncf %232 : vector<16x32xf32> to vector<16x32xbf16>
    %258 = arith.truncf %256 : vector<16x32xf32> to vector<16x32xbf16>
    %c0_112 = arith.constant 0 : index
    %c0_113 = arith.constant 0 : index
    %259 = vector.load %arg18[%c0_112, %c0_113] : memref<32x32xbf16, #tpu.memory_space<vmem>>, vector<32x32xbf16>
    %c0_114 = arith.constant 0 : index
    %c0_115 = arith.constant 0 : index
    %260 = vector.load %arg19[%c0_114, %c0_115] : memref<32x32xbf16, #tpu.memory_space<vmem>>, vector<32x32xbf16>
    %c0_116 = arith.constant 0 : index
    %c0_117 = arith.constant 0 : index
    %261 = vector.load %arg20[%c0_116, %c0_117] : memref<32x32xbf16, #tpu.memory_space<vmem>>, vector<32x32xbf16>
    %c0_118 = arith.constant 0 : index
    %c0_119 = arith.constant 0 : index
    %262 = vector.load %arg21[%c0_118, %c0_119] : memref<32x32xbf16, #tpu.memory_space<vmem>>, vector<32x32xbf16>
    %c0_120 = arith.constant 0 : index
    %c0_121 = arith.constant 0 : index
    %263 = vector.load %arg22[%c0_120, %c0_121] : memref<1x32xf32, #tpu.memory_space<vmem>>, vector<1x32xf32>
    %cst_122 = arith.constant dense<0.000000e+00> : vector<16x32xf32>
    %264 = tpu.matmul %257, %259, %cst_122 {dimension_numbers = #tpu.dot_dimension_numbers<[1], [0], [0], [1], [0, 0, 1, 1], [], []>} : vector<16x32xbf16>, vector<32x32xbf16>, vector<16x32xf32> -> vector<16x32xf32>
    %cst_123 = arith.constant 0.353553385 : f32
    %265 = vector.broadcast %cst_123 : f32 to vector<16x32xf32>
    %266 = arith.mulf %264, %265 : vector<16x32xf32>
    %cst_124 = arith.constant dense<0.000000e+00> : vector<16x32xf32>
    %267 = tpu.matmul %258, %260, %cst_124 {dimension_numbers = #tpu.dot_dimension_numbers<[1], [0], [0], [1], [0, 0, 1, 1], [], []>} : vector<16x32xbf16>, vector<32x32xbf16>, vector<16x32xf32> -> vector<16x32xf32>
    %cst_125 = arith.constant dense<0.000000e+00> : vector<16x32xf32>
    %268 = tpu.matmul %258, %261, %cst_125 {dimension_numbers = #tpu.dot_dimension_numbers<[1], [0], [0], [1], [0, 0, 1, 1], [], []>} : vector<16x32xbf16>, vector<32x32xbf16>, vector<16x32xf32> -> vector<16x32xf32>
    %269 = vector.extract_strided_slice %266 {offsets = [0, 0], sizes = [16, 8], strides = [1, 1]} : vector<16x32xf32> to vector<16x8xf32>
    %270 = arith.truncf %269 : vector<16x8xf32> to vector<16x8xbf16>
    %271 = vector.extract_strided_slice %267 {offsets = [0, 0], sizes = [16, 8], strides = [1, 1]} : vector<16x32xf32> to vector<16x8xf32>
    %272 = arith.truncf %271 : vector<16x8xf32> to vector<16x8xbf16>
    %cst_126 = arith.constant dense<0.000000e+00> : vector<16x16xf32>
    %273 = tpu.matmul %270, %272, %cst_126 {dimension_numbers = #tpu.dot_dimension_numbers<[1], [1], [0], [0], [0, 0, 1, 0], [], []>} : vector<16x8xbf16>, vector<16x8xbf16>, vector<16x16xf32> -> vector<16x16xf32>
    %cst_127 = arith.constant dense<0xFF800000> : vector<16xf32>
    %274 = vector.multi_reduction <maximumf>, %273, %cst_127 [1] : vector<16x16xf32> to vector<16xf32>
    %275 = vector.shape_cast %274 : vector<16xf32> to vector<16x1xf32>
    %276 = vector.broadcast %275 : vector<16x1xf32> to vector<16x16xf32>
    %277 = arith.subf %273, %276 : vector<16x16xf32>
    %278 = math.exp %277 : vector<16x16xf32>
    %cst_128 = arith.constant dense<0.000000e+00> : vector<16xf32>
    %279 = vector.multi_reduction <add>, %278, %cst_128 [1] : vector<16x16xf32> to vector<16xf32>
    %280 = vector.shape_cast %279 : vector<16xf32> to vector<16x1xf32>
    %281 = tpu.reciprocal %280 {approx = true} : vector<16x1xf32> -> vector<16x1xf32>
    %282 = vector.broadcast %281 : vector<16x1xf32> to vector<16x16xf32>
    %283 = arith.mulf %278, %282 : vector<16x16xf32>
    %284 = arith.truncf %283 : vector<16x16xf32> to vector<16x16xbf16>
    %285 = vector.extract_strided_slice %268 {offsets = [0, 0], sizes = [16, 8], strides = [1, 1]} : vector<16x32xf32> to vector<16x8xf32>
    %286 = arith.truncf %285 : vector<16x8xf32> to vector<16x8xbf16>
    %cst_129 = arith.constant dense<0.000000e+00> : vector<16x8xf32>
    %287 = tpu.matmul %284, %286, %cst_129 {dimension_numbers = #tpu.dot_dimension_numbers<[1], [0], [0], [1], [0, 0, 1, 1], [], []>} : vector<16x16xbf16>, vector<16x8xbf16>, vector<16x8xf32> -> vector<16x8xf32>
    %288 = arith.truncf %287 : vector<16x8xf32> to vector<16x8xbf16>
    %c0_130 = arith.constant 0 : index
    %c0_131 = arith.constant 0 : index
    %289 = vector.load %arg42[%c0_130, %c0_131] : memref<16x32xbf16, #tpu.memory_space<vmem>>, vector<16x8xbf16>
    tpu.vector_store %arg42[%c0_130, %c0_131], %288 {strides = array<i32>} : memref<16x32xbf16, #tpu.memory_space<vmem>>, vector<16x8xbf16>,
    %290 = vector.extract_strided_slice %266 {offsets = [0, 8], sizes = [16, 8], strides = [1, 1]} : vector<16x32xf32> to vector<16x8xf32>
    %291 = arith.truncf %290 : vector<16x8xf32> to vector<16x8xbf16>
    %292 = vector.extract_strided_slice %267 {offsets = [0, 8], sizes = [16, 8], strides = [1, 1]} : vector<16x32xf32> to vector<16x8xf32>
    %293 = arith.truncf %292 : vector<16x8xf32> to vector<16x8xbf16>
    %cst_132 = arith.constant dense<0.000000e+00> : vector<16x16xf32>
    %294 = tpu.matmul %291, %293, %cst_132 {dimension_numbers = #tpu.dot_dimension_numbers<[1], [1], [0], [0], [0, 0, 1, 0], [], []>} : vector<16x8xbf16>, vector<16x8xbf16>, vector<16x16xf32> -> vector<16x16xf32>
    %cst_133 = arith.constant dense<0xFF800000> : vector<16xf32>
    %295 = vector.multi_reduction <maximumf>, %294, %cst_133 [1] : vector<16x16xf32> to vector<16xf32>
    %296 = vector.shape_cast %295 : vector<16xf32> to vector<16x1xf32>
    %297 = vector.broadcast %296 : vector<16x1xf32> to vector<16x16xf32>
    %298 = arith.subf %294, %297 : vector<16x16xf32>
    %299 = math.exp %298 : vector<16x16xf32>
    %cst_134 = arith.constant dense<0.000000e+00> : vector<16xf32>
    %300 = vector.multi_reduction <add>, %299, %cst_134 [1] : vector<16x16xf32> to vector<16xf32>
    %301 = vector.shape_cast %300 : vector<16xf32> to vector<16x1xf32>
    %302 = tpu.reciprocal %301 {approx = true} : vector<16x1xf32> -> vector<16x1xf32>
    %303 = vector.broadcast %302 : vector<16x1xf32> to vector<16x16xf32>
    %304 = arith.mulf %299, %303 : vector<16x16xf32>
    %305 = arith.truncf %304 : vector<16x16xf32> to vector<16x16xbf16>
    %306 = vector.extract_strided_slice %268 {offsets = [0, 8], sizes = [16, 8], strides = [1, 1]} : vector<16x32xf32> to vector<16x8xf32>
    %307 = arith.truncf %306 : vector<16x8xf32> to vector<16x8xbf16>
    %cst_135 = arith.constant dense<0.000000e+00> : vector<16x8xf32>
    %308 = tpu.matmul %305, %307, %cst_135 {dimension_numbers = #tpu.dot_dimension_numbers<[1], [0], [0], [1], [0, 0, 1, 1], [], []>} : vector<16x16xbf16>, vector<16x8xbf16>, vector<16x8xf32> -> vector<16x8xf32>
    %309 = arith.truncf %308 : vector<16x8xf32> to vector<16x8xbf16>
    %c0_136 = arith.constant 0 : index
    %c8_137 = arith.constant 8 : index
    %310 = vector.load %arg42[%c0_136, %c8_137] : memref<16x32xbf16, #tpu.memory_space<vmem>>, vector<16x8xbf16>
    tpu.vector_store %arg42[%c0_136, %c8_137], %309 {strides = array<i32>} : memref<16x32xbf16, #tpu.memory_space<vmem>>, vector<16x8xbf16>,
    %311 = vector.extract_strided_slice %266 {offsets = [0, 16], sizes = [16, 8], strides = [1, 1]} : vector<16x32xf32> to vector<16x8xf32>
    %312 = arith.truncf %311 : vector<16x8xf32> to vector<16x8xbf16>
    %313 = vector.extract_strided_slice %267 {offsets = [0, 16], sizes = [16, 8], strides = [1, 1]} : vector<16x32xf32> to vector<16x8xf32>
    %314 = arith.truncf %313 : vector<16x8xf32> to vector<16x8xbf16>
    %cst_138 = arith.constant dense<0.000000e+00> : vector<16x16xf32>
    %315 = tpu.matmul %312, %314, %cst_138 {dimension_numbers = #tpu.dot_dimension_numbers<[1], [1], [0], [0], [0, 0, 1, 0], [], []>} : vector<16x8xbf16>, vector<16x8xbf16>, vector<16x16xf32> -> vector<16x16xf32>
    %cst_139 = arith.constant dense<0xFF800000> : vector<16xf32>
    %316 = vector.multi_reduction <maximumf>, %315, %cst_139 [1] : vector<16x16xf32> to vector<16xf32>
    %317 = vector.shape_cast %316 : vector<16xf32> to vector<16x1xf32>
    %318 = vector.broadcast %317 : vector<16x1xf32> to vector<16x16xf32>
    %319 = arith.subf %315, %318 : vector<16x16xf32>
    %320 = math.exp %319 : vector<16x16xf32>
    %cst_140 = arith.constant dense<0.000000e+00> : vector<16xf32>
    %321 = vector.multi_reduction <add>, %320, %cst_140 [1] : vector<16x16xf32> to vector<16xf32>
    %322 = vector.shape_cast %321 : vector<16xf32> to vector<16x1xf32>
    %323 = tpu.reciprocal %322 {approx = true} : vector<16x1xf32> -> vector<16x1xf32>
    %324 = vector.broadcast %323 : vector<16x1xf32> to vector<16x16xf32>
    %325 = arith.mulf %320, %324 : vector<16x16xf32>
    %326 = arith.truncf %325 : vector<16x16xf32> to vector<16x16xbf16>
    %327 = vector.extract_strided_slice %268 {offsets = [0, 16], sizes = [16, 8], strides = [1, 1]} : vector<16x32xf32> to vector<16x8xf32>
    %328 = arith.truncf %327 : vector<16x8xf32> to vector<16x8xbf16>
    %cst_141 = arith.constant dense<0.000000e+00> : vector<16x8xf32>
    %329 = tpu.matmul %326, %328, %cst_141 {dimension_numbers = #tpu.dot_dimension_numbers<[1], [0], [0], [1], [0, 0, 1, 1], [], []>} : vector<16x16xbf16>, vector<16x8xbf16>, vector<16x8xf32> -> vector<16x8xf32>
    %330 = arith.truncf %329 : vector<16x8xf32> to vector<16x8xbf16>
    %c0_142 = arith.constant 0 : index
    %c16_143 = arith.constant 16 : index
    %331 = vector.load %arg42[%c0_142, %c16_143] : memref<16x32xbf16, #tpu.memory_space<vmem>>, vector<16x8xbf16>
    tpu.vector_store %arg42[%c0_142, %c16_143], %330 {strides = array<i32>} : memref<16x32xbf16, #tpu.memory_space<vmem>>, vector<16x8xbf16>,
    %332 = vector.extract_strided_slice %266 {offsets = [0, 24], sizes = [16, 8], strides = [1, 1]} : vector<16x32xf32> to vector<16x8xf32>
    %333 = arith.truncf %332 : vector<16x8xf32> to vector<16x8xbf16>
    %334 = vector.extract_strided_slice %267 {offsets = [0, 24], sizes = [16, 8], strides = [1, 1]} : vector<16x32xf32> to vector<16x8xf32>
    %335 = arith.truncf %334 : vector<16x8xf32> to vector<16x8xbf16>
    %cst_144 = arith.constant dense<0.000000e+00> : vector<16x16xf32>
    %336 = tpu.matmul %333, %335, %cst_144 {dimension_numbers = #tpu.dot_dimension_numbers<[1], [1], [0], [0], [0, 0, 1, 0], [], []>} : vector<16x8xbf16>, vector<16x8xbf16>, vector<16x16xf32> -> vector<16x16xf32>
    %cst_145 = arith.constant dense<0xFF800000> : vector<16xf32>
    %337 = vector.multi_reduction <maximumf>, %336, %cst_145 [1] : vector<16x16xf32> to vector<16xf32>
    %338 = vector.shape_cast %337 : vector<16xf32> to vector<16x1xf32>
    %339 = vector.broadcast %338 : vector<16x1xf32> to vector<16x16xf32>
    %340 = arith.subf %336, %339 : vector<16x16xf32>
    %341 = math.exp %340 : vector<16x16xf32>
    %cst_146 = arith.constant dense<0.000000e+00> : vector<16xf32>
    %342 = vector.multi_reduction <add>, %341, %cst_146 [1] : vector<16x16xf32> to vector<16xf32>
    %343 = vector.shape_cast %342 : vector<16xf32> to vector<16x1xf32>
    %344 = tpu.reciprocal %343 {approx = true} : vector<16x1xf32> -> vector<16x1xf32>
    %345 = vector.broadcast %344 : vector<16x1xf32> to vector<16x16xf32>
    %346 = arith.mulf %341, %345 : vector<16x16xf32>
    %347 = arith.truncf %346 : vector<16x16xf32> to vector<16x16xbf16>
    %348 = vector.extract_strided_slice %268 {offsets = [0, 24], sizes = [16, 8], strides = [1, 1]} : vector<16x32xf32> to vector<16x8xf32>
    %349 = arith.truncf %348 : vector<16x8xf32> to vector<16x8xbf16>
    %cst_147 = arith.constant dense<0.000000e+00> : vector<16x8xf32>
    %350 = tpu.matmul %347, %349, %cst_147 {dimension_numbers = #tpu.dot_dimension_numbers<[1], [0], [0], [1], [0, 0, 1, 1], [], []>} : vector<16x16xbf16>, vector<16x8xbf16>, vector<16x8xf32> -> vector<16x8xf32>
    %351 = arith.truncf %350 : vector<16x8xf32> to vector<16x8xbf16>
    %c0_148 = arith.constant 0 : index
    %c24_149 = arith.constant 24 : index
    %352 = vector.load %arg42[%c0_148, %c24_149] : memref<16x32xbf16, #tpu.memory_space<vmem>>, vector<16x8xbf16>
    tpu.vector_store %arg42[%c0_148, %c24_149], %351 {strides = array<i32>} : memref<16x32xbf16, #tpu.memory_space<vmem>>, vector<16x8xbf16>,
    %c0_150 = arith.constant 0 : index
    %c0_151 = arith.constant 0 : index
    %353 = vector.load %arg42[%c0_150, %c0_151] : memref<16x32xbf16, #tpu.memory_space<vmem>>, vector<16x32xbf16>
    %cst_152 = arith.constant dense<0.000000e+00> : vector<16x32xf32>
    %354 = tpu.matmul %353, %262, %cst_152 {dimension_numbers = #tpu.dot_dimension_numbers<[1], [0], [0], [1], [0, 0, 1, 1], [], []>} : vector<16x32xbf16>, vector<32x32xbf16>, vector<16x32xf32> -> vector<16x32xf32>
    %355 = vector.broadcast %263 : vector<1x32xf32> to vector<16x32xf32>
    %356 = arith.addf %354, %355 : vector<16x32xf32>
    %c0_153 = arith.constant 0 : index
    %c0_154 = arith.constant 0 : index
    %c0_155 = arith.constant 0 : index
    %c0_156 = arith.constant 0 : index
    %357 = vector.load %arg6[%c0_153, %c0_154, %c0_155, %c0_156] : memref<1x8x16x32xbf16, #tpu.memory_space<vmem>>, vector<1x8x16x32xbf16>
    %358 = vector.shape_cast %357 : vector<1x8x16x32xbf16> to vector<8x16x32xbf16>
    %359 = vector.shape_cast %358 : vector<8x16x32xbf16> to vector<128x32xbf16>
    %360 = arith.extf %359 : vector<128x32xbf16> to vector<128x32xf32>
    %c0_157 = arith.constant 0 : index
    %c0_158 = arith.constant 0 : index
    %361 = vector.load %arg16[%c0_157, %c0_158] : memref<1x32xf32, #tpu.memory_space<vmem>>, vector<1x32xf32>
    %c0_159 = arith.constant 0 : index
    %c0_160 = arith.constant 0 : index
    %362 = vector.load %arg17[%c0_159, %c0_160] : memref<1x32xf32, #tpu.memory_space<vmem>>, vector<1x32xf32>
    %cst_161 = arith.constant dense<0.000000e+00> : vector<128xf32>
    %363 = vector.multi_reduction <add>, %360, %cst_161 [1] : vector<128x32xf32> to vector<128xf32>
    %364 = vector.shape_cast %363 : vector<128xf32> to vector<128x1xf32>
    %cst_162 = arith.constant 3.200000e+01 : f32
    %365 = vector.broadcast %cst_162 : f32 to vector<128x1xf32>
    %366 = arith.divf %364, %365 : vector<128x1xf32>
    %367 = vector.broadcast %366 : vector<128x1xf32> to vector<128x32xf32>
    %368 = arith.subf %360, %367 : vector<128x32xf32>
    %369 = arith.mulf %368, %368 : vector<128x32xf32>
    %cst_163 = arith.constant dense<0.000000e+00> : vector<128xf32>
    %370 = vector.multi_reduction <add>, %369, %cst_163 [1] : vector<128x32xf32> to vector<128xf32>
    %371 = vector.shape_cast %370 : vector<128xf32> to vector<128x1xf32>
    %cst_164 = arith.constant 3.200000e+01 : f32
    %372 = vector.broadcast %cst_164 : f32 to vector<128x1xf32>
    %373 = arith.divf %371, %372 : vector<128x1xf32>
    %374 = vector.broadcast %366 : vector<128x1xf32> to vector<128x32xf32>
    %375 = arith.subf %360, %374 : vector<128x32xf32>
    %cst_165 = arith.constant 9.99999974E-6 : f32
    %376 = vector.broadcast %cst_165 : f32 to vector<128x1xf32>
    %377 = arith.addf %373, %376 : vector<128x1xf32>
    %378 = math.rsqrt %377 : vector<128x1xf32>
    %379 = vector.broadcast %378 : vector<128x1xf32> to vector<128x32xf32>
    %380 = arith.mulf %375, %379 : vector<128x32xf32>
    %381 = vector.broadcast %361 : vector<1x32xf32> to vector<128x32xf32>
    %382 = arith.mulf %380, %381 : vector<128x32xf32>
    %383 = vector.broadcast %362 : vector<1x32xf32> to vector<128x32xf32>
    %384 = arith.addf %382, %383 : vector<128x32xf32>
    %385 = arith.truncf %384 : vector<128x32xf32> to vector<128x32xbf16>
    %c0_166 = arith.constant 0 : index
    %c0_167 = arith.constant 0 : index
    %386 = vector.load %arg35[%c0_166, %c0_167] : memref<32x32xbf16, #tpu.memory_space<vmem>>, vector<32x32xbf16>
    %c0_168 = arith.constant 0 : index
    %c0_169 = arith.constant 0 : index
    %387 = vector.load %arg36[%c0_168, %c0_169] : memref<32x32xbf16, #tpu.memory_space<vmem>>, vector<32x32xbf16>
    %c0_170 = arith.constant 0 : index
    %c0_171 = arith.constant 0 : index
    %388 = vector.load %arg37[%c0_170, %c0_171] : memref<1x32xf32, #tpu.memory_space<vmem>>, vector<1x32xf32>
    %cst_172 = arith.constant dense<0.000000e+00> : vector<16x32xf32>
    %389 = tpu.matmul %257, %387, %cst_172 {dimension_numbers = #tpu.dot_dimension_numbers<[1], [0], [0], [1], [0, 0, 1, 1], [], []>} : vector<16x32xbf16>, vector<32x32xbf16>, vector<16x32xf32> -> vector<16x32xf32>
    %390 = vector.broadcast %388 : vector<1x32xf32> to vector<16x32xf32>
    %391 = arith.addf %389, %390 : vector<16x32xf32>
    %cst_173 = arith.constant dense<0.000000e+00> : vector<128x32xf32>
    %392 = tpu.matmul %385, %386, %cst_173 {dimension_numbers = #tpu.dot_dimension_numbers<[1], [0], [0], [1], [0, 0, 1, 1], [], []>} : vector<128x32xbf16>, vector<32x32xbf16>, vector<128x32xf32> -> vector<128x32xf32>
    %393 = vector.shape_cast %392 : vector<128x32xf32> to vector<8x16x32xf32>
    %394 = vector.shape_cast %391 : vector<16x32xf32> to vector<1x16x32xf32>
    %395 = vector.broadcast %394 : vector<1x16x32xf32> to vector<8x16x32xf32>
    %396 = arith.addf %393, %395 : vector<8x16x32xf32>
    %cst_174 = arith.constant 2.000000e-01 : f32
    %397 = vector.broadcast %cst_174 : f32 to vector<8x16x32xf32>
    %398 = arith.mulf %397, %396 : vector<8x16x32xf32>
    %399 = arith.maximumf %396, %398 : vector<8x16x32xf32>
    %cst_175 = arith.constant dense<0xFF800000> : vector<16x32xf32>
    %400 = vector.multi_reduction <maximumf>, %399, %cst_175 [0] : vector<8x16x32xf32> to vector<16x32xf32>
    %401 = arith.truncf %356 : vector<16x32xf32> to vector<16x32xbf16>
    %c0_176 = arith.constant 0 : index
    %c0_177 = arith.constant 0 : index
    %402 = vector.load %arg38[%c0_176, %c0_177] : memref<32x32xbf16, #tpu.memory_space<vmem>>, vector<32x32xbf16>
    %cst_178 = arith.constant dense<0.000000e+00> : vector<16x32xf32>
    %403 = tpu.matmul %401, %402, %cst_178 {dimension_numbers = #tpu.dot_dimension_numbers<[1], [0], [0], [1], [0, 0, 1, 1], [], []>} : vector<16x32xbf16>, vector<32x32xbf16>, vector<16x32xf32> -> vector<16x32xf32>
    %404 = arith.truncf %400 : vector<16x32xf32> to vector<16x32xbf16>
    %c0_179 = arith.constant 0 : index
    %c0_180 = arith.constant 0 : index
    %405 = vector.load %arg39[%c0_179, %c0_180] : memref<32x32xbf16, #tpu.memory_space<vmem>>, vector<32x32xbf16>
    %cst_181 = arith.constant dense<0.000000e+00> : vector<16x32xf32>
    %406 = tpu.matmul %404, %405, %cst_181 {dimension_numbers = #tpu.dot_dimension_numbers<[1], [0], [0], [1], [0, 0, 1, 1], [], []>} : vector<16x32xbf16>, vector<32x32xbf16>, vector<16x32xf32> -> vector<16x32xf32>
    %407 = arith.addf %403, %406 : vector<16x32xf32>
    %c0_182 = arith.constant 0 : index
    %c0_183 = arith.constant 0 : index
    %408 = vector.load %arg40[%c0_182, %c0_183] : memref<1x32xf32, #tpu.memory_space<vmem>>, vector<1x32xf32>
    %409 = vector.broadcast %408 : vector<1x32xf32> to vector<16x32xf32>
    %410 = arith.addf %407, %409 : vector<16x32xf32>
    %411 = arith.addf %208, %410 : vector<16x32xf32>
    %c0_184 = arith.constant 0 : index
    %c0_185 = arith.constant 0 : index
    %412 = vector.load %arg23[%c0_184, %c0_185] : memref<1x32xf32, #tpu.memory_space<vmem>>, vector<1x32xf32>
    %c0_186 = arith.constant 0 : index
    %c0_187 = arith.constant 0 : index
    %413 = vector.load %arg24[%c0_186, %c0_187] : memref<1x32xf32, #tpu.memory_space<vmem>>, vector<1x32xf32>
    %cst_188 = arith.constant dense<0.000000e+00> : vector<16xf32>
    %414 = vector.multi_reduction <add>, %411, %cst_188 [1] : vector<16x32xf32> to vector<16xf32>
    %415 = vector.shape_cast %414 : vector<16xf32> to vector<16x1xf32>
    %cst_189 = arith.constant 3.200000e+01 : f32
    %416 = vector.broadcast %cst_189 : f32 to vector<16x1xf32>
    %417 = arith.divf %415, %416 : vector<16x1xf32>
    %418 = vector.broadcast %417 : vector<16x1xf32> to vector<16x32xf32>
    %419 = arith.subf %411, %418 : vector<16x32xf32>
    %420 = arith.mulf %419, %419 : vector<16x32xf32>
    %cst_190 = arith.constant dense<0.000000e+00> : vector<16xf32>
    %421 = vector.multi_reduction <add>, %420, %cst_190 [1] : vector<16x32xf32> to vector<16xf32>
    %422 = vector.shape_cast %421 : vector<16xf32> to vector<16x1xf32>
    %cst_191 = arith.constant 3.200000e+01 : f32
    %423 = vector.broadcast %cst_191 : f32 to vector<16x1xf32>
    %424 = arith.divf %422, %423 : vector<16x1xf32>
    %425 = vector.broadcast %417 : vector<16x1xf32> to vector<16x32xf32>
    %426 = arith.subf %411, %425 : vector<16x32xf32>
    %cst_192 = arith.constant 9.99999974E-6 : f32
    %427 = vector.broadcast %cst_192 : f32 to vector<16x1xf32>
    %428 = arith.addf %424, %427 : vector<16x1xf32>
    %429 = math.rsqrt %428 : vector<16x1xf32>
    %430 = vector.broadcast %429 : vector<16x1xf32> to vector<16x32xf32>
    %431 = arith.mulf %426, %430 : vector<16x32xf32>
    %432 = vector.broadcast %412 : vector<1x32xf32> to vector<16x32xf32>
    %433 = arith.mulf %431, %432 : vector<16x32xf32>
    %434 = vector.broadcast %413 : vector<1x32xf32> to vector<16x32xf32>
    %435 = arith.addf %433, %434 : vector<16x32xf32>
    %436 = arith.truncf %435 : vector<16x32xf32> to vector<16x32xbf16>
    %c0_193 = arith.constant 0 : index
    %c0_194 = arith.constant 0 : index
    %437 = vector.load %arg25[%c0_193, %c0_194] : memref<32x128xbf16, #tpu.memory_space<vmem>>, vector<32x128xbf16>
    %cst_195 = arith.constant dense<0.000000e+00> : vector<16x128xf32>
    %438 = tpu.matmul %436, %437, %cst_195 {dimension_numbers = #tpu.dot_dimension_numbers<[1], [0], [0], [1], [0, 0, 1, 1], [], []>} : vector<16x32xbf16>, vector<32x128xbf16>, vector<16x128xf32> -> vector<16x128xf32>
    %c0_196 = arith.constant 0 : index
    %c0_197 = arith.constant 0 : index
    %439 = vector.load %arg26[%c0_196, %c0_197] : memref<1x128xf32, #tpu.memory_space<vmem>>, vector<1x128xf32>
    %440 = vector.broadcast %439 : vector<1x128xf32> to vector<16x128xf32>
    %441 = arith.addf %438, %440 : vector<16x128xf32>
    %442 = arith.mulf %441, %441 : vector<16x128xf32>
    %443 = arith.mulf %441, %442 : vector<16x128xf32>
    %cst_198 = arith.constant 4.471500e-02 : f32
    %444 = vector.broadcast %cst_198 : f32 to vector<16x128xf32>
    %445 = arith.mulf %444, %443 : vector<16x128xf32>
    %446 = arith.addf %441, %445 : vector<16x128xf32>
    %cst_199 = arith.constant 0.797884583 : f32
    %447 = vector.broadcast %cst_199 : f32 to vector<16x128xf32>
    %448 = arith.mulf %447, %446 : vector<16x128xf32>
    %449 = math.tanh %448 : vector<16x128xf32>
    %cst_200 = arith.constant 1.000000e+00 : f32
    %450 = vector.broadcast %cst_200 : f32 to vector<16x128xf32>
    %451 = arith.addf %450, %449 : vector<16x128xf32>
    %cst_201 = arith.constant 5.000000e-01 : f32
    %452 = vector.broadcast %cst_201 : f32 to vector<16x128xf32>
    %453 = arith.mulf %452, %451 : vector<16x128xf32>
    %454 = arith.mulf %441, %453 : vector<16x128xf32>
    %455 = arith.truncf %454 : vector<16x128xf32> to vector<16x128xbf16>
    %c0_202 = arith.constant 0 : index
    %c0_203 = arith.constant 0 : index
    %456 = vector.load %arg27[%c0_202, %c0_203] : memref<128x32xbf16, #tpu.memory_space<vmem>>, vector<128x32xbf16>
    %cst_204 = arith.constant dense<0.000000e+00> : vector<16x32xf32>
    %457 = tpu.matmul %455, %456, %cst_204 {dimension_numbers = #tpu.dot_dimension_numbers<[1], [0], [0], [1], [0, 0, 1, 1], [], []>} : vector<16x128xbf16>, vector<128x32xbf16>, vector<16x32xf32> -> vector<16x32xf32>
    %c0_205 = arith.constant 0 : index
    %c0_206 = arith.constant 0 : index
    %458 = vector.load %arg28[%c0_205, %c0_206] : memref<1x32xf32, #tpu.memory_space<vmem>>, vector<1x32xf32>
    %459 = vector.broadcast %458 : vector<1x32xf32> to vector<16x32xf32>
    %460 = arith.addf %457, %459 : vector<16x32xf32>
    %461 = arith.addf %411, %460 : vector<16x32xf32>
    %c0_207 = arith.constant 0 : index
    %c0_208 = arith.constant 0 : index
    %c0_209 = arith.constant 0 : index
    %462 = vector.load %arg41[%c0_207, %c0_208, %c0_209] : memref<1x16x32xf32, #tpu.memory_space<vmem>>, vector<1x16x32xf32>
    %463 = vector.shape_cast %462 : vector<1x16x32xf32> to vector<16x32xf32>
    %464 = vector.shape_cast %461 : vector<16x32xf32> to vector<1x16x32xf32>
    tpu.vector_store %arg41[%c0_207, %c0_208, %c0_209], %464 {strides = array<i32>} : memref<1x16x32xf32, #tpu.memory_space<vmem>>, vector<1x16x32xf32>,
    return
  }
  func.func @transform_0(%arg0: i32, %arg1: i32) -> (i32, i32, i32) {
    %c0_i32 = arith.constant 0 : i32
    %c0_i32_0 = arith.constant 0 : i32
    return %arg0, %arg1, %c0_i32 : i32, i32, i32
  }
  func.func @transform_1(%arg0: i32, %arg1: i32) -> (i32, i32, i32) {
    %c0_i32 = arith.constant 0 : i32
    %c0_i32_0 = arith.constant 0 : i32
    %c0_i32_1 = arith.constant 0 : i32
    return %arg0, %c0_i32, %c0_i32_0 : i32, i32, i32
  }
  func.func @transform_2(%arg0: i32, %arg1: i32) -> (i32, i32, i32) {
    %c0_i32 = arith.constant 0 : i32
    %c0_i32_0 = arith.constant 0 : i32
    %c0_i32_1 = arith.constant 0 : i32
    return %arg0, %c0_i32, %c0_i32_0 : i32, i32, i32
  }
  func.func @transform_3(%arg0: i32, %arg1: i32) -> (i32, i32, i32, i32) {
    %c0_i32 = arith.constant 0 : i32
    %c0_i32_0 = arith.constant 0 : i32
    %c0_i32_1 = arith.constant 0 : i32
    return %arg0, %c0_i32, %arg1, %c0_i32_0 : i32, i32, i32, i32
  }
  func.func @transform_4(%arg0: i32, %arg1: i32) -> (i32, i32, i32, i32) {
    %c0_i32 = arith.constant 0 : i32
    %c0_i32_0 = arith.constant 0 : i32
    %c0_i32_1 = arith.constant 0 : i32
    return %arg0, %c0_i32, %arg1, %c0_i32_0 : i32, i32, i32, i32
  }
  func.func @transform_5(%arg0: i32, %arg1: i32) -> (i32, i32) {
    %c0_i32 = arith.constant 0 : i32
    %c0_i32_0 = arith.constant 0 : i32
    %c0_i32_1 = arith.constant 0 : i32
    return %c0_i32, %c0_i32_0 : i32, i32
  }
  func.func @transform_6(%arg0: i32, %arg1: i32) -> (i32, i32) {
    %c0_i32 = arith.constant 0 : i32
    %c0_i32_0 = arith.constant 0 : i32
    %c0_i32_1 = arith.constant 0 : i32
    return %c0_i32, %c0_i32_0 : i32, i32
  }
  func.func @transform_7(%arg0: i32, %arg1: i32) -> (i32, i32) {
    %c0_i32 = arith.constant 0 : i32
    %c0_i32_0 = arith.constant 0 : i32
    %c0_i32_1 = arith.constant 0 : i32
    return %c0_i32, %c0_i32_0 : i32, i32
  }
  func.func @transform_8(%arg0: i32, %arg1: i32) -> (i32, i32) {
    %c0_i32 = arith.constant 0 : i32
    %c0_i32_0 = arith.constant 0 : i32
    %c0_i32_1 = arith.constant 0 : i32
    return %c0_i32, %c0_i32_0 : i32, i32
  }
  func.func @transform_9(%arg0: i32, %arg1: i32) -> (i32, i32) {
    %c0_i32 = arith.constant 0 : i32
    %c0_i32_0 = arith.constant 0 : i32
    %c0_i32_1 = arith.constant 0 : i32
    return %c0_i32, %c0_i32_0 : i32, i32
  }
  func.func @transform_10(%arg0: i32, %arg1: i32) -> (i32, i32) {
    %c0_i32 = arith.constant 0 : i32
    %c0_i32_0 = arith.constant 0 : i32
    %c0_i32_1 = arith.constant 0 : i32
    return %c0_i32, %c0_i32_0 : i32, i32
  }
  func.func @transform_11(%arg0: i32, %arg1: i32) -> (i32, i32) {
    %c0_i32 = arith.constant 0 : i32
    %c0_i32_0 = arith.constant 0 : i32
    %c0_i32_1 = arith.constant 0 : i32
    return %c0_i32, %c0_i32_0 : i32, i32
  }
  func.func @transform_12(%arg0: i32, %arg1: i32) -> (i32, i32) {
    %c0_i32 = arith.constant 0 : i32
    %c0_i32_0 = arith.constant 0 : i32
    %c0_i32_1 = arith.constant 0 : i32
    return %c0_i32, %c0_i32_0 : i32, i32
  }
  func.func @transform_13(%arg0: i32, %arg1: i32) -> (i32, i32) {
    %c0_i32 = arith.constant 0 : i32
    %c0_i32_0 = arith.constant 0 : i32
    %c0_i32_1 = arith.constant 0 : i32
    return %c0_i32, %c0_i32_0 : i32, i32
  }
  func.func @transform_14(%arg0: i32, %arg1: i32) -> (i32, i32) {
    %c0_i32 = arith.constant 0 : i32
    %c0_i32_0 = arith.constant 0 : i32
    %c0_i32_1 = arith.constant 0 : i32
    return %c0_i32, %c0_i32_0 : i32, i32
  }
  func.func @transform_15(%arg0: i32, %arg1: i32) -> (i32, i32) {
    %c0_i32 = arith.constant 0 : i32
    %c0_i32_0 = arith.constant 0 : i32
    %c0_i32_1 = arith.constant 0 : i32
    return %c0_i32, %c0_i32_0 : i32, i32
  }
  func.func @transform_16(%arg0: i32, %arg1: i32) -> (i32, i32) {
    %c0_i32 = arith.constant 0 : i32
    %c0_i32_0 = arith.constant 0 : i32
    %c0_i32_1 = arith.constant 0 : i32
    return %c0_i32, %c0_i32_0 : i32, i32
  }
  func.func @transform_17(%arg0: i32, %arg1: i32) -> (i32, i32) {
    %c0_i32 = arith.constant 0 : i32
    %c0_i32_0 = arith.constant 0 : i32
    %c0_i32_1 = arith.constant 0 : i32
    return %c0_i32, %c0_i32_0 : i32, i32
  }
  func.func @transform_18(%arg0: i32, %arg1: i32) -> (i32, i32) {
    %c0_i32 = arith.constant 0 : i32
    %c0_i32_0 = arith.constant 0 : i32
    %c0_i32_1 = arith.constant 0 : i32
    return %c0_i32, %c0_i32_0 : i32, i32
  }
  func.func @transform_19(%arg0: i32, %arg1: i32) -> (i32, i32) {
    %c0_i32 = arith.constant 0 : i32
    %c0_i32_0 = arith.constant 0 : i32
    %c0_i32_1 = arith.constant 0 : i32
    return %c0_i32, %c0_i32_0 : i32, i32
  }
  func.func @transform_20(%arg0: i32, %arg1: i32) -> (i32, i32) {
    %c0_i32 = arith.constant 0 : i32
    %c0_i32_0 = arith.constant 0 : i32
    %c0_i32_1 = arith.constant 0 : i32
    return %c0_i32, %c0_i32_0 : i32, i32
  }
  func.func @transform_21(%arg0: i32, %arg1: i32) -> (i32, i32) {
    %c0_i32 = arith.constant 0 : i32
    %c0_i32_0 = arith.constant 0 : i32
    %c0_i32_1 = arith.constant 0 : i32
    return %c0_i32, %c0_i32_0 : i32, i32
  }
  func.func @transform_22(%arg0: i32, %arg1: i32) -> (i32, i32) {
    %c0_i32 = arith.constant 0 : i32
    %c0_i32_0 = arith.constant 0 : i32
    %c0_i32_1 = arith.constant 0 : i32
    return %c0_i32, %c0_i32_0 : i32, i32
  }
  func.func @transform_23(%arg0: i32, %arg1: i32) -> (i32, i32) {
    %c0_i32 = arith.constant 0 : i32
    %c0_i32_0 = arith.constant 0 : i32
    %c0_i32_1 = arith.constant 0 : i32
    return %c0_i32, %c0_i32_0 : i32, i32
  }
  func.func @transform_24(%arg0: i32, %arg1: i32) -> (i32, i32) {
    %c0_i32 = arith.constant 0 : i32
    %c0_i32_0 = arith.constant 0 : i32
    %c0_i32_1 = arith.constant 0 : i32
    return %c0_i32, %c0_i32_0 : i32, i32
  }
  func.func @transform_25(%arg0: i32, %arg1: i32) -> (i32, i32) {
    %c0_i32 = arith.constant 0 : i32
    %c0_i32_0 = arith.constant 0 : i32
    %c0_i32_1 = arith.constant 0 : i32
    return %c0_i32, %c0_i32_0 : i32, i32
  }
  func.func @transform_26(%arg0: i32, %arg1: i32) -> (i32, i32) {
    %c0_i32 = arith.constant 0 : i32
    %c0_i32_0 = arith.constant 0 : i32
    %c0_i32_1 = arith.constant 0 : i32
    return %c0_i32, %c0_i32_0 : i32, i32
  }
  func.func @transform_27(%arg0: i32, %arg1: i32) -> (i32, i32) {
    %c0_i32 = arith.constant 0 : i32
    %c0_i32_0 = arith.constant 0 : i32
    %c0_i32_1 = arith.constant 0 : i32
    return %c0_i32, %c0_i32_0 : i32, i32
  }
  func.func @transform_28(%arg0: i32, %arg1: i32) -> (i32, i32) {
    %c0_i32 = arith.constant 0 : i32
    %c0_i32_0 = arith.constant 0 : i32
    %c0_i32_1 = arith.constant 0 : i32
    return %c0_i32, %c0_i32_0 : i32, i32
  }
  func.func @transform_29(%arg0: i32, %arg1: i32) -> (i32, i32) {
    %c0_i32 = arith.constant 0 : i32
    %c0_i32_0 = arith.constant 0 : i32
    %c0_i32_1 = arith.constant 0 : i32
    return %c0_i32, %c0_i32_0 : i32, i32
  }
  func.func @transform_30(%arg0: i32, %arg1: i32) -> (i32, i32) {
    %c0_i32 = arith.constant 0 : i32
    %c0_i32_0 = arith.constant 0 : i32
    %c0_i32_1 = arith.constant 0 : i32
    return %c0_i32, %c0_i32_0 : i32, i32
  }
  func.func @transform_31(%arg0: i32, %arg1: i32) -> (i32, i32) {
    %c0_i32 = arith.constant 0 : i32
    %c0_i32_0 = arith.constant 0 : i32
    %c0_i32_1 = arith.constant 0 : i32
    return %c0_i32, %c0_i32_0 : i32, i32
  }
  func.func @transform_32(%arg0: i32, %arg1: i32) -> (i32, i32) {
    %c0_i32 = arith.constant 0 : i32
    %c0_i32_0 = arith.constant 0 : i32
    %c0_i32_1 = arith.constant 0 : i32
    return %c0_i32, %c0_i32_0 : i32, i32
  }
  func.func @transform_33(%arg0: i32, %arg1: i32) -> (i32, i32) {
    %c0_i32 = arith.constant 0 : i32
    %c0_i32_0 = arith.constant 0 : i32
    %c0_i32_1 = arith.constant 0 : i32
    return %c0_i32, %c0_i32_0 : i32, i32
  }
  func.func @transform_34(%arg0: i32, %arg1: i32) -> (i32, i32) {
    %c0_i32 = arith.constant 0 : i32
    %c0_i32_0 = arith.constant 0 : i32
    %c0_i32_1 = arith.constant 0 : i32
    return %c0_i32, %c0_i32_0 : i32, i32
  }
  func.func @transform_35(%arg0: i32, %arg1: i32) -> (i32, i32) {
    %c0_i32 = arith.constant 0 : i32
    %c0_i32_0 = arith.constant 0 : i32
    %c0_i32_1 = arith.constant 0 : i32
    return %c0_i32, %c0_i32_0 : i32, i32
  }
  func.func @transform_36(%arg0: i32, %arg1: i32) -> (i32, i32) {
    %c0_i32 = arith.constant 0 : i32
    %c0_i32_0 = arith.constant 0 : i32
    %c0_i32_1 = arith.constant 0 : i32
    return %c0_i32, %c0_i32_0 : i32, i32
  }
  func.func @transform_37(%arg0: i32, %arg1: i32) -> (i32, i32) {
    %c0_i32 = arith.constant 0 : i32
    %c0_i32_0 = arith.constant 0 : i32
    %c0_i32_1 = arith.constant 0 : i32
    return %c0_i32, %c0_i32_0 : i32, i32
  }
  func.func @transform_38(%arg0: i32, %arg1: i32) -> (i32, i32) {
    %c0_i32 = arith.constant 0 : i32
    %c0_i32_0 = arith.constant 0 : i32
    %c0_i32_1 = arith.constant 0 : i32
    return %c0_i32, %c0_i32_0 : i32, i32
  }
  func.func @transform_39(%arg0: i32, %arg1: i32) -> (i32, i32, i32) {
    %c0_i32 = arith.constant 0 : i32
    %c0_i32_0 = arith.constant 0 : i32
    return %arg0, %arg1, %c0_i32 : i32, i32, i32
  }
}

</mosaic_0001>

<bundles_post_ra>
// kernel: decoder_forward.1
= control target key start
LH: loop header
LB: loop body
LE: loop exit
PB: predicated region body
PF: predicated region fallthrough
CT: control target
= control target key end

     0   :  { %s5008_s6 = smov 1   ;;  %s5009_s10 = smov 2   ;;  %s6463_s0 = inlined_call_operand.smem [shape: u32[40], index: -1, kind: input, shape index: {}] }
   0x1   :  { %s5063_s5 = sld [smem:[%s6463_s0]]   ;;  %s5010_s14 = smov 3  }
   0x2   :  { %s5068_s9 = sld [smem:[%s6463_s0 + %s5008_s6]]   ;;  %s5011_s18 = smov 4  }
   0x3   :  { %s5073_s13 = sld [smem:[%s6463_s0 + %s5009_s10]]   ;;  %s5012_s22 = smov 5  }
   0x4   :  { %s5078_s17 = sld [smem:[%s6463_s0 + %s5010_s14]]   ;;  %s5013_s26 = smov 6  }
   0x5   :  { %s5083_s21 = sld [smem:[%s6463_s0 + %s5011_s18]]   ;;  %s5014_s30 = smov 7  }
   0x6   :  { %s5088_s25 = sld [smem:[%s6463_s0 + %s5012_s22]]   ;;  %s5015_s4 = smov 8  }
   0x7   :  { %6502 = sst [smem:[#allocation6_spill]] %s5063_s5  ;;  %s5016_s10 = smov 9  }
   0x8   :  { %6503 = sst [smem:[#allocation7_spill]] %s5068_s9  ;;  %s5017_s15 = smov 10  }
   0x9   :  { %6504 = sst [smem:[#allocation8_spill]] %s5073_s13  ;;  %s5018_s20 = smov 11  }
   0xa   :  { %s5093_s29 = sld [smem:[%s6463_s0 + %s5013_s26]]   ;;  %s5019_s26 = smov 12  }
   0xb   :  { %6505 = sst [smem:[#allocation9_spill]] %s5083_s21  ;;  %s5020_s1 = smov 13  }
   0xc   :  { %s5098_s3 = sld [smem:[%s6463_s0 + %s5014_s30]]   ;;  %s5021_s7 = smov 14  }
   0xd   :  { %s5103_s8 = sld [smem:[%s6463_s0 + %s5015_s4]]   ;;  %s5023_s22 = smov 16  }
   0xe   :  { %s5108_s14 = sld [smem:[%s6463_s0 + %s5016_s10]]   ;;  %s5024_s28 = smov 17  }
   0xf   :  { %s5113_s19 = sld [smem:[%s6463_s0 + %s5017_s15]]   ;;  %s5022_s15 = smov 15  }
  0x10   :  { %s5118_s24 = sld [smem:[%s6463_s0 + %s5018_s20]]  }
  0x11   :  { %s5123_s30 = sld [smem:[%s6463_s0 + %s5019_s26]]  }
  0x12   :  { %6506 = sst [smem:[#allocation10_spill]] %s5098_s3 }
  0x13   :  { %6507 = sst [smem:[#allocation11_spill]] %s5103_s8 }
  0x14   :  { %s5128_s6 = sld [smem:[%s6463_s0 + %s5020_s1]]  }
  0x15   :  { %s5133_s12 = sld [smem:[%s6463_s0 + %s5021_s7]]   ;;  %s5025_s7 = smov 18  }
  0x16   :  { %6508 = sst [smem:[#allocation12_spill]] %s5118_s24 }
  0x17   :  { %6509 = sst [smem:[#allocation13_spill]] %s5123_s30 }
  0x18   :  { %s5138_s20 = sld [smem:[%s6463_s0 + %s5022_s15]]   ;;  %s5026_s15 = smov 19  }
  0x19   :  { %s5143_s27 = sld [smem:[%s6463_s0 + %s5023_s22]]   ;;  %s5027_s22 = smov 20  }
  0x1a   :  { %6510 = sst [smem:[#allocation14_spill]] %s5128_s6 }
  0x1b   :  { %6511 = sst [smem:[#allocation15_spill]] %s5133_s12 }
  0x1c   :  { %s5148_s4 = sld [smem:[%s6463_s0 + %s5024_s28]]   ;;  %s5028_s28 = smov 21  }
  0x1d   :  { %s5153_s21 = sld [smem:[%s6463_s0 + %s5025_s7]]   ;;  %s5029_s7 = smov 22  }
  0x1e   :  { %6512 = sst [smem:[#allocation16_spill]] %s5138_s20 }
  0x1f   :  { %6513 = sst [smem:[#allocation17_spill]] %s5143_s27 }
  0x20   :  { %s5158_s6 = sld [smem:[%s6463_s0 + %s5026_s15]]   ;;  %s5030_s15 = smov 23  }
  0x21   :  { %s5163_s30 = sld [smem:[%s6463_s0 + %s5027_s22]]   ;;  %s5031_s22 = smov 24  }
  0x22   :  { %6514 = sst [smem:[#allocation18_spill]] %s5148_s4 }
  0x23   :  { %6515 = sst [smem:[#allocation19_spill]] %s5153_s21 }
  0x24   :  { %s5168_s27 = sld [smem:[%s6463_s0 + %s5028_s28]]   ;;  %s5032_s28 = smov 25  }
  0x25   :  { %s5173_s20 = sld [smem:[%s6463_s0 + %s5029_s7]]   ;;  %s5033_s7 = smov 26  }
  0x26   :  { %6516 = sst [smem:[#allocation20_spill]] %s5158_s6 }
  0x27   :  { %6517 = sst [smem:[#allocation21_spill]] %s5163_s30 }
  0x28   :  { %s5178_s6 = sld [smem:[%s6463_s0 + %s5030_s15]]   ;;  %s5034_s15 = smov 27  }
  0x29   :  { %s5183_s30 = sld [smem:[%s6463_s0 + %s5031_s22]]   ;;  %s5035_s22 = smov 28  }
  0x2a   :  { %6518 = sst [smem:[#allocation22_spill]] %s5168_s27 }
  0x2b   :  { %6519 = sst [smem:[#allocation23_spill]] %s5173_s20 }
  0x2c   :  { %s5188_s27 = sld [smem:[%s6463_s0 + %s5032_s28]]   ;;  %s5036_s28 = smov 29  }
  0x2d   :  { %s5193_s20 = sld [smem:[%s6463_s0 + %s5033_s7]]   ;;  %s5037_s7 = smov 30  }
  0x2e   :  { %6520 = sst [smem:[#allocation24_spill]] %s5178_s6 }
  0x2f   :  { %6521 = sst [smem:[#allocation25_spill]] %s5183_s30 }
  0x30   :  { %s5198_s6 = sld [smem:[%s6463_s0 + %s5034_s15]]   ;;  %s5038_s15 = smov 31  }
  0x31   :  { %s5203_s30 = sld [smem:[%s6463_s0 + %s5035_s22]]   ;;  %s5039_s22 = smov 32  }
  0x32   :  { %6522 = sst [smem:[#allocation26_spill]] %s5188_s27 }
  0x33   :  { %6523 = sst [smem:[#allocation27_spill]] %s5193_s20 }
  0x34   :  { %s5208_s27 = sld [smem:[%s6463_s0 + %s5036_s28]]   ;;  %s5040_s28 = smov 33  }
  0x35   :  { %s5213_s20 = sld [smem:[%s6463_s0 + %s5037_s7]]   ;;  %s5041_s7 = smov 34  }
  0x36   :  { %6524 = sst [smem:[#allocation28_spill]] %s5198_s6 }
  0x37   :  { %s5218_s12 = sld [smem:[%s6463_s0 + %s5038_s15]]   ;;  %s5042_s15 = smov 35  }
  0x38   :  { %s5223_s21 = sld [smem:[%s6463_s0 + %s5039_s22]]   ;;  %s5043_s22 = smov 36  }
  0x39   :  { %s5228_s4 = sld [smem:[%s6463_s0 + %s5040_s28]]   ;;  %s5044_s28 = smov 37  }
  0x3a   :  { %s5233_s24 = sld [smem:[%s6463_s0 + %s5041_s7]]   ;;  %s5045_s7 = smov 38  }
  0x3b   :  { %s5238_s13 = sld [smem:[%s6463_s0 + %s5042_s15]]   ;;  %s5046_s15 = smov 39  }
  0x3e   :  { %6525 = sst [smem:[#allocation29_spill]] %s5223_s21 }
  0x3f   :  { %6526 = sst [smem:[#allocation30_spill]] %s5228_s4 }
  0x40   :  { %6527 = sst [smem:[#allocation31_spill]] %s5233_s24 }
  0x41   :  { %6528 = sst [smem:[#allocation32_spill]] %s5238_s13 }
  0x42   :  { %s5243_s21 = sld [smem:[%s6463_s0 + %s5043_s22]]  }
  0x43   :  { %s5248_s4 = sld [smem:[%s6463_s0 + %s5044_s28]]  }
  0x44   :  { %s5253_s24 = sld [smem:[%s6463_s0 + %s5045_s7]]  }
  0x45   :  { %s5258_s13 = sld [smem:[%s6463_s0 + %s5046_s15]]  }
  0x49   :  { %6529 = sst [smem:[#allocation33_spill]] %s5248_s4 }
  0x4b   :  { %6530 = sst [smem:[#allocation34_spill]] %s5258_s13 }
  0x4c   :  { %84 = vsyncpa [#allocation4], 0 }
  0x4d   :  { %86 = vsyncpa [#allocation4 + $0x1], 0  ;;  %s5260_s22 = smov 0   ;;  %s5262_s23 = smov 0  }
  0x4e   :  { %s5264_s26 = smov 0   ;;  %s5266_s28 = smov 0  }
  0x4f   :  { %s5268_s1 = smov 0   ;;  %s5270_s2 = smov 0  }
  0x50 LB: > { %s6531_s4 = sld [smem:[#allocation33_spill]]  ;;  %s4276_s0 = sadd.s32 4294967295, %s5006_s2   ;;  %s4998_s28 = sphi %s5266_s28, %s6582_s28   ;;  %s4994_s26 = sphi %s5264_s26, %s6581_s26   ;;  %s4990_s23 = sphi %s5262_s23, %s6580_s23   ;;  %s4986_s22 = sphi %s5260_s22, %s6579_s22   ;;  %s5006_s2 = sphi %s5270_s2, %s92_s2   ;;  %s5002_s1 = sphi %s5268_s1, %s6583_s1  }
  0x51   : > { %s6532_s8 = sld [smem:[#allocation11_spill]]  ;;  %s4277_s7 = sadd.s32 4294967294, %s5006_s2  }
  0x52   : > { %s6533_s6 = sld [smem:[#allocation28_spill]]  ;;  %s104_s10 = sadd.s32 1, %s5002_s1 }
  0x53   : > { %s6534_s3 = sld [smem:[#allocation10_spill]]  ;;  %s963_s11 = sadd.s32 1, %s4994_s26 }
  0x54   : > { %p106_p0 = scmp.ge.s32.totalorder %s104_s10, 2  ;;  %p973_p1 = scmp.ne.s32.totalorder %s4994_s26, %s4990_s23 }
  0x55   : > { %p974_p2 = scmp.eq.s32.totalorder %s4276_s0, 1  ;;  %p979_p3 = scmp.ne.s32.totalorder %s4990_s23, %s4986_s22 }
  0x56   : > { %s6585_s10 = smov (%p106_p0, %s104_s10), 0  ;;  %p980_p5 = scmp.eq.s32.totalorder %s4277_s7, 1 }
  0x57   : > { %6535 = sst [smem:[#allocation35_spill]] %s6585_s10  ;;  %p5300_p4 = por %p974_p2, %p973_p1 }
  0x58   : > { %s958_s16 = ssub.s32 %s5002_s1, %s6585_s10  ;;  %p4280_p6 = scmp.ge.s32.totalorder %s5006_s2, 1 }
  0x59   : > { %p961_p7 = scmp.eq.s32.totalorder %s958_s16, 0  ;;  %p5307_p8 = por %p980_p5, %p979_p3 }
  0x5a   : > { %p1155_p9 = scmp.lt.s32.totalorder %s5006_s2, 3 }
  0x5b   : > { %s5313_s13 = scalar_select %p961_p7, %s4994_s26, %s963_s11  }
  0x5c   : > { %p1156_p10 = pnand %p4280_p6, %p1155_p9 }
  0x5d   : > { %s6538_s9 = sld [smem:[#allocation7_spill]] (!%p1156_p10)  ;;  %p1284_p11 = scmp.lt.s32.totalorder (!%p1156_p10), %s4998_s28, 1 }
  0x5e   : > { %1159 = sbr.rel (%p1156_p10) target bundleno = 4739 (0x1283), region = 176  ;;  %s6539_s5 = sld [smem:[#allocation6_spill]] (!%p1156_p10) }
  0x5f   : > { %s6477_s11 = smov (!%p1156_p10), 120  }
  0x63   : > { %s5317_s0 = scalar_select %p1284_p11, %s4998_s28, 1  ;;  %vm1333_vm0 = vcmask 261120   ;;  %v5047_v8 = vmov 32.0   ;;  %v4526_v35 = vld [vmem:[%s6534_s3 + $0x8] sm:$0xff]  ;;  %v4525_v40 = vld [vmem:[%s6534_s3] sm:$0xff]  ;;  %vm1550_vm14 = vcmask 64512  }
  0x64   : > { %4772 = vrcp.f32 %v5047_v8  ;;  %v4528_v36 = vld [vmem:[%s6532_s8 + $0x8] sm:$0xff]  ;;  %1483 = vmatpush.bf16.msra.mxu0 %v4526_v35  ;;  %v4527_v41 = vld [vmem:[%s6532_s8] sm:$0xff]  ;;  %s6479_s3 = smov 112   ;;  %vm1571_vm15 = vcmask 130048  }
  0x65   : > { %s5320_s7 = sshll.u32 %s5317_s0, 4  ;;  %1514 = vmatpush.bf16.msra.mxu1 %v4528_v36  ;;  %v4530_v46 = vld [vmem:[%s5108_s14 + $0x8] sm:$0xff]  ;;  %v4529_v50 = vld [vmem:[%s5108_s14] sm:$0xff] }
  0x66   : > { %s1297_s16 = scalar_lea.vmem %s6538_s9, %s5320_s7  ;;  %s5326_s10 = scalar_lea.vmem %s6539_s5, %s5320_s7 }
  0x67   : > { %v1327_v0 = vld [vmem:[%s1297_s16] sm:$0xff]  ;;  %v1328_v4 = vld [vmem:[%s1297_s16 + $0x8] sm:$0xff]  ;;  %s6482_s16 = smov 104  }
  0x68   : > { %v1395_v1 = vsel %vm1333_vm0, %v1327_v0, 0.0  ;;  %v1325_v2 = vld [vmem:[%s5326_s10] sm:$0xff]  ;;  %v1326_v5 = vld [vmem:[%s5326_s10 + $0x8] sm:$0xff]  ;;  %v1398_v6 = vsel %vm1333_vm0, %v1328_v4, 0.0  ;;  %1484 = vmatpush.bf16.msra.mxu0 %v4525_v40 }
  0x69   : > { %1396 = vadd.xlane.f32.xlu0 %v1395_v1  ;;  %v1334_v3 = vsel %vm1333_vm0, %v1325_v2, 0.0  ;;  %v1337_v7 = vsel %vm1333_vm0, %v1326_v5, 0.0  ;;  %1515 = vmatpush.bf16.msra.mxu1 %v4527_v41 }
  0x6a   : > { %1335 = vadd.xlane.f32.xlu1 %v1334_v3  ;;  %v4773_v9 = vpop.eup %4772 }
  0x6b   : > { %v1341_v10 = vmul.f32 32.0, %v4773_v9  ;;  %vm1345_vm1 = vweird.f32 %v4773_v9 }
  0x6d   : > { %v1342_v11 = vsub.f32 1.0, %v1341_v10  ;;  %1540 = vmatpush.bf16.msrb.mxu1 %v4530_v46 }
  0x6f   : > { %v1343_v12 = vmul.f32 %v4773_v9, %v1342_v11 }
  0x71   : > { %1399 = vadd.xlane.f32.xlu0 %v1398_v6  ;;  %v1344_v13 = vadd.f32 %v4773_v9, %v1343_v12  ;;  %1541 = vmatpush.bf16.msrb.mxu1 %v4529_v50 }
  0x72   : > { %1338 = vadd.xlane.f32.xlu1 %v1337_v7 }
  0x73   : > { %v5334_v14 = vsel %vm1345_vm1, %v4773_v9, %v1344_v13  ;;  %vm1615_vm1 = vcmask 60416  }
  0xdc   : > { %v1397_v15 = vpop.xlane.xlu0 %1396 }
  0xdd   : > { %v1401_v16 = vmul.f32 %v1397_v15, %v5334_v14  ;;  %v1336_v17 = vpop.xlane.xlu1 %1335  ;;  %v4752_v15 = vld [vmem:[%s5088_s25] ss:$0 sm:$0xff] }
  0xde   : > { %v1347_v18 = vmul.f32 %v5334_v14, %v1336_v17 }
  0xdf   : > { %v5338_v19 = vsub.f32 %v1327_v0, %v1401_v16 }
  0xe0   : > { %v5340_v20 = vsub.f32 %v1325_v2, %v1347_v18 }
  0xe1   : > { %v1405_v21 = vmul.f32 %v5338_v19, %v5338_v19 }
  0xe2   : > { %v1351_v22 = vmul.f32 %v5340_v20, %v5340_v20 }
  0xe3   : > { %v1407_v23 = vsel %vm1333_vm0, %v1405_v21, 0.0 }
  0xe4   : > { %1408 = vadd.xlane.f32.xlu2 %v1407_v23  ;;  %v1400_v24 = vpop.xlane.xlu0 %1399  ;;  %v1353_v25 = vsel %vm1333_vm0, %v1351_v22, 0.0 }
  0xe5   : > { %v1402_v26 = vmul.f32 %v1400_v24, %v5334_v14  ;;  %1354 = vadd.xlane.f32.xlu0 %v1353_v25  ;;  %v1339_v27 = vpop.xlane.xlu1 %1338  ;;  %v4753_v24 = vld [vmem:[%s5093_s29] ss:$0 sm:$0xff] }
  0xe6   : > { %v1348_v28 = vmul.f32 %v5334_v14, %v1339_v27 }
  0xe7   : > { %v5350_v29 = vsub.f32 %v1328_v4, %v1402_v26 }
  0xe8   : > { %v5352_v30 = vsub.f32 %v1326_v5, %v1348_v28 }
  0xe9   : > { %v1406_v31 = vmul.f32 %v5350_v29, %v5350_v29 }
  0xea   : > { %v1352_v32 = vmul.f32 %v5352_v30, %v5352_v30 }
  0xeb   : > { %v1410_v33 = vsel %vm1333_vm0, %v1406_v31, 0.0 }
  0xec   : > { %1411 = vadd.xlane.f32.xlu2 %v1410_v33  ;;  %v1356_v34 = vsel %vm1333_vm0, %v1352_v32, 0.0 }
  0xed   : > { %1357 = vadd.xlane.f32.xlu1 %v1356_v34 }
 0x157   : > { %v1409_v37 = vpop.xlane.xlu2 %1408 }
 0x158   : > { %v1413_v38 = vmul.f32 %v1409_v37, %v5334_v14  ;;  %v1355_v39 = vpop.xlane.xlu0 %1354 }
 0x159   : > { %v1359_v42 = vmul.f32 %v1355_v39, %v5334_v14 }
 0x15a   : > { %v1415_v43 = vadd.f32 1e-05, %v1413_v38 }
 0x15b   : > { %v1361_v44 = vadd.f32 1e-05, %v1359_v42 }
 0x15c   : > { %4774 = vrsqrt.f32 %v1415_v43  ;;  %vm1423_vm2 = vweird.f32 %v1415_v43 }
 0x15d   : > { %4776 = vrsqrt.f32 %v1361_v44  ;;  %vm1369_vm6 = vweird.f32 %v1361_v44 }
 0x15f   : > { %v1412_v45 = vpop.xlane.xlu2 %1411 }
 0x160   : > { %v1414_v47 = vmul.f32 %v1412_v45, %v5334_v14  ;;  %v1358_v48 = vpop.xlane.xlu1 %1357 }
 0x161   : > { %v1360_v49 = vmul.f32 %v1358_v48, %v5334_v14 }
 0x162   : > { %v4775_v51 = vpop.eup %4774  ;;  %v1416_v52 = vadd.f32 1e-05, %v1414_v47 }
 0x163   : > { %v4777_v53 = vpop.eup %4776  ;;  %v1418_v54 = vmul.f32 %v4775_v51, %v1415_v43  ;;  %v1362_v55 = vadd.f32 1e-05, %v1360_v49  ;;  %vm1424_vm3 = vweird.f32 %v4775_v51 }
 0x164   : > { %v1364_v56 = vmul.f32 %v4777_v53, %v1361_v44  ;;  %4778 = vrsqrt.f32 %v1416_v52  ;;  %vm1425_vm4 = vmor %vm1423_vm2, %vm1424_vm3  ;;  %vm1370_vm5 = vweird.f32 %v4777_v53  ;;  %vm1433_vm8 = vweird.f32 %v1416_v52 }
 0x165   : > { %v1419_v57 = vmul.f32 %v4775_v51, %v1418_v54  ;;  %4780 = vrsqrt.f32 %v1362_v55  ;;  %vm1371_vm7 = vmor %vm1369_vm6, %vm1370_vm5  ;;  %vm1379_vm12 = vweird.f32 %v1362_v55 }
 0x166   : > { %v1365_v58 = vmul.f32 %v4777_v53, %v1364_v56 }
 0x167   : > { %v1420_v59 = vmul.f32 0.5, %v1419_v57 }
 0x168   : > { %v1366_v60 = vmul.f32 0.5, %v1365_v58 }
 0x169   : > { %v1421_v61 = vsub.f32 1.5, %v1420_v59 }
 0x16a   : > { %v4779_v62 = vpop.eup %4778  ;;  %v1367_v63 = vsub.f32 1.5, %v1366_v60 }
 0x16b   : > { %v4781_v0 = vpop.eup %4780  ;;  %v1422_v1 = vmul.f32 %v4775_v51, %v1421_v61  ;;  %v1428_v2 = vmul.f32 %v4779_v62, %v1416_v52  ;;  %vm1434_vm9 = vweird.f32 %v4779_v62 }
 0x16c   : > { %v1368_v3 = vmul.f32 %v4777_v53, %v1367_v63  ;;  %v1374_v4 = vmul.f32 %v4781_v0, %v1362_v55  ;;  %vm1435_vm10 = vmor %vm1433_vm8, %vm1434_vm9  ;;  %vm1380_vm11 = vweird.f32 %v4781_v0 }
 0x16d   : > { %v1429_v5 = vmul.f32 %v4779_v62, %v1428_v2  ;;  %v1426_v7 = vsel %vm1425_vm4, %v4775_v51, %v1422_v1  ;;  %vm1381_vm13 = vmor %vm1379_vm12, %vm1380_vm11 }
 0x16e   : > { %v1375_v6 = vmul.f32 %v4781_v0, %v1374_v4  ;;  %v1372_v9 = vsel %vm1371_vm7, %v4777_v53, %v1368_v3  ;;  %v1437_v12 = vmul.f32 %v1426_v7, %v5338_v19 }
 0x16f   : > { %v1430_v8 = vmul.f32 0.5, %v1429_v5  ;;  %v1383_v16 = vmul.f32 %v1372_v9, %v5340_v20 }
 0x170   : > { %v1376_v10 = vmul.f32 0.5, %v1375_v6  ;;  %v1439_v25 = vmul.f32 %v4752_v15, %v1437_v12 }
 0x171   : > { %v1431_v11 = vsub.f32 1.5, %v1430_v8  ;;  %v1388_v27 = vmul.f32 %v4752_v15, %v1383_v16 }
 0x172   : > { %v1377_v13 = vsub.f32 1.5, %v1376_v10  ;;  %v1441_v31 = vadd.f32 %v4753_v24, %v1439_v25 }
 0x173   : > { %v1432_v17 = vmul.f32 %v4779_v62, %v1431_v11  ;;  %v1393_v33 = vadd.f32 %v4753_v24, %v1388_v27 }
 0x174   : > { %v1378_v18 = vmul.f32 %v4781_v0, %v1377_v13 }
 0x175   : > { %v1436_v21 = vsel %vm1435_vm10, %v4779_v62, %v1432_v17 }
 0x176   : > { %v1438_v22 = vmul.f32 %v1436_v21, %v5350_v29  ;;  %v1382_v23 = vsel %vm1381_vm13, %v4781_v0, %v1378_v18 }
 0x177   : > { %v1384_v26 = vmul.f32 %v1382_v23, %v5352_v30 }
 0x178   : > { %v1440_v19 = vmul.f32 %v4752_v15, %v1438_v22 }
 0x179   : > { %v1389_v28 = vmul.f32 %v4752_v15, %v1384_v26 }
 0x17a   : > { %v1442_v32 = vadd.f32 %v4753_v24, %v1440_v19 }
 0x17b   : > { %v1394_v34 = vadd.f32 %v4753_v24, %v1389_v28 }
 0x17c   : > { %v1444_v20 = vpack.c.bf16 %v1442_v32, %v1441_v31 }
 0x17d   : > { %v5376_v35 = vpack.c.bf16 %v1394_v34, %v1393_v33 }
 0x17e   : > { %4309 = vmatmul.msk.bf16.vlgmr.msra.gmra.mxu1 %vm1333_vm0, %v1444_v20 }
 0x17f   : > { %4300 = vmatmul.msk.bf16.vlgmr.msra.gmra.mxu0 %vm1333_vm0, %v5376_v35 }
 0x18e   : > { %4318 = vmatmul.msk.bf16.vlgmr.msrb.gmra.mxu1 %vm1333_vm0, %v1444_v20 }
 0x1fb   : > { %v1517_v29 = vpop.f32.mrf.mxu1 }
 0x1fc   : > { %v1486_v36 = vpop.f32.mrf.mxu0 }
 0x1fd   : > { %v1491_v39 = vmul.f32 0.35355338, %v1486_v36 }
 0x203   : > { %v1519_v30 = vpop.f32.mrf.mxu1 }
 0x204   : > { %v1488_v37 = vpop.f32.mrf.mxu0  ;;  %v5382_v38 = vpack.c.bf16 %v1519_v30, %v1517_v29 }
 0x205   : > { %v1492_v40 = vmul.f32 0.35355338, %v1488_v37 }
 0x206   : > { %1622 = vrot.lane.b32.xlu2 %v5382_v38, %s6477_s11  ;;  %v1555_v41 = vsel %vm1550_vm14, %v5382_v38, 0 }
 0x207   : > { %v1548_v42 = vpack.c.bf16 %v1492_v40, %v1491_v39  ;;  %1564 = vmatpush.bf16.xpose.msra.mxu3 %v1555_v41 }
 0x209   : > { %1619 = vrot.lane.b32.xlu0 %v1548_v42, %s6477_s11 }
 0x20b   : > { %v1543_v43 = vpop.f32.mrf.mxu1 }
 0x20e   : > { %4319 = vmatmul.msk.bf16.vlgmr.msra.gmra.mxu3 %vm1550_vm14, %v1548_v42 }
 0x213   : > { %v1545_v44 = vpop.f32.mrf.mxu1 }
 0x214   : > { %v5390_v45 = vpack.c.bf16 %v1545_v44, %v1543_v43 }
 0x216   : > { %1606 = vmatpush.bf16.msrb.mxu0 %v5390_v45  ;;  %1668 = vrot.lane.b32.xlu0 %v5390_v45, %s6477_s11  ;;  %s6481_s11 = sshll.u32 %s5317_s0, 6 }
 0x21e   : > { %1783 = vrot.lane.b32.xlu0 %v5382_v38, %s6482_s16 }
 0x226   : > { %1701 = vrot.lane.b32.xlu0 %v1548_v42, %s6479_s3 }
 0x22e   : > { %1781 = vrot.lane.b32.xlu0 %v1548_v42, %s6482_s16 }
 0x260   : > { %v1623_v46 = vpop.permute.xlu2 %1622 }
 0x261   : > { %v1628_v47 = vsel %vm1550_vm14, %v1623_v46, 0 }
 0x262   : > { %1637 = vmatpush.bf16.xpose.msra.mxu1 %v1628_v47 }
 0x27b   : > { %v1620_v48 = vpop.permute.xlu0 %1619 }
 0x27c   : > { %4321 = vmatmul.msk.bf16.vlgmr.msra.gmra.mxu1 %vm1550_vm14, %v1620_v48 }
 0x288   : > { %v1669_v49 = vpop.permute.xlu0 %1668 }
 0x289   : > { %1681 = vmatpush.bf16.msra.mxu2 %v1669_v49 }
 0x290   : > { %v1784_v50 = vpop.permute.xlu0 %1783 }
 0x291   : > { %v1789_v51 = vsel %vm1550_vm14, %v1784_v50, 0  ;;  %v5402_v52 = vpop.f32.mrf.mxu3 }
 0x292   : > { %1798 = vmatpush.bf16.xpose.msrb.mxu1 %v1789_v51  ;;  %v1572_v15 = vsel %vm1571_vm15, %v5402_v52, -inf }
 0x298   : > { %v5404_v53 = vpop.permute.xlu0 %1701 }
 0x299   : > { %v1568_v54 = vpop.f32.mrf.mxu3 }
 0x29a   : > { %v1575_v55 = vsel %vm1571_vm15, %v1568_v54, -inf }
 0x29b   : > { %1576 = vmax.xlane.f32.xlu0 %v1575_v55 }
 0x2a0   : > { %v1782_v56 = vpop.permute.xlu0 %1781 }
 0x2a1   : > { %4325 = vmatmul.msk.bf16.vlgmr.msrb.gmra.mxu1 %vm1550_vm14, %v1782_v56 }
 0x2f9   : > { %v1639_v57 = vpop.f32.mrf.mxu1 }
 0x2fa   : > { %v1644_v58 = vsel %vm1571_vm15, %v1639_v57, -inf }
 0x2fb   : > { %1645 = vmax.xlane.f32.xlu1 %v1644_v58 }
 0x301   : > { %v1641_v59 = vpop.f32.mrf.mxu1 }
 0x302   : > { %v1647_v60 = vsel %vm1571_vm15, %v1641_v59, -inf }
 0x303   : > { %1648 = vmax.xlane.f32.xlu1 %v1647_v60 }
 0x30e   : > { %v1577_v11 = vpop.xlane.xlu0 %1576 }
 0x30f   : > { %v1579_v12 = vsub.f32 %v1568_v54, %v1577_v11 }
 0x311   : > { %v1582_v13 = vmul.f32 1.442695, %v1579_v12 }
 0x31e   : > { %v1800_v7 = vpop.f32.mrf.mxu1 }
 0x31f   : > { %v1805_v8 = vsel %vm1571_vm15, %v1800_v7, -inf }
 0x326   : > { %v1802_v9 = vpop.f32.mrf.mxu1 }
 0x327   : > { %v1808_v10 = vsel %vm1571_vm15, %v1802_v9, -inf }
 0x36e   : > { %v1646_v61 = vpop.xlane.xlu1 %1645 }
 0x36f   : > { %v1650_v62 = vsub.f32 %v1639_v57, %v1646_v61 }
 0x371   : > { %v1652_v63 = vmul.f32 1.442695, %v1650_v62 }
 0x373   : > { %4782 = vpow2.f32 %v1652_v63 }
 0x376   : > { %v1649_v0 = vpop.xlane.xlu1 %1648 }
 0x377   : > { %v1651_v1 = vsub.f32 %v1641_v59, %v1649_v0 }
 0x379   : > { %v4783_v2 = vpop.eup %4782  ;;  %v1654_v3 = vmul.f32 1.442695, %v1651_v1 }
 0x37a   : > { %v1656_v4 = vsel %vm1571_vm15, %v4783_v2, 0.0 }
 0x37b   : > { %4784 = vpow2.f32 %v1654_v3  ;;  %1657 = vadd.xlane.f32.xlu1 %v1656_v4 }
 0x37c   : > { %4786 = vpow2.f32 %v1582_v13 }
 0x381   : > { %v4785_v5 = vpop.eup %4784 }
 0x382   : > { %v1659_v6 = vsel %vm1571_vm15, %v4785_v5, 0.0  ;;  %v5418_v16 = vpop.eup %4786 }
 0x383   : > { %1660 = vadd.xlane.f32.xlu2 %v1659_v6  ;;  %v1587_v17 = vsel %vm1571_vm15, %v5418_v16, 0.0 }
 0x38b   : > { %1806 = vmax.xlane.f32.xlu2 %v1805_v8 }
 0x393   : > { %1809 = vmax.xlane.f32.xlu2 %v1808_v10 }
 0x394   : > { %1703 = vrot.lane.b32.xlu1 %v5382_v38, %s6479_s3  ;;  %s5445_s3 = scalar_lea.vmem %s5078_s17, %s6481_s11  ;;  %s6540_s11 = smov 112  }
 0x395   : > { %v5448_v50 = vld [vmem:[%s5445_s3] sm:$0xff]   ;;  %v5468_v13 = vld [vmem:[%s5445_s3 + $0x8] sm:$0xff]  }
 0x396   : > { %v4572_v51 = vunpack.c.l.bf16 %v5448_v50 }
 0x3be   : > { %1573 = vmax.xlane.f32.xlu1 %v1572_v15 }
 0x3c6   : > { %1588 = vadd.xlane.f32.xlu1 %v1587_v17  ;;  %v4576_v17 = vunpack.c.l.bf16 %v5468_v13 }
 0x3ee   : > { %v1658_v18 = vpop.xlane.xlu1 %1657 }
 0x3ef   : > { %4788 = vrcp.f32 %v1658_v18 }
 0x3f5   : > { %v4789_v22 = vpop.eup %4788 }
 0x3f6   : > { %v1661_v21 = vpop.xlane.xlu2 %1660  ;;  %v1664_v25 = vmul.f32 %v4789_v22, %v4783_v2  ;;  %v5458_v2 = vld [vmem:[%s5445_s3 + $0x10] sm:$0xff]  }
 0x3f7   : > { %4790 = vrcp.f32 %v1661_v21  ;;  %v4580_v4 = vunpack.c.l.bf16 %v5458_v2 }
 0x3fd   : > { %v4791_v23 = vpop.eup %4790 }
 0x3fe   : > { %v1807_v24 = vpop.xlane.xlu2 %1806  ;;  %v1665_v26 = vmul.f32 %v4791_v23, %v4785_v5  ;;  %v4573_v5 = vunpack.c.h.bf16 %v5448_v50 }
 0x3ff   : > { %v1811_v27 = vsub.f32 %v1800_v7, %v1807_v24  ;;  %v1946_v7 = vsel %vm1333_vm0, %v4580_v4, 0.0  ;;  %v1940_v24 = vsel %vm1333_vm0, %v4576_v17, 0.0 }
 0x400   : > { %v1666_v19 = vpack.c.bf16 %v1665_v26, %v1664_v25  ;;  %v1937_v12 = vsel %vm1333_vm0, %v4573_v5, 0.0  ;;  %v4577_v25 = vunpack.c.h.bf16 %v5468_v13 }
 0x401   : > { %v1813_v28 = vmul.f32 1.442695, %v1811_v27  ;;  %v4581_v27 = vunpack.c.h.bf16 %v5458_v2 }
 0x402   : > { %4322 = vmatmul.msk.bf16.vlgmr.msra.gmra.mxu2 %vm1571_vm15, %v1666_v19  ;;  %v1943_v26 = vsel %vm1333_vm0, %v4577_v25, 0.0 }
 0x403   : > { %4792 = vpow2.f32 %v1813_v28  ;;  %v1949_v19 = vsel %vm1333_vm0, %v4581_v27, 0.0 }
 0x406   : > { %v1704_v31 = vpop.permute.xlu1 %1703  ;;  %v1810_v40 = vpop.xlane.xlu2 %1809 }
 0x407   : > { %v1709_v32 = vsel %vm1550_vm14, %v1704_v31, 0  ;;  %v1812_v41 = vsub.f32 %v1802_v9, %v1810_v40 }
 0x408   : > { %1718 = vmatpush.bf16.xpose.msrb.mxu2 %v1709_v32 }
 0x409   : > { %v5424_v33 = vpop.eup %4792  ;;  %v1815_v44 = vmul.f32 1.442695, %v1812_v41 }
 0x40a   : > { %v1817_v34 = vsel %vm1571_vm15, %v5424_v33, 0.0 }
 0x40b   : > { %1818 = vadd.xlane.f32.xlu0 %v1817_v34 }
 0x412   : > { %4323 = vmatmul.msk.bf16.vlgmr.msrb.gmra.mxu2 %vm1550_vm14, %v5404_v53 }
 0x431   : > { %v1574_v36 = vpop.xlane.xlu1 %1573 }
 0x432   : > { %v1578_v30 = vsub.f32 %v5402_v52, %v1574_v36  ;;  %v1934_v52 = vsel %vm1333_vm0, %v4572_v51, 0.0 }
 0x433   : > { %1935 = vadd.xlane.f32.xlu1 %v1934_v52 }
 0x434   : > { %v1580_v39 = vmul.f32 1.442695, %v1578_v30 }
 0x436   : > { %4794 = vpow2.f32 %v1580_v39 }
 0x437   : > { %4796 = vpow2.f32 %v1815_v44  ;;  %v4537_v44 = vld [vmem:[%s5203_s30 + $0x8] sm:$0xff] }
 0x439   : > { %v1589_v60 = vpop.xlane.xlu1 %1588 }
 0x43c   : > { %v4795_v46 = vpop.eup %4794 }
 0x43d   : > { %v1584_v47 = vsel %vm1571_vm15, %v4795_v46, 0.0  ;;  %v4797_v48 = vpop.eup %4796 }
 0x43e   : > { %v1820_v49 = vsel %vm1571_vm15, %v4797_v48, 0.0 }
 0x47e   : > { %v1819_v0 = vpop.xlane.xlu0 %1818 }
 0x485   : > { %v5430_v20 = vpop.f32.mrf.mxu2 }
 0x48d   : > { %v5432_v29 = vpop.f32.mrf.mxu2 }
 0x495   : > { %v1720_v37 = vpop.f32.mrf.mxu2 }
 0x496   : > { %v1725_v38 = vsel %vm1571_vm15, %v1720_v37, -inf }
 0x497   : > { %1726 = vmax.xlane.f32.xlu2 %v1725_v38 }
 0x49d   : > { %v1722_v42 = vpop.f32.mrf.mxu2 }
 0x49e   : > { %v1728_v43 = vsel %vm1571_vm15, %v1722_v42, -inf }
 0x49f   : > { %1729 = vmax.xlane.f32.xlu2 %v1728_v43  ;;  %v5493_v43 = vld [vmem:[%s5445_s3 + $0x18] sm:$0xff]  }
 0x4a6   : > { %v1936_v28 = vpop.xlane.xlu1 %1935 }
 0x4a7   : > { %1585 = vadd.xlane.f32.xlu2 %v1584_v47  ;;  %v1982_v31 = vmul.f32 %v1936_v28, %v5334_v14 }
 0x4a9   : > { %v5482_v32 = vsub.f32 %v4572_v51, %v1982_v31  ;;  %v4584_v51 = vunpack.c.l.bf16 %v5493_v43 }
 0x4af   : > { %1821 = vadd.xlane.f32.xlu2 %v1820_v49 }
 0x4c7   : > { %1828 = vrot.lane.b32.xlu2 %v5390_v45, %s6482_s16  ;;  %s6484_s16 = smov 16  }
 0x4f0   : > { %1947 = vadd.xlane.f32.xlu2 %v1946_v7 }
 0x50a   : > { %v1727_v53 = vpop.xlane.xlu2 %1726 }
 0x50b   : > { %v1731_v54 = vsub.f32 %v1720_v37, %v1727_v53 }
 0x50d   : > { %v1733_v55 = vmul.f32 1.442695, %v1731_v54  ;;  %v4536_v54 = vld [vmem:[%s5203_s30] sm:$0xff] }
 0x50f   : > { %4798 = vpow2.f32 %v1733_v55  ;;  %v1952_v55 = vsel %vm1333_vm0, %v4584_v51, 0.0 }
 0x512   : > { %v1730_v56 = vpop.xlane.xlu2 %1729 }
 0x513   : > { %v1732_v57 = vsub.f32 %v1722_v42, %v1730_v56 }
 0x515   : > { %v5452_v58 = vpop.eup %4798  ;;  %v1735_v59 = vmul.f32 1.442695, %v1732_v57 }
 0x516   : > { %v1737_v61 = vsel %vm1571_vm15, %v5452_v58, 0.0 }
 0x517   : > { %4800 = vpow2.f32 %v1735_v59  ;;  %1738 = vadd.xlane.f32.xlu1 %v1737_v61 }
 0x518   : > { %4802 = vrcp.f32 %v1589_v60  ;;  %v4585_v60 = vunpack.c.h.bf16 %v5493_v43 }
 0x51a   : > { %v1586_v62 = vpop.xlane.xlu2 %1585 }
 0x51b   : > { %4804 = vrcp.f32 %v1586_v62 }
 0x51c   : > { %4806 = vrcp.f32 %v1819_v0  ;;  %v1955_v0 = vsel %vm1333_vm0, %v4585_v60, 0.0 }
 0x51d   : > { %v4801_v63 = vpop.eup %4800 }
 0x51e   : > { %v1740_v1 = vsel %vm1571_vm15, %v4801_v63, 0.0  ;;  %v4803_v3 = vpop.eup %4802 }
 0x51f   : > { %1741 = vadd.xlane.f32.xlu0 %v1740_v1  ;;  %v1593_v8 = vmul.f32 %v4803_v3, %v5418_v16  ;;  %v5519_v3 = vld [vmem:[%s5445_s3 + $0x20] sm:$0xff]  }
 0x521   : > { %v4805_v6 = vpop.eup %4804 }
 0x522   : > { %v1592_v9 = vmul.f32 %v4805_v6, %v4795_v46  ;;  %v1822_v10 = vpop.xlane.xlu2 %1821  ;;  %v4807_v15 = vpop.eup %4806 }
 0x523   : > { %4808 = vrcp.f32 %v1822_v10  ;;  %v1825_v21 = vmul.f32 %v4807_v15, %v5424_v33 }
 0x524   : > { %v1594_v11 = vpack.c.bf16 %v1593_v8, %v1592_v9  ;;  %v4589_v9 = vunpack.c.h.bf16 %v5519_v3 }
 0x526   : > { %4320 = vmatmul.msk.bf16.vlgmr.msrb.gmra.mxu0 %vm1571_vm15, %v1594_v11 }
 0x527   : > { %1938 = vadd.xlane.f32.xlu0 %v1937_v12  ;;  %v1961_v12 = vsel %vm1333_vm0, %v4589_v9, 0.0 }
 0x529   : > { %v4809_v18 = vpop.eup %4808 }
 0x52a   : > { %v1826_v22 = vmul.f32 %v4809_v18, %v4797_v48  ;;  %v1829_v16 = vpop.permute.xlu2 %1828 }
 0x52b   : > { %1841 = vmatpush.bf16.msra.mxu2 %v1829_v16 }
 0x52c   : > { %v1827_v23 = vpack.c.bf16 %v1826_v22, %v1825_v21  ;;  %v4588_v21 = vunpack.c.l.bf16 %v5519_v3 }
 0x52e   : > { %4326 = vmatmul.msk.bf16.vlgmr.msra.gmra.mxu2 %vm1571_vm15, %v1827_v23  ;;  %v1958_v23 = vsel %vm1333_vm0, %v4588_v21, 0.0 }
 0x52f   : > { %1941 = vadd.xlane.f32.xlu0 %v1940_v24 }
 0x530   : > { %1748 = vrot.lane.b32.xlu1 %v5390_v45, %s6540_s11  ;;  %v2014_v45 = vmul.f32 %v5482_v32, %v5482_v32 }
 0x532   : > { %v2030_v33 = vsel %vm1333_vm0, %v2014_v45, 0.0 }
 0x537   : > { %1944 = vadd.xlane.f32.xlu0 %v1943_v26 }
 0x53f   : > { %1950 = vadd.xlane.f32.xlu0 %v1949_v19 }
 0x55a   : > { %2031 = vadd.xlane.f32.xlu1 %v2030_v33 }
 0x563   : > { %v1948_v15 = vpop.xlane.xlu2 %1947 }
 0x58a   : > { %v1739_v36 = vpop.xlane.xlu1 %1738 }
 0x592   : > { %v1742_v34 = vpop.xlane.xlu0 %1741 }
 0x593   : > { %4810 = vrcp.f32 %v1742_v34  ;;  %v4535_v34 = vld [vmem:[%s6533_s6 + $0x8] sm:$0xff] }
 0x594   : > { %4812 = vrcp.f32 %v1739_v36  ;;  %2412 = vmatpush.bf16.msra.mxu1 %v4535_v34 }
 0x599   : > { %v4811_v38 = vpop.eup %4810 }
 0x59a   : > { %v1939_v30 = vpop.xlane.xlu0 %1938  ;;  %v4813_v40 = vpop.eup %4812  ;;  %v1746_v42 = vmul.f32 %v4811_v38, %v4801_v63 }
 0x59b   : > { %v1983_v37 = vmul.f32 %v1939_v30, %v5334_v14  ;;  %v1745_v47 = vmul.f32 %v4813_v40, %v5452_v58  ;;  %v4534_v30 = vld [vmem:[%s6533_s6] sm:$0xff]  ;;  %s6555_s6 = sld [smem:[#allocation14_spill]] }
 0x59c   : > { %2413 = vmatpush.bf16.msra.mxu1 %v4534_v30 }
 0x59d   : > { %v5488_v39 = vsub.f32 %v4573_v5, %v1983_v37  ;;  %v1747_v52 = vpack.c.bf16 %v1746_v42, %v1745_v47 }
 0x59f   : > { %v2015_v41 = vmul.f32 %v5488_v39, %v5488_v39 }
 0x5a1   : > { %v2033_v46 = vsel %vm1333_vm0, %v2015_v41, 0.0 }
 0x5a2   : > { %v1749_v48 = vpop.permute.xlu1 %1748  ;;  %2034 = vadd.xlane.f32.xlu0 %v2033_v46  ;;  %v1942_v49 = vpop.xlane.xlu0 %1941 }
 0x5a3   : > { %v1608_v50 = vpop.f32.mrf.mxu0  ;;  %1761 = vmatpush.bf16.msra.mxu0 %v1749_v48  ;;  %v1984_v57 = vmul.f32 %v1942_v49, %v5334_v14 }
 0x5a4   : > { %v1613_v53 = vpack.c.bf16 %v1608_v50, %v1608_v50 }
 0x5a5   : > { %v5511_v63 = vsub.f32 %v4576_v17, %v1984_v57  ;;  %v5537_v17 = vld [vmem:[%s5445_s3 + $0x28] sm:$0xff]  }
 0x5a6   : > { %1616 = vst.msk [vmem:[#allocation2] sm:$0xf] %vm1615_vm1, %v1613_v53  ;;  %4324 = vmatmul.msk.bf16.vlgmr.msra.gmra.mxu0 %vm1571_vm15, %v1747_v52  ;;  %v4592_v22 = vunpack.c.l.bf16 %v5537_v17  ;;  %v4593_v2 = vunpack.c.h.bf16 %v5537_v17 }
 0x5a7   : > { %2362 = vmatpush.bf16.msrb.mxu0 %v4537_v44  ;;  %v2016_v8 = vmul.f32 %v5511_v63, %v5511_v63 }
 0x5a8   : > { %v1964_v24 = vsel %vm1333_vm0, %v4592_v22, 0.0 }
 0x5a9   : > { %v2036_v11 = vsel %vm1333_vm0, %v2016_v8, 0.0 }
 0x5aa   : > { %1953 = vadd.xlane.f32.xlu0 %v1952_v55  ;;  %v1945_v56 = vpop.xlane.xlu0 %1944 }
 0x5ab   : > { %2363 = vmatpush.bf16.msrb.mxu0 %v4536_v54  ;;  %v1985_v58 = vmul.f32 %v1945_v56, %v5334_v14  ;;  %v1610_v59 = vpop.f32.mrf.mxu0 }
 0x5ac   : > { %v1614_v61 = vpack.c.bf16 %v1610_v59, %v1610_v59 }
 0x5ad   : > { %v5508_v62 = vsub.f32 %v4577_v25, %v1985_v58 }
 0x5ae   : > { %1617 = vst.msk [vmem:[#allocation2 + $0x4] sm:$0xf] %vm1615_vm1, %v1614_v61 }
 0x5af   : > { %v2017_v1 = vmul.f32 %v5508_v62, %v5508_v62 }
 0x5b1   : > { %v2039_v5 = vsel %vm1333_vm0, %v2017_v1, 0.0 }
 0x5b2   : > { %1956 = vadd.xlane.f32.xlu0 %v1955_v0  ;;  %2040 = vadd.xlane.f32.xlu2 %v2039_v5  ;;  %v1951_v6 = vpop.xlane.xlu0 %1950 }
 0x5b3   : > { %v1987_v7 = vmul.f32 %v1951_v6, %v5334_v14  ;;  %v5583_v6 = vld [vmem:[%s5088_s25] ss:$0 sm:$0xff] }
 0x5b5   : > { %v5526_v10 = vsub.f32 %v4581_v27, %v1987_v7  ;;  %v5561_v27 = vld [vmem:[%s5445_s3 + $0x30] sm:$0xff]  }
 0x5b6   : > { %4348 = vmatmul.msk.bf16.vlgmr.msrb.gmra.mxu0 %vm1333_vm0, %v5376_v35  ;;  %v1986_v35 = vmul.f32 %v1948_v15, %v5334_v14  ;;  %v4596_v19 = vunpack.c.l.bf16 %v5561_v27  ;;  %v4597_v1 = vunpack.c.h.bf16 %v5561_v27 }
 0x5b7   : > { %v2019_v13 = vmul.f32 %v5526_v10, %v5526_v10 }
 0x5b8   : > { %v5545_v16 = vsub.f32 %v4580_v4, %v1986_v35  ;;  %v1967_v4 = vsel %vm1333_vm0, %v4593_v2, 0.0  ;;  %v1970_v28 = vsel %vm1333_vm0, %v4596_v19, 0.0  ;;  %v5596_v35 = vld [vmem:[%s5445_s3 + $0x38] sm:$0xff]   ;;  %s6488_s3 = smov 8  }
 0x5b9   : > { %v2045_v18 = vsel %vm1333_vm0, %v2019_v13, 0.0  ;;  %v1973_v13 = vsel %vm1333_vm0, %v4597_v1, 0.0 }
 0x5ba   : > { %2037 = vadd.xlane.f32.xlu0 %v2036_v11  ;;  %1962 = vadd.xlane.f32.xlu2 %v1961_v12  ;;  %v2018_v25 = vmul.f32 %v5545_v16, %v5545_v16 }
 0x5bb   : > { %2046 = vadd.xlane.f32.xlu1 %v2045_v18 }
 0x5bc   : > { %v2042_v26 = vsel %vm1333_vm0, %v2018_v25, 0.0 }
 0x5c2   : > { %1959 = vadd.xlane.f32.xlu0 %v1958_v23  ;;  %1965 = vadd.xlane.f32.xlu2 %v1964_v24 }
 0x5ca   : > { %2043 = vadd.xlane.f32.xlu0 %v2042_v26 }
 0x5cd   : > { %v2032_v31 = vpop.xlane.xlu1 %2031 }
 0x5ce   : > { %v2078_v45 = vmul.f32 %v2032_v31, %v5334_v14 }
 0x5d0   : > { %v2094_v33 = vadd.f32 1e-05, %v2078_v45  ;;  %v4600_v45 = vunpack.c.l.bf16 %v5596_v35 }
 0x5d2   : > { %1968 = vadd.xlane.f32.xlu0 %v1967_v4  ;;  %4814 = vrsqrt.f32 %v2094_v33  ;;  %vm2116_vm2 = vweird.f32 %v2094_v33 }
 0x5d8   : > { %v4815_v36 = vpop.eup %4814 }
 0x5d9   : > { %v2111_v37 = vmul.f32 %v4815_v36, %v2094_v33  ;;  %vm2117_vm3 = vweird.f32 %v4815_v36 }
 0x5da   : > { %1971 = vadd.xlane.f32.xlu0 %v1970_v28  ;;  %vm2118_vm4 = vmor %vm2116_vm2, %vm2117_vm3 }
 0x5db   : > { %v2112_v38 = vmul.f32 %v4815_v36, %v2111_v37 }
 0x5dd   : > { %v2113_v44 = vmul.f32 0.5, %v2112_v38 }
 0x5df   : > { %v2114_v46 = vsub.f32 1.5, %v2113_v44  ;;  %v1976_v44 = vsel %vm1333_vm0, %v4600_v45, 0.0 }
 0x5e1   : > { %v2115_v52 = vmul.f32 %v4815_v36, %v2114_v46 }
 0x5e3   : > { %v2119_v57 = vsel %vm2118_vm4, %v4815_v36, %v2115_v52 }
 0x5e4   : > { %v2270_v7 = vmul.f32 %v2119_v57, %v5482_v32  ;;  %v5599_v32 = vld [vmem:[%s5093_s29] ss:$0 sm:$0xff] }
 0x5e6   : > { %v2289_v43 = vmul.f32 %v5583_v6, %v2270_v7 }
 0x615   : > { %v2035_v40 = vpop.xlane.xlu0 %2034 }
 0x616   : > { %v2079_v41 = vmul.f32 %v2035_v40, %v5334_v14 }
 0x618   : > { %v2095_v42 = vadd.f32 1e-05, %v2079_v41 }
 0x61a   : > { %4816 = vrsqrt.f32 %v2095_v42  ;;  %vm2126_vm6 = vweird.f32 %v2095_v42 }
 0x61d   : > { %v1954_v47 = vpop.xlane.xlu0 %1953 }
 0x61e   : > { %v1988_v48 = vmul.f32 %v1954_v47, %v5334_v14 }
 0x620   : > { %v4817_v49 = vpop.eup %4816  ;;  %v5574_v50 = vsub.f32 %v4584_v51, %v1988_v48 }
 0x621   : > { %v2121_v53 = vmul.f32 %v4817_v49, %v2095_v42  ;;  %vm2127_vm5 = vweird.f32 %v4817_v49 }
 0x622   : > { %v2020_v54 = vmul.f32 %v5574_v50, %v5574_v50  ;;  %vm2128_vm7 = vmor %vm2126_vm6, %vm2127_vm5 }
 0x623   : > { %v2122_v55 = vmul.f32 %v4817_v49, %v2121_v53 }
 0x624   : > { %v2048_v56 = vsel %vm1333_vm0, %v2020_v54, 0.0 }
 0x625   : > { %v2123_v58 = vmul.f32 0.5, %v2122_v55  ;;  %v2041_v59 = vpop.xlane.xlu2 %2040  ;;  %2049 = vadd.xlane.f32.xlu1 %v2048_v56  ;;  %v1957_v61 = vpop.xlane.xlu0 %1956 }
 0x626   : > { %v2081_v0 = vmul.f32 %v2041_v59, %v5334_v14  ;;  %v1989_v51 = vmul.f32 %v1957_v61, %v5334_v14 }
 0x627   : > { %v2124_v5 = vsub.f32 1.5, %v2123_v58 }
 0x628   : > { %v2097_v8 = vadd.f32 1e-05, %v2081_v0  ;;  %v5588_v11 = vsub.f32 %v4585_v60, %v1989_v51 }
 0x629   : > { %v2125_v12 = vmul.f32 %v4817_v49, %v2124_v5 }
 0x62a   : > { %4818 = vrsqrt.f32 %v2097_v8  ;;  %v2021_v15 = vmul.f32 %v5588_v11, %v5588_v11  ;;  %vm2146_vm8 = vweird.f32 %v2097_v8 }
 0x62b   : > { %v2129_v18 = vsel %vm2128_vm7, %v4817_v49, %v2125_v12 }
 0x62c   : > { %v2271_v60 = vmul.f32 %v2129_v18, %v5488_v39  ;;  %v2051_v23 = vsel %vm1333_vm0, %v2021_v15, 0.0  ;;  %v2308_v39 = vadd.f32 %v5599_v32, %v2289_v43 }
 0x62d   : > { %v1963_v24 = vpop.xlane.xlu2 %1962  ;;  %1974 = vadd.xlane.f32.xlu1 %v1973_v13  ;;  %2052 = vadd.xlane.f32.xlu2 %v2051_v23  ;;  %v2038_v25 = vpop.xlane.xlu0 %2037 }
 0x62e   : > { %v2290_v26 = vmul.f32 %v5583_v6, %v2271_v60  ;;  %v1991_v4 = vmul.f32 %v1963_v24, %v5334_v14  ;;  %v2047_v28 = vpop.xlane.xlu1 %2046  ;;  %v2080_v31 = vmul.f32 %v2038_v25, %v5334_v14  ;;  %v4601_v60 = vunpack.c.h.bf16 %v5596_v35 }
 0x62f   : > { %v2083_v33 = vmul.f32 %v2047_v28, %v5334_v14 }
 0x630   : > { %v4819_v34 = vpop.eup %4818  ;;  %v2309_v36 = vadd.f32 %v5599_v32, %v2290_v26  ;;  %v5613_v30 = vsub.f32 %v4589_v9, %v1991_v4  ;;  %v2096_v37 = vadd.f32 1e-05, %v2080_v31  ;;  %v1979_v28 = vsel %vm1333_vm0, %v4601_v60, 0.0 }
 0x631   : > { %v2141_v38 = vmul.f32 %v4819_v34, %v2097_v8  ;;  %v5615_v40 = vadd.f32 1e-05, %v2083_v33  ;;  %vm2147_vm9 = vweird.f32 %v4819_v34 }
 0x632   : > { %4820 = vrsqrt.f32 %v2096_v37  ;;  %v2324_v41 = vpack.c.bf16 %v2309_v36, %v2308_v39  ;;  %v2023_v42 = vmul.f32 %v5613_v30, %v5613_v30  ;;  %vm5635_vm10 = vmor %vm2146_vm8, %vm2147_vm9  ;;  %vm2136_vm12 = vweird.f32 %v2096_v37 }
 0x633   : > { %v2142_v46 = vmul.f32 %v4819_v34, %v2141_v38  ;;  %4822 = vrsqrt.f32 %v5615_v40  ;;  %vm2166_vm2 = vweird.f32 %v5615_v40 }
 0x634   : > { %4357 = vmatmul.msk.bf16.vlgmr.msra.gmra.mxu1 %vm1333_vm0, %v2324_v41  ;;  %v2057_v9 = vsel %vm1333_vm0, %v2023_v42, 0.0 }
 0x635   : > { %v2143_v47 = vmul.f32 0.5, %v2142_v46  ;;  %2058 = vadd.xlane.f32.xlu0 %v2057_v9  ;;  %v1966_v48 = vpop.xlane.xlu2 %1965  ;;  %1977 = vadd.xlane.f32.xlu1 %v1976_v44  ;;  %v1960_v49 = vpop.xlane.xlu0 %1959 }
 0x636   : > { %v1992_v52 = vmul.f32 %v1966_v48, %v5334_v14  ;;  %v1990_v53 = vmul.f32 %v1960_v49, %v5334_v14 }
 0x637   : > { %v2144_v54 = vsub.f32 1.5, %v2143_v47 }
 0x638   : > { %v4821_v55 = vpop.eup %4820  ;;  %v5629_v56 = vsub.f32 %v4592_v22, %v1992_v52  ;;  %v5633_v57 = vsub.f32 %v4588_v21, %v1990_v53 }
 0x639   : > { %v4823_v58 = vpop.eup %4822  ;;  %v2145_v59 = vmul.f32 %v4819_v34, %v2144_v54  ;;  %v2131_v61 = vmul.f32 %v4821_v55, %v2096_v37  ;;  %vm2137_vm11 = vweird.f32 %v4821_v55 }
 0x63a   : > { %v2161_v51 = vmul.f32 %v4823_v58, %v5615_v40  ;;  %v2024_v5 = vmul.f32 %v5629_v56, %v5629_v56  ;;  %v2022_v22 = vmul.f32 %v5633_v57, %v5633_v57  ;;  %vm2138_vm13 = vmor %vm2136_vm12, %vm2137_vm11  ;;  %vm2167_vm3 = vweird.f32 %v4823_v58 }
 0x63b   : > { %v2132_v7 = vmul.f32 %v4821_v55, %v2131_v61  ;;  %v2149_v21 = vsel %vm5635_vm10, %v4819_v34, %v2145_v59  ;;  %vm2168_vm4 = vmor %vm2166_vm2, %vm2167_vm3 }
 0x63c   : > { %v2060_v3 = vsel %vm1333_vm0, %v2024_v5, 0.0  ;;  %v2162_v8 = vmul.f32 %v4823_v58, %v2161_v51  ;;  %v2054_v13 = vsel %vm1333_vm0, %v2022_v22, 0.0  ;;  %v2273_v23 = vmul.f32 %v2149_v21, %v5508_v62 }
 0x63d   : > { %v2133_v12 = vmul.f32 0.5, %v2132_v7  ;;  %2061 = vadd.xlane.f32.xlu0 %v2060_v3  ;;  %v2044_v15 = vpop.xlane.xlu0 %2043  ;;  %2055 = vadd.xlane.f32.xlu2 %v2054_v13 }
 0x63e   : > { %v2082_v18 = vmul.f32 %v2044_v15, %v5334_v14  ;;  %v2163_v25 = vmul.f32 0.5, %v2162_v8  ;;  %v2292_v33 = vmul.f32 %v5583_v6, %v2273_v23 }
 0x63f   : > { %v2134_v43 = vsub.f32 1.5, %v2133_v12 }
 0x640   : > { %v2098_v24 = vadd.f32 1e-05, %v2082_v18  ;;  %v2164_v34 = vsub.f32 1.5, %v2163_v25 }
 0x641   : > { %v2135_v26 = vmul.f32 %v4821_v55, %v2134_v43 }
 0x642   : > { %4824 = vrsqrt.f32 %v2098_v24  ;;  %v2165_v42 = vmul.f32 %v4823_v58, %v2164_v34  ;;  %vm2156_vm5 = vweird.f32 %v2098_v24 }
 0x643   : > { %v2139_v4 = vsel %vm2138_vm13, %v4821_v55, %v2135_v26 }
 0x644   : > { %v2272_v31 = vmul.f32 %v2139_v4, %v5511_v63  ;;  %v2311_v63 = vadd.f32 %v5599_v32, %v2292_v33  ;;  %v2169_v48 = vsel %vm2168_vm4, %v4823_v58, %v2165_v42 }
 0x645   : > { %v1969_v39 = vpop.xlane.xlu0 %1968  ;;  %1980 = vadd.xlane.f32.xlu2 %v1979_v28  ;;  %v2275_v53 = vmul.f32 %v2169_v48, %v5526_v10 }
 0x646   : > { %v1993_v62 = vmul.f32 %v1969_v39, %v5334_v14  ;;  %v2291_v36 = vmul.f32 %v5583_v6, %v2272_v31 }
 0x647   : > { %v2294_v51 = vmul.f32 %v5583_v6, %v2275_v53 }
 0x648   : > { %v4825_v37 = vpop.eup %4824  ;;  %v5661_v38 = vsub.f32 %v4593_v2, %v1993_v62  ;;  %v2310_v41 = vadd.f32 %v5599_v32, %v2291_v36 }
 0x649   : > { %v2151_v44 = vmul.f32 %v4825_v37, %v2098_v24  ;;  %vm2157_vm6 = vweird.f32 %v4825_v37  ;;  %v2313_v22 = vadd.f32 %v5599_v32, %v2294_v51 }
 0x64a   : > { %v2325_v46 = vpack.c.bf16 %v2311_v63, %v2310_v41  ;;  %v2025_v9 = vmul.f32 %v5661_v38, %v5661_v38  ;;  %vm2158_vm7 = vmor %vm2156_vm5, %vm2157_vm6 }
 0x64b   : > { %v2152_v47 = vmul.f32 %v4825_v37, %v2151_v44 }
 0x64c   : > { %4358 = vmatmul.msk.bf16.gmra.mxu1 %vm1333_vm0, %v2325_v46  ;;  %v2063_v40 = vsel %vm1333_vm0, %v2025_v9, 0.0 }
 0x64d   : > { %v2153_v17 = vmul.f32 0.5, %v2152_v47  ;;  %2064 = vadd.xlane.f32.xlu1 %v2063_v40  ;;  %v1972_v2 = vpop.xlane.xlu0 %1971 }
 0x64e   : > { %v1994_v49 = vmul.f32 %v1972_v2, %v5334_v14 }
 0x64f   : > { %v2154_v52 = vsub.f32 1.5, %v2153_v17 }
 0x650   : > { %v5673_v54 = vsub.f32 %v4596_v19, %v1994_v49 }
 0x651   : > { %v2155_v55 = vmul.f32 %v4825_v37, %v2154_v52 }
 0x652   : > { %v2026_v59 = vmul.f32 %v5673_v54, %v5673_v54 }
 0x653   : > { %v2159_v58 = vsel %vm2158_vm7, %v4825_v37, %v2155_v55 }
 0x654   : > { %v2274_v61 = vmul.f32 %v2159_v58, %v5545_v16  ;;  %v2066_v0 = vsel %vm1333_vm0, %v2026_v59, 0.0  ;;  %v5708_v59 = vpop.f32.mrf.mxu0 }
 0x655   : > { %2067 = vadd.xlane.f32.xlu2 %v2066_v0 }
 0x656   : > { %v2293_v5 = vmul.f32 %v5583_v6, %v2274_v61 }
 0x658   : > { %v2312_v10 = vadd.f32 %v5599_v32, %v2293_v5 }
 0x65a   : > { %v2326_v19 = vpack.c.bf16 %v2313_v22, %v2312_v10 }
 0x65c   : > { %4359 = vmatmul.msk.bf16.gmra.mxu1 %vm1333_vm0, %v2326_v19  ;;  %v1688_v19 = vpack.c.bf16 %v5430_v20, %v5430_v20  ;;  %v1843_v20 = vpop.f32.mrf.mxu2 }
 0x698   : > { %v2050_v7 = vpop.xlane.xlu1 %2049 }
 0x699   : > { %v2084_v3 = vmul.f32 %v2050_v7, %v5334_v14 }
 0x69b   : > { %v2100_v21 = vadd.f32 1e-05, %v2084_v3 }
 0x69d   : > { %4826 = vrsqrt.f32 %v2100_v21  ;;  %vm2176_vm9 = vweird.f32 %v2100_v21 }
 0x6a0   : > { %v1975_v16 = vpop.xlane.xlu1 %1974  ;;  %v2053_v8 = vpop.xlane.xlu2 %2052 }
 0x6a1   : > { %v1995_v12 = vmul.f32 %v1975_v16, %v5334_v14  ;;  %v2085_v13 = vmul.f32 %v2053_v8, %v5334_v14 }
 0x6a3   : > { %v4827_v15 = vpop.eup %4826  ;;  %v5689_v18 = vsub.f32 %v4597_v1, %v1995_v12  ;;  %v2101_v43 = vadd.f32 1e-05, %v2085_v13 }
 0x6a4   : > { %v2171_v23 = vmul.f32 %v4827_v15, %v2100_v21  ;;  %vm2177_vm8 = vweird.f32 %v4827_v15 }
 0x6a5   : > { %4828 = vrsqrt.f32 %v2101_v43  ;;  %v2027_v24 = vmul.f32 %v5689_v18, %v5689_v18  ;;  %vm2178_vm10 = vmor %vm2176_vm9, %vm2177_vm8  ;;  %vm2186_vm12 = vweird.f32 %v2101_v43 }
 0x6a6   : > { %v2172_v25 = vmul.f32 %v4827_v15, %v2171_v23 }
 0x6a7   : > { %v2069_v26 = vsel %vm1333_vm0, %v2027_v24, 0.0 }
 0x6a8   : > { %v2173_v4 = vmul.f32 0.5, %v2172_v25  ;;  %2070 = vadd.xlane.f32.xlu0 %v2069_v26  ;;  %v1978_v28 = vpop.xlane.xlu1 %1977  ;;  %v2059_v31 = vpop.xlane.xlu0 %2058 }
 0x6a9   : > { %v1996_v33 = vmul.f32 %v1978_v28, %v5334_v14  ;;  %v2087_v34 = vmul.f32 %v2059_v31, %v5334_v14  ;;  %v1765_v26 = vpop.f32.mrf.mxu0 }
 0x6aa   : > { %v2174_v27 = vsub.f32 1.5, %v2173_v4 }
 0x6ab   : > { %v4829_v1 = vpop.eup %4828  ;;  %v5698_v39 = vsub.f32 %v4600_v45, %v1996_v33  ;;  %v2103_v62 = vadd.f32 1e-05, %v2087_v34 }
 0x6ac   : > { %v2175_v36 = vmul.f32 %v4827_v15, %v2174_v27  ;;  %v2181_v37 = vmul.f32 %v4829_v1, %v2101_v43  ;;  %vm2187_vm11 = vweird.f32 %v4829_v1 }
 0x6ad   : > { %4830 = vrsqrt.f32 %v2103_v62  ;;  %v2028_v41 = vmul.f32 %v5698_v39, %v5698_v39  ;;  %vm2188_vm13 = vmor %vm2186_vm12, %vm2187_vm11  ;;  %vm2206_vm2 = vweird.f32 %v2103_v62 }
 0x6ae   : > { %v2182_v63 = vmul.f32 %v4829_v1, %v2181_v37  ;;  %v2179_v44 = vsel %vm2178_vm10, %v4827_v15, %v2175_v36 }
 0x6af   : > { %v2072_v42 = vsel %vm1333_vm0, %v2028_v41, 0.0  ;;  %v2276_v2 = vmul.f32 %v2179_v44, %v5574_v50  ;;  %v1845_v44 = vpop.f32.mrf.mxu2 }
 0x6b0   : > { %v2183_v46 = vmul.f32 0.5, %v2182_v63  ;;  %2073 = vadd.xlane.f32.xlu1 %v2072_v42  ;;  %v2062_v9 = vpop.xlane.xlu0 %2061  ;;  %v2056_v47 = vpop.xlane.xlu2 %2055  ;;  %v1689_v42 = vpack.c.bf16 %v5432_v29, %v5432_v29 }
 0x6b1   : > { %v2088_v45 = vmul.f32 %v2062_v9, %v5334_v14  ;;  %v2086_v48 = vmul.f32 %v2056_v47, %v5334_v14  ;;  %v5712_v51 = vpop.f32.mrf.mxu1  ;;  %v2295_v50 = vmul.f32 %v5583_v6, %v2276_v2 }
 0x6b2   : > { %v2184_v40 = vsub.f32 1.5, %v2183_v46 }
 0x6b3   : > { %v4831_v17 = vpop.eup %4830  ;;  %v5706_v49 = vadd.f32 1e-05, %v2088_v45  ;;  %v2102_v55 = vadd.f32 1e-05, %v2086_v48 }
 0x6b4   : > { %v2185_v52 = vmul.f32 %v4829_v1, %v2184_v40  ;;  %v2201_v53 = vmul.f32 %v4831_v17, %v2103_v62  ;;  %vm2207_vm3 = vweird.f32 %v4831_v17  ;;  %v1849_v40 = vpack.c.bf16 %v1845_v44, %v1845_v44  ;;  %v4532_v44 = vld [vmem:[%s5113_s19 + $0x8] sm:$0xff] }
 0x6b5   : > { %4832 = vrsqrt.f32 %v5706_v49  ;;  %vm5730_vm4 = vmor %vm2206_vm2, %vm2207_vm3  ;;  %vm2196_vm6 = vweird.f32 %v2102_v55  ;;  %vm2216_vm8 = vweird.f32 %v5706_v49  ;;  %1892 = vmatpush.bf16.msrb.mxu3 %v4532_v44 }
 0x6b6   : > { %v2189_v58 = vsel %vm2188_vm13, %v4829_v1, %v2185_v52  ;;  %v2202_v61 = vmul.f32 %v4831_v17, %v2201_v53  ;;  %4834 = vrsqrt.f32 %v2102_v55  ;;  %v1769_v1 = vpack.c.bf16 %v1765_v26, %v1765_v26  ;;  %v5761_v53 = vld [vmem:[%s5208_s27] ss:$0 sm:$0xff] }
 0x6b7   : > { %v2277_v0 = vmul.f32 %v2189_v58, %v5588_v11  ;;  %v2314_v11 = vadd.f32 %v5599_v32, %v2295_v50  ;;  %v1848_v58 = vpack.c.bf16 %v1843_v20, %v1843_v20 }
 0x6b8   : > { %v2203_v5 = vmul.f32 0.5, %v2202_v61  ;;  %v1981_v10 = vpop.xlane.xlu2 %1980  ;;  %v2365_v61 = vpop.f32.mrf.mxu0 }
 0x6b9   : > { %v2296_v22 = vmul.f32 %v5583_v6, %v2277_v0  ;;  %v1997_v3 = vmul.f32 %v1981_v10, %v5334_v14  ;;  %v5741_v34 = vpop.f32.mrf.mxu1  ;;  %v5769_v10 = vadd.f32 %v5761_v53, %v2365_v61 }
 0x6ba   : > { %v2204_v7 = vsub.f32 1.5, %v2203_v5 }
 0x6bb   : > { %v5719_v21 = vpop.eup %4832  ;;  %v2315_v16 = vadd.f32 %v5599_v32, %v2296_v22  ;;  %v5727_v13 = vsub.f32 %v4601_v60, %v1997_v3 }
 0x6bc   : > { %v4835_v8 = vpop.eup %4834  ;;  %v2211_v12 = vmul.f32 %v5719_v21, %v5706_v49  ;;  %1692 = vrot.lane.b32.xlu0 %v1688_v19, %s6488_s3  ;;  %v2205_v15 = vmul.f32 %v4831_v17, %v2204_v7  ;;  %vm2217_vm9 = vweird.f32 %v5719_v21  ;;  %v2455_v7 = vadd.f32 %v5712_v51, %v5769_v10 }
 0x6bd   : > { %v2191_v43 = vmul.f32 %v4835_v8, %v2102_v55  ;;  %v2327_v23 = vpack.c.bf16 %v2315_v16, %v2314_v11  ;;  %v2029_v25 = vmul.f32 %v5727_v13, %v5727_v13  ;;  %vm2197_vm5 = vweird.f32 %v4835_v8  ;;  %vm2218_vm10 = vmor %vm2216_vm8, %vm2217_vm9 }
 0x6be   : > { %v2212_v35 = vmul.f32 %v5719_v21, %v2211_v12  ;;  %v2209_v31 = vsel %vm5730_vm4, %v4831_v17, %v2205_v15  ;;  %vm2198_vm7 = vmor %vm2196_vm6, %vm2197_vm5  ;;  %v1768_v11 = vpack.c.bf16 %v5708_v59, %v5708_v59  ;;  %v2471_v12 = vmul.f32 0.2, %v2455_v7 }
 0x6bf   : > { %v2192_v4 = vmul.f32 %v4835_v8, %v2191_v43  ;;  %4360 = vmatmul.msk.bf16.gmra.mxu1 %vm1333_vm0, %v2327_v23  ;;  %v2075_v28 = vsel %vm1333_vm0, %v2029_v25, 0.0  ;;  %v2279_v37 = vmul.f32 %v2209_v31, %v5613_v30  ;;  %vm1698_vm5 = vcmask 126016  }
 0x6c0   : > { %v2065_v60 = vpop.xlane.xlu1 %2064  ;;  %2076 = vadd.xlane.f32.xlu2 %v2075_v28  ;;  %v2213_v41 = vmul.f32 0.5, %v2212_v35  ;;  %v2487_v23 = vmax.f32 %v2455_v7, %v2471_v12  ;;  %vm1778_vm9 = vcmask 191616  }
 0x6c1   : > { %v2193_v33 = vmul.f32 0.5, %v2192_v4  ;;  %v2089_v27 = vmul.f32 %v2065_v60, %v5334_v14  ;;  %v2298_v45 = vmul.f32 %v5583_v6, %v2279_v37 }
 0x6c2   : > { %v2214_v47 = vsub.f32 1.5, %v2213_v41 }
 0x6c3   : > { %v2194_v62 = vsub.f32 1.5, %v2193_v33  ;;  %v2105_v36 = vadd.f32 1e-05, %v2089_v27  ;;  %v2317_v52 = vadd.f32 %v5599_v32, %v2298_v45 }
 0x6c4   : > { %1774 = vrot.lane.b32.xlu0 %v1769_v1, %s6484_s16  ;;  %v2215_v17 = vmul.f32 %v5719_v21, %v2214_v47  ;;  %s6486_s16 = smov 24  }
 0x6c5   : > { %v2195_v63 = vmul.f32 %v4835_v8, %v2194_v62  ;;  %4836 = vrsqrt.f32 %v2105_v36  ;;  %vm2226_vm11 = vweird.f32 %v2105_v36 }
 0x6c6   : > { %v2219_v0 = vsel %vm2218_vm10, %v5719_v21, %v2215_v17  ;;  %vm1858_vm10 = vcmask 257216  }
 0x6c7   : > { %v2199_v46 = vsel %vm2198_vm7, %v4835_v8, %v2195_v63  ;;  %v2280_v19 = vmul.f32 %v2219_v0, %v5629_v56 }
 0x6c8   : > { %v2278_v9 = vmul.f32 %v2199_v46, %v5633_v57  ;;  %v2068_v35 = vpop.xlane.xlu2 %2067 }
 0x6c9   : > { %v5750_v30 = vpop.f32.mrf.mxu1  ;;  %1694 = vrot.lane.b32.xlu1 %v1689_v42, %s6488_s3  ;;  %v2299_v8 = vmul.f32 %v5583_v6, %v2280_v19  ;;  %v2090_v60 = vmul.f32 %v2068_v35, %v5334_v14  ;;  %s6546_s3 = sld [smem:[#allocation8_spill]] }
 0x6ca   : > { %v2297_v48 = vmul.f32 %v5583_v6, %v2278_v9 }
 0x6cb   : > { %v4837_v29 = vpop.eup %4836  ;;  %v2318_v43 = vadd.f32 %v5599_v32, %v2299_v8  ;;  %v2106_v28 = vadd.f32 1e-05, %v2090_v60  ;;  %v2457_v8 = vadd.f32 %v5750_v30, %v5769_v10 }
 0x6cc   : > { %v2221_v2 = vmul.f32 %v4837_v29, %v2105_v36  ;;  %1854 = vrot.lane.b32.xlu0 %v1849_v40, %s6486_s16  ;;  %v2316_v57 = vadd.f32 %v5599_v32, %v2297_v48  ;;  %vm2227_vm12 = vweird.f32 %v4837_v29  ;;  %v4531_v48 = vld [vmem:[%s5113_s19] sm:$0xff] }
 0x6cd   : > { %vm2228_vm13 = vmor %vm2226_vm11, %vm2227_vm12  ;;  %4838 = vrsqrt.f32 %v2106_v28  ;;  %vm2236_vm2 = vweird.f32 %v2106_v28  ;;  %1893 = vmatpush.bf16.msrb.mxu3 %v4531_v48 }
 0x6ce   : > { %v2222_v55 = vmul.f32 %v4837_v29, %v2221_v2  ;;  %v2328_v49 = vpack.c.bf16 %v2317_v52, %v2316_v57 }
 0x6cf   : > { %s1302_s5 = scalar_lea.vmem %s6546_s3, %s5320_s7  ;;  %s6548_s7 = sld [smem:[#allocation29_spill]] }
 0x6d0   : > { %v2223_v50 = vmul.f32 0.5, %v2222_v55  ;;  %4361 = vmatmul.msk.bf16.gmra.mxu1 %vm1333_vm0, %v2328_v49  ;;  %s6549_s3 = sld [smem:[#allocation18_spill]] }
 0x6d1   : > { %v5765_v5 = vpop.f32.mrf.mxu1  ;;  %1852 = vrot.lane.b32.xlu1 %v1848_v58, %s6486_s16  ;;  %s6545_s16 = smov 16  }
 0x6d2   : > { %v2224_v22 = vsub.f32 1.5, %v2223_v50 }
 0x6d3   : > { %v4839_v31 = vpop.eup %4838 }
 0x6d4   : > { %v2225_v3 = vmul.f32 %v4837_v29, %v2224_v22  ;;  %v2231_v33 = vmul.f32 %v4839_v31, %v2106_v28  ;;  %vm2237_vm3 = vweird.f32 %v4839_v31 }
 0x6d5   : > { %vm2238_vm4 = vmor %vm2236_vm2, %vm2237_vm3 }
 0x6d6   : > { %v2229_v21 = vsel %vm2228_vm13, %v4837_v29, %v2225_v3  ;;  %v2232_v27 = vmul.f32 %v4839_v31, %v2231_v33 }
 0x6d7   : > { %v2281_v16 = vmul.f32 %v2229_v21, %v5661_v38  ;;  %v5784_v38 = vsel %vm1333_vm0, %v2487_v23, -inf }
 0x6d8   : > { %1772 = vrot.lane.b32.xlu2 %v1768_v11, %s6545_s16  ;;  %v2233_v37 = vmul.f32 0.5, %v2232_v27 }
 0x6d9   : > { %v2425_v20 = vpop.f32.mrf.mxu1  ;;  %v2300_v15 = vmul.f32 %v5583_v6, %v2281_v16 }
 0x6da   : > { %v2459_v56 = vadd.f32 %v2425_v20, %v5769_v10  ;;  %v2234_v41 = vsub.f32 1.5, %v2233_v37 }
 0x6db   : > { %v2319_v51 = vadd.f32 %v5599_v32, %v2300_v15  ;;  %v2473_v15 = vmul.f32 0.2, %v2457_v8 }
 0x6dc   : > { %v2475_v24 = vmul.f32 0.2, %v2459_v56  ;;  %v2235_v47 = vmul.f32 %v4839_v31, %v2234_v41 }
 0x6dd   : > { %v2329_v25 = vpack.c.bf16 %v2319_v51, %v2318_v43 }
 0x6de   : > { %v2491_v59 = vmax.f32 %v2459_v56, %v2475_v24  ;;  %v2239_v29 = vsel %vm2238_vm4, %v4839_v31, %v2235_v47 }
 0x6df   : > { %v2282_v52 = vmul.f32 %v2239_v29, %v5673_v54 }
 0x6e0   : > { %v5787_v26 = vsel %vm1333_vm0, %v2491_v59, -inf  ;;  %4362 = vmatmul.msk.bf16.gmra.mxu1 %vm1333_vm0, %v2329_v25  ;;  %v2489_v59 = vmax.f32 %v2457_v8, %v2473_v15 }
 0x6e1   : > { %v2506_v4 = vmax.f32 %v5784_v38, %v5787_v26  ;;  %v2301_v50 = vmul.f32 %v5583_v6, %v2282_v52  ;;  %v5801_v22 = vpop.f32.mrf.mxu1  ;;  %v4539_v52 = vld [vmem:[%s5213_s20 + $0x8] sm:$0xff] }
 0x6e2   : > { %v5816_v27 = vsel %vm1333_vm0, %v2489_v59, -inf  ;;  %2593 = vmatpush.bf16.msra.mxu3 %v4539_v52 }
 0x6e3   : > { %v2320_v11 = vadd.f32 %v5599_v32, %v2301_v50  ;;  %v5842_v50 = vld [vmem:[%s1302_s5 + $0x8] sm:$0xff] }
 0x71b   : > { %v2071_v1 = vpop.xlane.xlu0 %2070 }
 0x71c   : > { %v2091_v62 = vmul.f32 %v2071_v1, %v5334_v14 }
 0x71e   : > { %v2107_v36 = vadd.f32 1e-05, %v2091_v62 }
 0x720   : > { %4840 = vrsqrt.f32 %v2107_v36  ;;  %vm2246_vm6 = vweird.f32 %v2107_v36 }
 0x723   : > { %v2074_v63 = vpop.xlane.xlu1 %2073 }
 0x724   : > { %v2092_v42 = vmul.f32 %v2074_v63, %v5334_v14 }
 0x726   : > { %v4841_v46 = vpop.eup %4840  ;;  %v2108_v9 = vadd.f32 1e-05, %v2092_v42 }
 0x727   : > { %v2241_v45 = vmul.f32 %v4841_v46, %v2107_v36  ;;  %vm2247_vm7 = vweird.f32 %v4841_v46 }
 0x728   : > { %4842 = vrsqrt.f32 %v2108_v9  ;;  %vm2248_vm8 = vmor %vm2246_vm6, %vm2247_vm7  ;;  %vm2256_vm11 = vweird.f32 %v2108_v9 }
 0x729   : > { %v2242_v40 = vmul.f32 %v4841_v46, %v2241_v45 }
 0x72b   : > { %v2243_v17 = vmul.f32 0.5, %v2242_v40 }
 0x72d   : > { %v2244_v2 = vsub.f32 1.5, %v2243_v17 }
 0x72e   : > { %v4843_v57 = vpop.eup %4842  ;;  %v1693_v55 = vpop.permute.xlu0 %1692 }
 0x72f   : > { %v2245_v49 = vmul.f32 %v4841_v46, %v2244_v2  ;;  %1699 = vst.msk [vmem:[#allocation2] sm:$0xf] %vm1698_vm5, %v1693_v55  ;;  %v2251_v58 = vmul.f32 %v4843_v57, %v2108_v9  ;;  %vm2257_vm12 = vweird.f32 %v4843_v57 }
 0x730   : > { %vm2258_vm13 = vmor %vm2256_vm11, %vm2257_vm12 }
 0x731   : > { %v2249_v61 = vsel %vm2248_vm8, %v4841_v46, %v2245_v49  ;;  %v2252_v19 = vmul.f32 %v4843_v57, %v2251_v58  ;;  %v4538_v49 = vld [vmem:[%s5213_s20] sm:$0xff] }
 0x732   : > { %v2283_v0 = vmul.f32 %v2249_v61, %v5689_v18  ;;  %2594 = vmatpush.bf16.msra.mxu3 %v4538_v49  ;;  %v4540_v61 = vld [vmem:[%s5218_s12] sm:$0xff] }
 0x733   : > { %v2077_v7 = vpop.xlane.xlu2 %2076  ;;  %v2253_v18 = vmul.f32 0.5, %v2252_v19  ;;  %v2367_v19 = vpop.f32.mrf.mxu0 }
 0x734   : > { %v2302_v3 = vmul.f32 %v5583_v6, %v2283_v0  ;;  %v2093_v21 = vmul.f32 %v2077_v7, %v5334_v14  ;;  %v5838_v0 = vld [vmem:[%s1302_s5] sm:$0xff]  ;;  %s6547_s5 = sld [smem:[#allocation12_spill]] }
 0x735   : > { %v2254_v43 = vsub.f32 1.5, %v2253_v18 }
 0x736   : > { %v1775_v54 = vpop.permute.xlu0 %1774  ;;  %v2321_v16 = vadd.f32 %v5599_v32, %v2302_v3  ;;  %v2109_v12 = vadd.f32 1e-05, %v2093_v21  ;;  %v2670_v21 = vsel %vm1333_vm0, %v5842_v50, 0.0 }
 0x737   : > { %v2255_v60 = vmul.f32 %v4843_v57, %v2254_v43  ;;  %2671 = vadd.xlane.f32.xlu1 %v2670_v21 }
 0x738   : > { %v2330_v20 = vpack.c.bf16 %v2321_v16, %v2320_v11  ;;  %4844 = vrsqrt.f32 %v2109_v12  ;;  %vm2266_vm3 = vweird.f32 %v2109_v12  ;;  %v2368_v16 = vadd.f32 %v5761_v53, %v2367_v19 }
 0x739   : > { %v2259_v36 = vsel %vm2258_vm13, %v4843_v57, %v2255_v60 }
 0x73a   : > { %4363 = vmatmul.msk.bf16.gmra.mxu1 %vm1333_vm0, %v2330_v20  ;;  %v2284_v42 = vmul.f32 %v2259_v36, %v5698_v39  ;;  %v2460_v18 = vadd.f32 %v5801_v22, %v2368_v16  ;;  %v2458_v43 = vadd.f32 %v5765_v5, %v2368_v16 }
 0x73b   : > { %v1695_v56 = vpop.permute.xlu1 %1694  ;;  %v1773_v51 = vpop.permute.xlu2 %1772 }
 0x73c   : > { %1700 = vst.msk [vmem:[#allocation2 + $0x4] sm:$0xf] %vm1698_vm5, %v1695_v56  ;;  %v2430_v23 = vpop.f32.mrf.mxu1  ;;  %v2303_v45 = vmul.f32 %v5583_v6, %v2284_v42  ;;  %v2456_v56 = vadd.f32 %v5741_v34, %v2368_v16 }
 0x73d   : > { %1779 = vst.msk [vmem:[#allocation2] sm:$0xf] %vm1778_vm9, %v1773_v51  ;;  %v2461_v24 = vadd.f32 %v2430_v23, %v5769_v10 }
 0x73e   : > { %1780 = vst.msk [vmem:[#allocation2 + $0x4] sm:$0xf] %vm1778_vm9, %v1775_v54  ;;  %v1855_v30 = vpop.permute.xlu0 %1854  ;;  %v4845_v25 = vpop.eup %4844  ;;  %v2322_v48 = vadd.f32 %v5599_v32, %v2303_v45  ;;  %v2472_v22 = vmul.f32 0.2, %v2456_v56 }
 0x73f   : > { %v2477_v35 = vmul.f32 0.2, %v2461_v24  ;;  %1860 = vst.msk [vmem:[#allocation2 + $0x4] sm:$0xf] %vm1858_vm10, %v1855_v30  ;;  %v2261_v28 = vmul.f32 %v4845_v25, %v2109_v12  ;;  %vm2267_vm2 = vweird.f32 %v4845_v25 }
 0x740   : > { %vm2268_vm4 = vmor %vm2266_vm3, %vm2267_vm2  ;;  %v2488_v45 = vmax.f32 %v2456_v56, %v2472_v22 }
 0x741   : > { %v2493_v31 = vmax.f32 %v2461_v24, %v2477_v35  ;;  %v2262_v33 = vmul.f32 %v4845_v25, %v2261_v28 }
 0x743   : > { %v5819_v1 = vsel %vm1333_vm0, %v2493_v31, -inf  ;;  %v1853_v62 = vpop.permute.xlu1 %1852  ;;  %v2263_v37 = vmul.f32 0.5, %v2262_v33  ;;  %v2474_v33 = vmul.f32 0.2, %v2458_v43 }
 0x744   : > { %v2508_v41 = vmax.f32 %v5816_v27, %v5819_v1  ;;  %1859 = vst.msk [vmem:[#allocation2] sm:$0xf] %vm1858_vm10, %v1853_v62 }
 0x745   : > { %v2264_v63 = vsub.f32 1.5, %v2263_v37 }
 0x747   : > { %v2265_v44 = vmul.f32 %v4845_v25, %v2264_v63 }
 0x749   : > { %v2269_v46 = vsel %vm2268_vm4, %v4845_v25, %v2265_v44  ;;  %v2476_v25 = vmul.f32 0.2, %v2460_v18 }
 0x74a   : > { %v2285_v9 = vmul.f32 %v2269_v46, %v5727_v13  ;;  %v2432_v13 = vpop.f32.mrf.mxu1 }
 0x74b   : > { %v4533_v47 = vld [vmem:[#allocation2] sm:$0xff]  ;;  %v2462_v20 = vadd.f32 %v2432_v13, %v2368_v16  ;;  %v2492_v63 = vmax.f32 %v2460_v18, %v2476_v25 }
 0x74c   : > { %4339 = vmatmul.msk.bf16.vlgmr.msrb.gmra.mxu3 %vm1333_vm0, %v4533_v47  ;;  %v2304_v40 = vmul.f32 %v5583_v6, %v2285_v9  ;;  %v4541_v6 = vld [vmem:[%s5218_s12 + $0x8] sm:$0xff]  ;;  %v4757_v47 = vld [vmem:[%s6547_s5] ss:$0 sm:$0xff]  ;;  %s6550_s5 = sld [smem:[#allocation19_spill]] }
 0x74d   : > { %2564 = vmatpush.bf16.msrb.mxu2 %v4541_v6  ;;  %v2478_v59 = vmul.f32 0.2, %v2462_v20  ;;  %v4758_v25 = vld [vmem:[%s6548_s7] ss:$0 sm:$0xff]  ;;  %s6552_s7 = sld [smem:[#allocation16_spill]] }
 0x74e   : > { %v2323_v39 = vadd.f32 %v5599_v32, %v2304_v40  ;;  %v2667_v32 = vsel %vm1333_vm0, %v5838_v0, 0.0  ;;  %v2490_v40 = vmax.f32 %v2458_v43, %v2474_v33 }
 0x74f   : > { %2668 = vadd.xlane.f32.xlu2 %v2667_v32  ;;  %v2494_v42 = vmax.f32 %v2462_v20, %v2478_v59 }
 0x750   : > { %v2331_v29 = vpack.c.bf16 %v2323_v39, %v2322_v48  ;;  %v2519_v27 = vsel %vm1333_vm0, %v2490_v40, -inf }
 0x751   : > { %2565 = vmatpush.bf16.msrb.mxu2 %v4540_v61 }
 0x752   : > { %4364 = vmatmul.msk.bf16.gmra.mxu1 %vm1333_vm0, %v2331_v29  ;;  %v2435_v17 = vpop.f32.mrf.mxu1 }
 0x753   : > { %v2463_v7 = vadd.f32 %v2435_v17, %v5769_v10  ;;  %v2520_v17 = vsel %vm1333_vm0, %v2492_v63, -inf }
 0x755   : > { %v2479_v8 = vmul.f32 0.2, %v2463_v7 }
 0x757   : > { %v2495_v23 = vmax.f32 %v2463_v7, %v2479_v8 }
 0x759   : > { %v2509_v34 = vsel %vm1333_vm0, %v2495_v23, -inf }
 0x75a   : > { %v2437_v2 = vpop.f32.mrf.mxu1 }
 0x75b   : > { %v2464_v51 = vadd.f32 %v2437_v2, %v2368_v16  ;;  %v2522_v2 = vsel %vm1333_vm0, %v2494_v42, -inf }
 0x75d   : > { %v2480_v62 = vmul.f32 0.2, %v2464_v51 }
 0x75f   : > { %v2496_v39 = vmax.f32 %v2464_v51, %v2480_v62 }
 0x762   : > { %v2440_v57 = vpop.f32.mrf.mxu1 }
 0x763   : > { %v2465_v3 = vadd.f32 %v2440_v57, %v5769_v10 }
 0x765   : > { %v2481_v12 = vmul.f32 0.2, %v2465_v3 }
 0x767   : > { %v2497_v24 = vmax.f32 %v2465_v3, %v2481_v12  ;;  %v2523_v3 = vmax.f32 %v2519_v27, %v2522_v2 }
 0x769   : > { %v2511_v5 = vsel %vm1333_vm0, %v2497_v24, -inf }
 0x76a   : > { %v2442_v55 = vpop.f32.mrf.mxu1  ;;  %v2512_v48 = vmax.f32 %v2508_v41, %v2511_v5  ;;  %v2524_v41 = vsel %vm1333_vm0, %v2496_v39, -inf  ;;  %v4545_v39 = vld [vmem:[%s6549_s3 + $0x8] sm:$0xff] }
 0x76b   : > { %v2466_v30 = vadd.f32 %v2442_v55, %v2368_v16  ;;  %2792 = vmatpush.bf16.msra.mxu2 %v4545_v39  ;;  %v4762_v39 = vld [vmem:[%s6555_s6] ss:$0 sm:$0xff]  ;;  %s6556_s6 = smov 120  }
 0x76d   : > { %v2482_v36 = vmul.f32 0.2, %v2466_v30 }
 0x76f   : > { %v2498_v29 = vmax.f32 %v2466_v30, %v2482_v36  ;;  %v4927_v36 = vld [vmem:[%s5326_s10 + $0x8] sm:$0xff] }
 0x771   : > { %v2526_v61 = vsel %vm1333_vm0, %v2498_v29, -inf  ;;  %v4547_v29 = vld [vmem:[%s6550_s5 + $0x8] sm:$0xff] }
 0x772   : > { %2818 = vmatpush.bf16.msrb.mxu3 %v4547_v29 }
 0x7b7   : > { %v2445_v58 = vpop.f32.mrf.mxu1 }
 0x7b8   : > { %v2467_v11 = vadd.f32 %v2445_v58, %v5769_v10 }
 0x7ba   : > { %v2483_v15 = vmul.f32 0.2, %v2467_v11 }
 0x7bc   : > { %v2499_v53 = vmax.f32 %v2467_v11, %v2483_v15 }
 0x7be   : > { %v2513_v44 = vsel %vm1333_vm0, %v2499_v53, -inf  ;;  %v4926_v53 = vld [vmem:[%s5326_s10] sm:$0xff]  ;;  %s6551_s10 = sld [smem:[#allocation15_spill]] }
 0x7bf   : > { %v2447_v54 = vpop.f32.mrf.mxu1 }
 0x7c0   : > { %v2468_v28 = vadd.f32 %v2447_v54, %v2368_v16 }
 0x7c2   : > { %v2484_v46 = vmul.f32 0.2, %v2468_v28  ;;  %v2669_v56 = vpop.xlane.xlu2 %2668 }
 0x7c3   : > { %v2673_v43 = vmul.f32 %v2669_v56, %v5334_v14 }
 0x7c4   : > { %v2500_v6 = vmax.f32 %v2468_v28, %v2484_v46 }
 0x7c5   : > { %v5877_v51 = vsub.f32 %v5838_v0, %v2673_v43 }
 0x7c6   : > { %v2528_v21 = vsel %vm1333_vm0, %v2500_v6, -inf }
 0x7c7   : > { %v2677_v23 = vmul.f32 %v5877_v51, %v5877_v51 }
 0x7c9   : > { %v2679_v24 = vsel %vm1333_vm0, %v2677_v23, 0.0 }
 0x7ca   : > { %2680 = vadd.xlane.f32.xlu1 %v2679_v24 }
 0x7cf   : > { %v2450_v35 = vpop.f32.mrf.mxu1  ;;  %v1895_v60 = vpop.f32.mrf.mxu3 }
 0x7d0   : > { %v2469_v31 = vadd.f32 %v2450_v35, %v5769_v10  ;;  %v2510_v10 = vmax.f32 %v2506_v4, %v2509_v34  ;;  %v1896_v58 = vadd.f32 %v4757_v47, %v1895_v60  ;;  %v2518_v4 = vsel %vm1333_vm0, %v2488_v45, -inf }
 0x7d1   : > { %v2521_v7 = vmax.f32 %v2518_v4, %v2520_v17 }
 0x7d2   : > { %v2485_v37 = vmul.f32 0.2, %v2469_v31  ;;  %v2514_v57 = vmax.f32 %v2510_v10, %v2513_v44 }
 0x7d3   : > { %v2525_v11 = vmax.f32 %v2521_v7, %v2524_v41 }
 0x7d4   : > { %v2501_v9 = vmax.f32 %v2469_v31, %v2485_v37  ;;  %v2672_v31 = vpop.xlane.xlu1 %2671 }
 0x7d5   : > { %v2529_v12 = vmax.f32 %v2525_v11, %v2528_v21  ;;  %v2674_v34 = vmul.f32 %v2672_v31, %v5334_v14 }
 0x7d6   : > { %v2515_v13 = vsel %vm1333_vm0, %v2501_v9, -inf }
 0x7d7   : > { %v2516_v52 = vmax.f32 %v2512_v48, %v2515_v13  ;;  %v2452_v55 = vpop.f32.mrf.mxu1  ;;  %v1897_v49 = vpop.f32.mrf.mxu3  ;;  %v2676_v63 = vsub.f32 %v5842_v50, %v2674_v34 }
 0x7d8   : > { %v2470_v38 = vadd.f32 %v2452_v55, %v2368_v16  ;;  %v1898_v26 = vadd.f32 %v4757_v47, %v1897_v49  ;;  %v2527_v16 = vmax.f32 %v2523_v3, %v2526_v61  ;;  %v4546_v55 = vld [vmem:[%s6550_s5] sm:$0xff]  ;;  %s6554_s5 = sld [smem:[#allocation13_spill]] }
 0x7d9   : > { %v2517_v1 = vmax.f32 %v2514_v57, %v2516_v52  ;;  %v2678_v44 = vmul.f32 %v2676_v63, %v2676_v63  ;;  %v4544_v52 = vld [vmem:[%s6549_s3] sm:$0xff]  ;;  %2819 = vmatpush.bf16.msrb.mxu3 %v4546_v55  ;;  %s6553_s3 = sld [smem:[#allocation17_spill]] }
 0x7da   : > { %v2486_v32 = vmul.f32 0.2, %v2470_v38  ;;  %v2533_v19 = vpack.c.bf16 %v1898_v26, %v1896_v58  ;;  %2793 = vmatpush.bf16.msra.mxu2 %v4544_v52 }
 0x7db   : > { %v2682_v46 = vsel %vm1333_vm0, %v2678_v44, 0.0 }
 0x7dc   : > { %v2502_v54 = vmax.f32 %v2470_v38, %v2486_v32  ;;  %4382 = vmatmul.msk.bf16.vlgmr.msra.gmra.mxu3 %vm1333_vm0, %v2533_v19 }
 0x7de   : > { %v2530_v8 = vsel %vm1333_vm0, %v2502_v54, -inf }
 0x7df   : > { %v2531_v18 = vmax.f32 %v2527_v16, %v2530_v8  ;;  %v4759_v16 = vld [vmem:[%s6551_s10] ss:$0 sm:$0xff] }
 0x7e1   : > { %v2532_v20 = vmax.f32 %v2529_v12, %v2531_v18 }
 0x7e3   : > { %v2538_v15 = vpack.c.bf16 %v2532_v20, %v2517_v1  ;;  %v4760_v20 = vld [vmem:[%s6552_s7] ss:$0 sm:$0xff] }
 0x7e5   : > { %4373 = vmatmul.msk.bf16.vlgmr.msrb.gmra.mxu2 %vm1333_vm0, %v2538_v15 }
 0x83d   : > { %v2681_v9 = vpop.xlane.xlu1 %2680 }
 0x83e   : > { %v2685_v47 = vmul.f32 %v2681_v9, %v5334_v14 }
 0x840   : > { %v2687_v45 = vadd.f32 1e-05, %v2685_v47 }
 0x842   : > { %4846 = vrsqrt.f32 %v2687_v45  ;;  %vm2695_vm6 = vweird.f32 %v2687_v45 }
 0x848   : > { %v4847_v2 = vpop.eup %4846 }
 0x849   : > { %v2690_v6 = vmul.f32 %v4847_v2, %v2687_v45  ;;  %vm2696_vm7 = vweird.f32 %v4847_v2  ;;  %v4761_v45 = vld [vmem:[%s6554_s5] ss:$0 sm:$0xff]  ;;  %s6557_s5 = smov 104  }
 0x84a   : > { %vm2697_vm8 = vmor %vm2695_vm6, %vm2696_vm7 }
 0x84b   : > { %v2691_v26 = vmul.f32 %v4847_v2, %v2690_v6 }
 0x84d   : > { %v2692_v41 = vmul.f32 0.5, %v2691_v26 }
 0x84f   : > { %v2693_v61 = vsub.f32 1.5, %v2692_v41 }
 0x851   : > { %v2694_v19 = vmul.f32 %v4847_v2, %v2693_v61 }
 0x853   : > { %v2698_v21 = vsel %vm2697_vm8, %v4847_v2, %v2694_v19 }
 0x854   : > { %v2709_v8 = vmul.f32 %v2698_v21, %v5877_v51 }
 0x856   : > { %v2714_v15 = vmul.f32 %v4759_v16, %v2709_v8 }
 0x858   : > { %v2719_v23 = vadd.f32 %v4760_v20, %v2714_v15 }
 0x85f   : > { %v2596_v30 = vpop.f32.mrf.mxu3 }
 0x867   : > { %v2598_v22 = vpop.f32.mrf.mxu3 }
 0x868   : > { %v2567_v59 = vpop.f32.mrf.mxu2 }
 0x869   : > { %v2597_v35 = vadd.f32 %v2596_v30, %v2567_v59 }
 0x86b   : > { %v2605_v60 = vadd.f32 %v4758_v25, %v2597_v35  ;;  %v4542_v35 = vld [vmem:[%s6553_s3] sm:$0xff] }
 0x86d   : > { %v5884_v28 = vadd.f32 %v4926_v53, %v2605_v60 }
 0x86f   : > { %v2611_v0 = vsel %vm1333_vm0, %v5884_v28, 0.0 }
 0x870   : > { %v2569_v33 = vpop.f32.mrf.mxu2  ;;  %2612 = vadd.xlane.f32.xlu0 %v2611_v0 }
 0x871   : > { %v2599_v62 = vadd.f32 %v2598_v22, %v2569_v33 }
 0x873   : > { %v2606_v5 = vadd.f32 %v4758_v25, %v2599_v62  ;;  %v4543_v25 = vld [vmem:[%s6553_s3 + $0x8] sm:$0xff]  ;;  %s6559_s3 = sld [smem:[#allocation9_spill]] }
 0x874   : > { %2761 = vmatpush.bf16.msra.mxu0 %v4543_v25 }
 0x875   : > { %v5890_v37 = vadd.f32 %v4927_v36, %v2606_v5 }
 0x877   : > { %v2614_v42 = vsel %vm1333_vm0, %v5890_v37, 0.0 }
 0x878   : > { %2615 = vadd.xlane.f32.xlu2 %v2614_v42  ;;  %2762 = vmatpush.bf16.msra.mxu0 %v4542_v35 }
 0x880   : > { %2683 = vadd.xlane.f32.xlu2 %v2682_v46 }
 0x8e3   : > { %v2613_v40 = vpop.xlane.xlu0 %2612 }
 0x8e4   : > { %v2617_v10 = vmul.f32 %v2613_v40, %v5334_v14 }
 0x8e6   : > { %v5899_v50 = vsub.f32 %v5884_v28, %v2617_v10 }
 0x8e8   : > { %v2621_v48 = vmul.f32 %v5899_v50, %v5899_v50 }
 0x8ea   : > { %v2623_v13 = vsel %vm1333_vm0, %v2621_v48, 0.0 }
 0x8eb   : > { %v2616_v17 = vpop.xlane.xlu2 %2615  ;;  %2624 = vadd.xlane.f32.xlu0 %v2623_v13 }
 0x8ec   : > { %v2618_v57 = vmul.f32 %v2616_v17, %v5334_v14 }
 0x8ee   : > { %v5910_v49 = vsub.f32 %v5890_v37, %v2618_v57 }
 0x8f0   : > { %v2622_v58 = vmul.f32 %v5910_v49, %v5910_v49 }
 0x8f2   : > { %v2626_v38 = vsel %vm1333_vm0, %v2622_v58, 0.0 }
 0x8f3   : > { %2627 = vadd.xlane.f32.xlu1 %v2626_v38  ;;  %v2684_v4 = vpop.xlane.xlu2 %2683 }
 0x8f4   : > { %v2686_v27 = vmul.f32 %v2684_v4, %v5334_v14 }
 0x8f6   : > { %v2688_v1 = vadd.f32 1e-05, %v2686_v27 }
 0x8f8   : > { %4848 = vrsqrt.f32 %v2688_v1  ;;  %vm2705_vm11 = vweird.f32 %v2688_v1 }
 0x8fe   : > { %v4849_v32 = vpop.eup %4848 }
 0x8ff   : > { %v2700_v7 = vmul.f32 %v4849_v32, %v2688_v1  ;;  %vm2706_vm12 = vweird.f32 %v4849_v32 }
 0x900   : > { %vm2707_vm13 = vmor %vm2705_vm11, %vm2706_vm12 }
 0x901   : > { %v2701_v3 = vmul.f32 %v4849_v32, %v2700_v7 }
 0x903   : > { %v2702_v54 = vmul.f32 0.5, %v2701_v3 }
 0x905   : > { %v2703_v11 = vsub.f32 1.5, %v2702_v54 }
 0x907   : > { %v2704_v12 = vmul.f32 %v4849_v32, %v2703_v11 }
 0x909   : > { %v2708_v18 = vsel %vm2707_vm13, %v4849_v32, %v2704_v12 }
 0x90a   : > { %v2710_v56 = vmul.f32 %v2708_v18, %v2676_v63 }
 0x90c   : > { %v2715_v43 = vmul.f32 %v4759_v16, %v2710_v56 }
 0x90e   : > { %v2720_v24 = vadd.f32 %v4760_v20, %v2715_v43 }
 0x910   : > { %v2722_v30 = vpack.c.bf16 %v2720_v24, %v2719_v23 }
 0x912   : > { %4400 = vmatmul.msk.bf16.vlgmr.msra.gmra.mxu2 %vm1333_vm0, %v2722_v30  ;;  %4409 = vmatmul.msk.bf16.vlgmr.msrb.gmra.mxu3 %vm1333_vm0, %v2722_v30 }
 0x95e   : > { %v2625_v59 = vpop.xlane.xlu0 %2624 }
 0x95f   : > { %v2629_v51 = vmul.f32 %v2625_v59, %v5334_v14 }
 0x961   : > { %v2631_v60 = vadd.f32 1e-05, %v2629_v51 }
 0x963   : > { %4850 = vrsqrt.f32 %v2631_v60  ;;  %vm2639_vm3 = vweird.f32 %v2631_v60 }
 0x966   : > { %v2628_v53 = vpop.xlane.xlu1 %2627 }
 0x967   : > { %v2630_v31 = vmul.f32 %v2628_v53, %v5334_v14 }
 0x969   : > { %v4851_v0 = vpop.eup %4850  ;;  %v2632_v22 = vadd.f32 1e-05, %v2630_v31 }
 0x96a   : > { %v2634_v33 = vmul.f32 %v4851_v0, %v2631_v60  ;;  %vm2640_vm2 = vweird.f32 %v4851_v0 }
 0x96b   : > { %4852 = vrsqrt.f32 %v2632_v22  ;;  %vm2641_vm4 = vmor %vm2639_vm3, %vm2640_vm2  ;;  %vm2649_vm7 = vweird.f32 %v2632_v22 }
 0x96c   : > { %v2635_v62 = vmul.f32 %v4851_v0, %v2634_v33 }
 0x96e   : > { %v2636_v34 = vmul.f32 0.5, %v2635_v62 }
 0x970   : > { %v2637_v5 = vsub.f32 1.5, %v2636_v34 }
 0x971   : > { %v4853_v36 = vpop.eup %4852 }
 0x972   : > { %v2638_v63 = vmul.f32 %v4851_v0, %v2637_v5  ;;  %v2644_v42 = vmul.f32 %v4853_v36, %v2632_v22  ;;  %vm2650_vm6 = vweird.f32 %v4853_v36 }
 0x973   : > { %vm2651_vm8 = vmor %vm2649_vm7, %vm2650_vm6 }
 0x974   : > { %v2645_v44 = vmul.f32 %v4853_v36, %v2644_v42  ;;  %v2642_v46 = vsel %vm2641_vm4, %v4851_v0, %v2638_v63 }
 0x975   : > { %v2653_v40 = vmul.f32 %v2642_v46, %v5899_v50 }
 0x976   : > { %v2646_v9 = vmul.f32 0.5, %v2645_v44 }
 0x977   : > { %v2658_v29 = vmul.f32 %v4761_v45, %v2653_v40 }
 0x978   : > { %v2647_v47 = vsub.f32 1.5, %v2646_v9 }
 0x979   : > { %v2663_v2 = vadd.f32 %v4762_v39, %v2658_v29 }
 0x97a   : > { %v2648_v10 = vmul.f32 %v4853_v36, %v2647_v47 }
 0x97c   : > { %v2652_v48 = vsel %vm2651_vm8, %v4853_v36, %v2648_v10 }
 0x97d   : > { %v2654_v13 = vmul.f32 %v2652_v48, %v5910_v49 }
 0x97f   : > { %v2659_v17 = vmul.f32 %v4761_v45, %v2654_v13 }
 0x981   : > { %v2664_v57 = vadd.f32 %v4762_v39, %v2659_v17 }
 0x983   : > { %v5929_v52 = vpack.c.bf16 %v2664_v57, %v2663_v2 }
 0x985   : > { %4391 = vmatmul.msk.bf16.vlgmr.msra.gmra.mxu0 %vm1333_vm0, %v5929_v52 }
 0x995   : > { %v2795_v55 = vpop.f32.mrf.mxu2  ;;  %v2821_v6 = vpop.f32.mrf.mxu3 }
 0x99d   : > { %v2797_v58 = vpop.f32.mrf.mxu2  ;;  %v2823_v50 = vpop.f32.mrf.mxu3 }
 0x99e   : > { %v2827_v38 = vpack.c.bf16 %v2797_v58, %v2795_v55  ;;  %v5933_v26 = vpack.c.bf16 %v2823_v50, %v2821_v6 }
 0x9a0   : > { %2882 = vmatpush.bf16.msrb.mxu2 %v5933_v26  ;;  %2897 = vrot.lane.b32.xlu2 %v2827_v38, %s6556_s6  ;;  %v2832_v49 = vsel %vm1550_vm14, %v2827_v38, 0 }
 0x9a1   : > { %2841 = vmatpush.bf16.xpose.msrb.mxu0 %v2832_v49 }
 0x9fa   : > { %v2898_v4 = vpop.permute.xlu2 %2897 }
 0x9fb   : > { %v2903_v27 = vsel %vm1550_vm14, %v2898_v4, 0 }
 0x9fc   : > { %2912 = vmatpush.bf16.xpose.msra.mxu3 %v2903_v27 }
 0xa02   : > { %v2764_v1 = vpop.f32.mrf.mxu0 }
 0xa03   : > { %v2769_v61 = vmul.f32 0.35355338, %v2764_v1 }
 0xa0a   : > { %v2766_v41 = vpop.f32.mrf.mxu0 }
 0xa0b   : > { %v2770_v32 = vmul.f32 0.35355338, %v2766_v41 }
 0xa0d   : > { %v2826_v19 = vpack.c.bf16 %v2770_v32, %v2769_v61 }
 0xa0f   : > { %2894 = vrot.lane.b32.xlu0 %v2826_v19, %s6556_s6  ;;  %4410 = vmatmul.msk.bf16.vlgmr.msrb.gmra.mxu0 %vm1550_vm14, %v2826_v19 }
 0xa81   : > { %v2895_v7 = vpop.permute.xlu0 %2894 }
 0xa82   : > { %4412 = vmatmul.msk.bf16.vlgmr.msra.gmra.mxu3 %vm1550_vm14, %v2895_v7 }
 0xa8c   : > { %v2843_v3 = vpop.f32.mrf.mxu0 }
 0xa8d   : > { %v2848_v21 = vsel %vm1571_vm15, %v2843_v3, -inf }
 0xa8e   : > { %2849 = vmax.xlane.f32.xlu1 %v2848_v21 }
 0xa94   : > { %v2845_v54 = vpop.f32.mrf.mxu0 }
 0xa95   : > { %v2851_v11 = vsel %vm1571_vm15, %v2845_v54, -inf }
 0xa96   : > { %2852 = vmax.xlane.f32.xlu1 %v2851_v11 }
 0xb01   : > { %v2850_v16 = vpop.xlane.xlu1 %2849 }
 0xb02   : > { %v2854_v8 = vsub.f32 %v2843_v3, %v2850_v16 }
 0xb04   : > { %v2856_v12 = vmul.f32 1.442695, %v2854_v8 }
 0xb05   : > { %v2914_v18 = vpop.f32.mrf.mxu3 }
 0xb06   : > { %4854 = vpow2.f32 %v2856_v12  ;;  %v2919_v20 = vsel %vm1571_vm15, %v2914_v18, -inf }
 0xb07   : > { %2920 = vmax.xlane.f32.xlu0 %v2919_v20 }
 0xb09   : > { %v2853_v24 = vpop.xlane.xlu1 %2852 }
 0xb0a   : > { %v2855_v30 = vsub.f32 %v2845_v54, %v2853_v24 }
 0xb0c   : > { %v4855_v15 = vpop.eup %4854  ;;  %v2858_v25 = vmul.f32 1.442695, %v2855_v30 }
 0xb0d   : > { %v2916_v56 = vpop.f32.mrf.mxu3  ;;  %v2860_v43 = vsel %vm1571_vm15, %v4855_v15, 0.0 }
 0xb0e   : > { %2861 = vadd.xlane.f32.xlu2 %v2860_v43  ;;  %v2922_v23 = vsel %vm1571_vm15, %v2916_v56, -inf  ;;  %4856 = vpow2.f32 %v2858_v25 }
 0xb0f   : > { %2923 = vmax.xlane.f32.xlu1 %v2922_v23 }
 0xb14   : > { %v4857_v59 = vpop.eup %4856 }
 0xb15   : > { %v2863_v51 = vsel %vm1571_vm15, %v4857_v59, 0.0 }
 0xb1b   : > { %2977 = vrot.lane.b32.xlu0 %v2827_v38, %s6540_s11 }
 0xb23   : > { %3054 = vrot.lane.b32.xlu0 %v2826_v19, %s6557_s5 }
 0xb26   : > { %3056 = vrot.lane.b32.xlu2 %v2827_v38, %s6557_s5 }
 0xb28   : > { %2943 = vrot.lane.b32.xlu1 %v5933_v26, %s6556_s6  ;;  %s6558_s6 = sld [smem:[#allocation31_spill]] }
 0xb2e   : > { %v4554_v6 = vld [vmem:[%s6558_s6 + $0x8] sm:$0xff]  ;;  %v4553_v50 = vld [vmem:[%s6558_s6] sm:$0xff]  ;;  %s6560_s6 = sshll.u32 %s5317_s0, 6  ;;  %s6562_s0 = sld [smem:[#allocation30_spill]] }
 0xb2f   : > { %s5987_s8 = scalar_lea.vmem %s6559_s3, %s6560_s6  ;;  %s6569_s3 = sld [smem:[#allocation21_spill]] }
 0xb30   : > { %s6571_s6 = sld [smem:[#allocation24_spill]] }
 0xb52   : > { %2864 = vadd.xlane.f32.xlu1 %v2863_v51 }
 0xb7a   : > { %v2921_v35 = vpop.xlane.xlu0 %2920 }
 0xb7b   : > { %v2925_v60 = vsub.f32 %v2914_v18, %v2921_v35 }
 0xb7d   : > { %v2927_v53 = vmul.f32 1.442695, %v2925_v60 }
 0xb7f   : > { %4858 = vpow2.f32 %v2927_v53 }
 0xb81   : > { %v2862_v36 = vpop.xlane.xlu2 %2861 }
 0xb82   : > { %v2924_v31 = vpop.xlane.xlu1 %2923 }
 0xb83   : > { %v2926_v0 = vsub.f32 %v2916_v56, %v2924_v31 }
 0xb85   : > { %v4859_v22 = vpop.eup %4858  ;;  %v2929_v33 = vmul.f32 1.442695, %v2926_v0  ;;  %v5992_v0 = vld [vmem:[%s5987_s8] sm:$0xff]  }
 0xb86   : > { %v2931_v62 = vsel %vm1571_vm15, %v4859_v22, 0.0 }
 0xb87   : > { %4860 = vpow2.f32 %v2929_v33  ;;  %2932 = vadd.xlane.f32.xlu1 %v2931_v62 }
 0xb88   : > { %4862 = vrcp.f32 %v2862_v36  ;;  %v4605_v36 = vunpack.c.h.bf16 %v5992_v0 }
 0xb89   : > { %v3057_v44 = vpop.permute.xlu2 %3056 }
 0xb8a   : > { %v3062_v9 = vsel %vm1550_vm14, %v3057_v44, 0 }
 0xb8d   : > { %v4861_v34 = vpop.eup %4860  ;;  %v2978_v5 = vpop.permute.xlu0 %2977 }
 0xb8e   : > { %v2983_v63 = vsel %vm1550_vm14, %v2978_v5, 0  ;;  %v2934_v42 = vsel %vm1571_vm15, %v4861_v34, 0.0  ;;  %v4863_v45 = vpop.eup %4862 }
 0xb8f   : > { %2992 = vmatpush.bf16.xpose.msra.mxu2 %v2983_v63  ;;  %2935 = vadd.xlane.f32.xlu1 %v2934_v42  ;;  %v2868_v10 = vmul.f32 %v4863_v45, %v4855_v15  ;;  %v3209_v63 = vsel %vm1333_vm0, %v4605_v36, 0.0  ;;  %v6009_v42 = vld [vmem:[%s5987_s8 + $0x8] sm:$0xff]  }
 0xb90   : > { %v4609_v44 = vunpack.c.h.bf16 %v6009_v42 }
 0xb95   : > { %v3055_v49 = vpop.permute.xlu0 %3054 }
 0xb9a   : > { %v2944_v46 = vpop.permute.xlu1 %2943 }
 0xb9b   : > { %2956 = vmatpush.bf16.msra.mxu0 %v2944_v46  ;;  %v3215_v46 = vsel %vm1333_vm0, %v4609_v44, 0.0 }
 0xb9f   : > { %3071 = vmatpush.bf16.xpose.msrb.mxu0 %v3062_v9  ;;  %v6018_v9 = vld [vmem:[%s5987_s8 + $0x10] sm:$0xff]  }
 0xba8   : > { %2975 = vrot.lane.b32.xlu1 %v2826_v19, %s6540_s11 }
 0xbc5   : > { %v2865_v47 = vpop.xlane.xlu1 %2864 }
 0xbc6   : > { %4864 = vrcp.f32 %v2865_v47  ;;  %v4613_v47 = vunpack.c.h.bf16 %v6018_v9 }
 0xbc8   : > { %v3221_v45 = vsel %vm1333_vm0, %v4613_v47, 0.0 }
 0xbcc   : > { %v4865_v40 = vpop.eup %4864 }
 0xbcd   : > { %v2869_v48 = vmul.f32 %v4865_v40, %v4857_v59  ;;  %v6025_v40 = vld [vmem:[%s5987_s8 + $0x28] sm:$0xff]  }
 0xbcf   : > { %v2870_v39 = vpack.c.bf16 %v2869_v48, %v2868_v10  ;;  %v4624_v10 = vunpack.c.l.bf16 %v6025_v40  ;;  %v4625_v48 = vunpack.c.h.bf16 %v6025_v40 }
 0xbd1   : > { %4411 = vmatmul.msk.bf16.vlgmr.msrb.gmra.mxu2 %vm1571_vm15, %v2870_v39  ;;  %v3239_v39 = vsel %vm1333_vm0, %v4625_v48, 0.0 }
 0xbfa   : > { %v2933_v29 = vpop.xlane.xlu1 %2932 }
 0xbfb   : > { %4866 = vrcp.f32 %v2933_v29  ;;  %v4612_v29 = vunpack.c.l.bf16 %v6018_v9 }
 0xc01   : > { %v4867_v17 = vpop.eup %4866 }
 0xc02   : > { %v2936_v13 = vpop.xlane.xlu1 %2935  ;;  %v2939_v57 = vmul.f32 %v4867_v17, %v4859_v22  ;;  %v4608_v17 = vunpack.c.l.bf16 %v6009_v42 }
 0xc03   : > { %4868 = vrcp.f32 %v2936_v13  ;;  %v3218_v13 = vsel %vm1333_vm0, %v4612_v29, 0.0 }
 0xc09   : > { %v4869_v2 = vpop.eup %4868 }
 0xc0a   : > { %v2940_v55 = vmul.f32 %v4869_v2, %v4861_v34  ;;  %v4604_v34 = vunpack.c.l.bf16 %v5992_v0  ;;  %v3212_v2 = vsel %vm1333_vm0, %v4608_v17, 0.0 }
 0xc0c   : > { %v2941_v58 = vpack.c.bf16 %v2940_v55, %v2939_v57  ;;  %v3206_v5 = vsel %vm1333_vm0, %v4604_v34, 0.0  ;;  %v6044_v57 = vld [vmem:[%s5987_s8 + $0x18] sm:$0xff]  }
 0xc0d   : > { %v4616_v55 = vunpack.c.l.bf16 %v6044_v57  ;;  %v4617_v0 = vunpack.c.h.bf16 %v6044_v57 }
 0xc0e   : > { %4413 = vmatmul.msk.bf16.vlgmr.msra.gmra.mxu0 %vm1571_vm15, %v2941_v58  ;;  %v6051_v58 = vld [vmem:[%s5987_s8 + $0x30] sm:$0xff]  }
 0xc0f   : > { %3634 = vmatpush.bf16.msra.mxu0 %v4554_v6  ;;  %v3224_v6 = vsel %vm1333_vm0, %v4616_v55, 0.0 }
 0xc13   : > { %3635 = vmatpush.bf16.msra.mxu0 %v4553_v50  ;;  %v4629_v50 = vunpack.c.h.bf16 %v6051_v58 }
 0xc1a   : > { %v2976_v38 = vpop.permute.xlu1 %2975 }
 0xc1b   : > { %4414 = vmatmul.msk.bf16.vlgmr.msra.gmra.mxu2 %vm1550_vm14, %v2976_v38  ;;  %v4628_v38 = vunpack.c.l.bf16 %v6051_v58 }
 0xc1e   : > { %4416 = vmatmul.msk.bf16.vlgmr.msrb.gmra.mxu0 %vm1550_vm14, %v3055_v49 }
 0xc2e   : > { %4439 = vmatmul.msk.bf16.vlgmr.msra.gmra.mxu0 %vm1333_vm0, %v5929_v52 }
 0xc54   : > { %v2884_v4 = vpop.f32.mrf.mxu2 }
 0xc55   : > { %v2889_v27 = vpack.c.bf16 %v2884_v4, %v2884_v4  ;;  %v3245_v4 = vsel %vm1333_vm0, %v4629_v50, 0.0 }
 0xc57   : > { %2891 = vst.msk [vmem:[#allocation2] sm:$0xf] %vm1615_vm1, %v2889_v27  ;;  %v3242_v27 = vsel %vm1333_vm0, %v4628_v38, 0.0 }
 0xc5c   : > { %v2886_v1 = vpop.f32.mrf.mxu2 }
 0xc5d   : > { %v2890_v41 = vpack.c.bf16 %v2886_v1, %v2886_v1  ;;  %v6062_v1 = vld [vmem:[%s5987_s8 + $0x20] sm:$0xff]  }
 0xc5f   : > { %2892 = vst.msk [vmem:[#allocation2 + $0x4] sm:$0xf] %vm1615_vm1, %v2890_v41  ;;  %v4620_v41 = vunpack.c.l.bf16 %v6062_v1 }
 0xc8b   : > { %v5968_v61 = vpop.f32.mrf.mxu0 }
 0xc93   : > { %v5970_v32 = vpop.f32.mrf.mxu0 }
 0xc9b   : > { %v3073_v19 = vpop.f32.mrf.mxu0 }
 0xc9c   : > { %v3078_v7 = vsel %vm1571_vm15, %v3073_v19, -inf }
 0xc9d   : > { %3079 = vmax.xlane.f32.xlu0 %v3078_v7 }
 0xc9e   : > { %v2994_v3 = vpop.f32.mrf.mxu2 }
 0xc9f   : > { %v2999_v21 = vsel %vm1571_vm15, %v2994_v3, -inf }
 0xca0   : > { %3000 = vmax.xlane.f32.xlu1 %v2999_v21  ;;  %v6069_v21 = vld [vmem:[%s5987_s8 + $0x38] sm:$0xff]   ;;  %s6561_s8 = smov 8  }
 0xca3   : > { %v3075_v52 = vpop.f32.mrf.mxu0 }
 0xca4   : > { %v3081_v11 = vsel %vm1571_vm15, %v3075_v52, -inf }
 0xca6   : > { %v2996_v54 = vpop.f32.mrf.mxu2 }
 0xca7   : > { %v3002_v16 = vsel %vm1571_vm15, %v2996_v54, -inf }
 0xca8   : > { %3082 = vmax.xlane.f32.xlu1 %v3081_v11  ;;  %3003 = vmax.xlane.f32.xlu2 %v3002_v16 }
 0xd10   : > { %v3080_v8 = vpop.xlane.xlu0 %3079 }
 0xd11   : > { %v3084_v12 = vsub.f32 %v3073_v19, %v3080_v8  ;;  %v3230_v19 = vsel %vm1333_vm0, %v4620_v41, 0.0 }
 0xd13   : > { %v3086_v18 = vmul.f32 1.442695, %v3084_v12  ;;  %v3001_v20 = vpop.xlane.xlu1 %3000 }
 0xd14   : > { %v3005_v15 = vsub.f32 %v2994_v3, %v3001_v20 }
 0xd15   : > { %4870 = vpow2.f32 %v3086_v18 }
 0xd16   : > { %v3007_v56 = vmul.f32 1.442695, %v3005_v15 }
 0xd18   : > { %4872 = vpow2.f32 %v3007_v56 }
 0xd1b   : > { %v5976_v43 = vpop.eup %4870  ;;  %v3083_v23 = vpop.xlane.xlu1 %3082 }
 0xd1c   : > { %v3004_v24 = vpop.xlane.xlu2 %3003  ;;  %v3085_v30 = vsub.f32 %v3075_v52, %v3083_v23  ;;  %v3090_v59 = vsel %vm1571_vm15, %v5976_v43, 0.0  ;;  %v4633_v52 = vunpack.c.h.bf16 %v6069_v21 }
 0xd1d   : > { %v3006_v25 = vsub.f32 %v2996_v54, %v3004_v24  ;;  %3091 = vadd.xlane.f32.xlu1 %v3090_v59 }
 0xd1e   : > { %v5980_v51 = vpop.eup %4872  ;;  %v3088_v35 = vmul.f32 1.442695, %v3085_v30  ;;  %v3251_v11 = vsel %vm1333_vm0, %v4633_v52, 0.0 }
 0xd1f   : > { %v3009_v60 = vmul.f32 1.442695, %v3006_v25  ;;  %v3011_v53 = vsel %vm1571_vm15, %v5980_v51, 0.0 }
 0xd20   : > { %4874 = vpow2.f32 %v3088_v35  ;;  %3012 = vadd.xlane.f32.xlu2 %v3011_v53 }
 0xd21   : > { %4876 = vpow2.f32 %v3009_v60 }
 0xd26   : > { %v5989_v31 = vpop.eup %4874 }
 0xd27   : > { %v5994_v22 = vpop.eup %4876  ;;  %v3093_v33 = vsel %vm1571_vm15, %v5989_v31, 0.0 }
 0xd28   : > { %3094 = vadd.xlane.f32.xlu2 %v3093_v33  ;;  %v3014_v62 = vsel %vm1571_vm15, %v5994_v22, 0.0 }
 0xd29   : > { %3015 = vadd.xlane.f32.xlu0 %v3014_v62 }
 0xd30   : > { %3207 = vadd.xlane.f32.xlu2 %v3206_v5 }
 0xd36   : > { %3101 = vrot.lane.b32.xlu1 %v5933_v26, %s6557_s5  ;;  %s6570_s5 = sld [smem:[#allocation32_spill]] }
 0xd38   : > { %3210 = vadd.xlane.f32.xlu2 %v3209_v63 }
 0xd3d   : > { %3022 = vrot.lane.b32.xlu0 %v5933_v26, %s6540_s11  ;;  %v3236_v26 = vsel %vm1333_vm0, %v4624_v10, 0.0  ;;  %s6563_s11 = smov 24  }
 0xd40   : > { %3216 = vadd.xlane.f32.xlu2 %v3215_v46 }
 0xd48   : > { %3222 = vadd.xlane.f32.xlu2 %v3221_v45 }
 0xd50   : > { %3237 = vadd.xlane.f32.xlu2 %v3236_v26 }
 0xd58   : > { %3240 = vadd.xlane.f32.xlu2 %v3239_v39 }
 0xd60   : > { %3219 = vadd.xlane.f32.xlu1 %v3218_v13 }
 0xd67   : > { %3213 = vadd.xlane.f32.xlu0 %v3212_v2  ;;  %v4632_v2 = vunpack.c.l.bf16 %v6069_v21 }
 0xd68   : > { %3246 = vadd.xlane.f32.xlu1 %v3245_v4 }
 0xd6f   : > { %3225 = vadd.xlane.f32.xlu0 %v3224_v6  ;;  %v3248_v6 = vsel %vm1333_vm0, %v4632_v2, 0.0 }
 0xd70   : > { %3231 = vadd.xlane.f32.xlu1 %v3230_v19 }
 0xd77   : > { %3243 = vadd.xlane.f32.xlu0 %v3242_v27 }
 0xd78   : > { %3252 = vadd.xlane.f32.xlu1 %v3251_v11 }
 0xd90   : > { %v3092_v3 = vpop.xlane.xlu1 %3091 }
 0xd93   : > { %v3013_v49 = vpop.xlane.xlu2 %3012 }
 0xd9b   : > { %v3095_v7 = vpop.xlane.xlu2 %3094 }
 0xd9c   : > { %4878 = vrcp.f32 %v3095_v7  ;;  %v3016_v54 = vpop.xlane.xlu0 %3015 }
 0xd9d   : > { %4880 = vrcp.f32 %v3092_v3 }
 0xd9e   : > { %4882 = vrcp.f32 %v3016_v54 }
 0xd9f   : > { %4884 = vrcp.f32 %v3013_v49 }
 0xda2   : > { %v4879_v16 = vpop.eup %4878 }
 0xda3   : > { %v3208_v8 = vpop.xlane.xlu2 %3207  ;;  %v4881_v18 = vpop.eup %4880  ;;  %v3099_v20 = vmul.f32 %v4879_v16, %v5989_v31  ;;  %v2963_v16 = vpack.c.bf16 %v5968_v61, %v5968_v61  ;;  %v4621_v61 = vunpack.c.h.bf16 %v6062_v1 }
 0xda4   : > { %v3254_v12 = vmul.f32 %v3208_v8, %v5334_v14  ;;  %v3098_v56 = vmul.f32 %v4881_v18, %v5976_v43  ;;  %v4883_v30 = vpop.eup %4882 }
 0xda5   : > { %v4885_v60 = vpop.eup %4884  ;;  %v3020_v31 = vmul.f32 %v4883_v30, %v5994_v22 }
 0xda6   : > { %v6077_v15 = vsub.f32 %v4604_v34, %v3254_v12  ;;  %v3100_v25 = vpack.c.bf16 %v3099_v20, %v3098_v56  ;;  %v3019_v33 = vmul.f32 %v4885_v60, %v5980_v51  ;;  %v3227_v51 = vsel %vm1333_vm0, %v4617_v0, 0.0 }
 0xda7   : > { %v2964_v20 = vpack.c.bf16 %v5970_v32, %v5970_v32 }
 0xda8   : > { %v3102_v23 = vpop.permute.xlu1 %3101  ;;  %v3286_v24 = vmul.f32 %v6077_v15, %v6077_v15  ;;  %v3021_v5 = vpack.c.bf16 %v3020_v31, %v3019_v33 }
 0xda9   : > { %3114 = vmatpush.bf16.msrb.mxu2 %v3102_v23 }
 0xdaa   : > { %v3302_v59 = vsel %vm1333_vm0, %v3286_v24, 0.0 }
 0xdab   : > { %3303 = vadd.xlane.f32.xlu2 %v3302_v59  ;;  %v3211_v35 = vpop.xlane.xlu2 %3210 }
 0xdac   : > { %v3255_v53 = vmul.f32 %v3211_v35, %v5334_v14  ;;  %4417 = vmatmul.msk.bf16.vlgmr.msrb.gmra.mxu2 %vm1571_vm15, %v3100_v25 }
 0xdae   : > { %v6088_v43 = vsub.f32 %v4605_v36, %v3255_v53  ;;  %v6170_v53 = vld [vmem:[%s6562_s0 + $0x8] sm:$0xff] }
 0xdaf   : > { %v3023_v62 = vpop.permute.xlu0 %3022  ;;  %3684 = vmatpush.bf16.msra.mxu2 %v6170_v53 }
 0xdb0   : > { %3035 = vmatpush.bf16.msrb.mxu3 %v3023_v62  ;;  %v3287_v34 = vmul.f32 %v6088_v43, %v6088_v43 }
 0xdb2   : > { %v3305_v63 = vsel %vm1333_vm0, %v3287_v34, 0.0  ;;  %v6175_v34 = vld [vmem:[%s6562_s0] sm:$0xff]  ;;  %s6575_s0 = sld [smem:[#allocation25_spill]] }
 0xdb3   : > { %4415 = vmatmul.msk.bf16.vlgmr.msrb.gmra.mxu3 %vm1571_vm15, %v3021_v5  ;;  %3306 = vadd.xlane.f32.xlu2 %v3305_v63  ;;  %v3217_v46 = vpop.xlane.xlu2 %3216 }
 0xdb4   : > { %v3257_v22 = vmul.f32 %v3217_v46, %v5334_v14  ;;  %3685 = vmatpush.bf16.msra.mxu2 %v6175_v34 }
 0xdb6   : > { %v6099_v36 = vsub.f32 %v4609_v44, %v3257_v22 }
 0xdb8   : > { %v3289_v45 = vmul.f32 %v6099_v36, %v6099_v36 }
 0xdba   : > { %v3311_v26 = vsel %vm1333_vm0, %v3289_v45, 0.0 }
 0xdbb   : > { %3228 = vadd.xlane.f32.xlu2 %v3227_v51  ;;  %3312 = vadd.xlane.f32.xlu0 %v3311_v26  ;;  %v3223_v39 = vpop.xlane.xlu2 %3222 }
 0xdbc   : > { %v3259_v13 = vmul.f32 %v3223_v39, %v5334_v14 }
 0xdbe   : > { %v6111_v44 = vsub.f32 %v4613_v47, %v3259_v13 }
 0xdc0   : > { %v3291_v27 = vmul.f32 %v6111_v44, %v6111_v44 }
 0xdc2   : > { %v3317_v7 = vsel %vm1333_vm0, %v3291_v27, 0.0 }
 0xdc3   : > { %3249 = vadd.xlane.f32.xlu0 %v3248_v6  ;;  %v3238_v49 = vpop.xlane.xlu2 %3237 }
 0xdc4   : > { %v3264_v4 = vmul.f32 %v3238_v49, %v5334_v14 }
 0xdc6   : > { %v6121_v19 = vsub.f32 %v4624_v10, %v3264_v4 }
 0xdc8   : > { %v3296_v47 = vmul.f32 %v6121_v19, %v6121_v19 }
 0xdca   : > { %v3332_v3 = vsel %vm1333_vm0, %v3296_v47, 0.0 }
 0xdcb   : > { %3318 = vadd.xlane.f32.xlu0 %v3317_v7  ;;  %3333 = vadd.xlane.f32.xlu1 %v3332_v3  ;;  %v3241_v23 = vpop.xlane.xlu2 %3240 }
 0xdcc   : > { %v3265_v24 = vmul.f32 %v3241_v23, %v5334_v14 }
 0xdce   : > { %v6156_v25 = vsub.f32 %v4625_v48, %v3265_v24 }
 0xdd0   : > { %v3297_v59 = vmul.f32 %v6156_v25, %v6156_v25 }
 0xdd2   : > { %v3335_v60 = vsel %vm1333_vm0, %v3297_v59, 0.0 }
 0xdd3   : > { %v3220_v12 = vpop.xlane.xlu1 %3219 }
 0xdd4   : > { %v3258_v56 = vmul.f32 %v3220_v12, %v5334_v14 }
 0xdd6   : > { %v6145_v42 = vsub.f32 %v4612_v29, %v3258_v56 }
 0xdd8   : > { %v3290_v32 = vmul.f32 %v6145_v42, %v6145_v42 }
 0xdda   : > { %v3214_v54 = vpop.xlane.xlu0 %3213  ;;  %v3314_v30 = vsel %vm1333_vm0, %v3290_v32, 0.0 }
 0xddb   : > { %v3256_v11 = vmul.f32 %v3214_v54, %v5334_v14  ;;  %v3247_v49 = vpop.xlane.xlu1 %3246 }
 0xddd   : > { %v6132_v8 = vsub.f32 %v4608_v17, %v3256_v11  ;;  %v3233_v17 = vsel %vm1333_vm0, %v4621_v61, 0.0 }
 0xddf   : > { %2967 = vrot.lane.b32.xlu0 %v2963_v16, %s6561_s8  ;;  %v3288_v10 = vmul.f32 %v6132_v8, %v6132_v8 }
 0xde1   : > { %v3308_v18 = vsel %vm1333_vm0, %v3288_v10, 0.0 }
 0xde2   : > { %3309 = vadd.xlane.f32.xlu2 %v3308_v18  ;;  %v3226_v9 = vpop.xlane.xlu0 %3225 }
 0xde3   : > { %v3260_v29 = vmul.f32 %v3226_v9, %v5334_v14  ;;  %v6194_v23 = vpop.xlane.xlu1 %3231 }
 0xde4   : > { %2969 = vrot.lane.b32.xlu1 %v2964_v20, %s6561_s8  ;;  %v6190_v20 = vld [vmem:[%s6551_s10] ss:$0 sm:$0xff] }
 0xde5   : > { %v6163_v35 = vsub.f32 %v4616_v55, %v3260_v29 }
 0xde7   : > { %v3292_v40 = vmul.f32 %v6163_v35, %v6163_v35 }
 0xde9   : > { %v3320_v48 = vsel %vm1333_vm0, %v3292_v40, 0.0 }
 0xdea   : > { %3234 = vadd.xlane.f32.xlu2 %v3233_v17  ;;  %v6179_v51 = vpop.xlane.xlu0 %3243 }
 0xdf2   : > { %3315 = vadd.xlane.f32.xlu2 %v3314_v30  ;;  %v6197_v30 = vld [vmem:[%s6552_s7] ss:$0 sm:$0xff] }
 0xdfa   : > { %3336 = vadd.xlane.f32.xlu2 %v3335_v60 }
 0xe02   : > { %3321 = vadd.xlane.f32.xlu2 %v3320_v48 }
 0xe1e   : > { %v3304_v31 = vpop.xlane.xlu2 %3303 }
 0xe1f   : > { %v3350_v33 = vmul.f32 %v3304_v31, %v5334_v14 }
 0xe21   : > { %v3366_v62 = vadd.f32 1e-05, %v3350_v33 }
 0xe23   : > { %4886 = vrsqrt.f32 %v3366_v62  ;;  %vm3388_vm15 = vweird.f32 %v3366_v62 }
 0xe26   : > { %v3307_v55 = vpop.xlane.xlu2 %3306 }
 0xe27   : > { %v3351_v5 = vmul.f32 %v3307_v55, %v5334_v14 }
 0xe29   : > { %v4887_v63 = vpop.eup %4886  ;;  %v3367_v46 = vadd.f32 1e-05, %v3351_v5  ;;  %v6206_v5 = vpop.xlane.xlu1 %3252 }
 0xe2a   : > { %v3383_v22 = vmul.f32 %v4887_v63, %v3366_v62  ;;  %vm3389_vm14 = vweird.f32 %v4887_v63 }
 0xe2b   : > { %4888 = vrsqrt.f32 %v3367_v46  ;;  %vm3390_vm1 = vmor %vm3388_vm15, %vm3389_vm14  ;;  %vm3398_vm12 = vweird.f32 %v3367_v46 }
 0xe2c   : > { %v3384_v45 = vmul.f32 %v4887_v63, %v3383_v22 }
 0xe2e   : > { %v3385_v26 = vmul.f32 0.5, %v3384_v45  ;;  %v3229_v39 = vpop.xlane.xlu2 %3228  ;;  %v3313_v11 = vpop.xlane.xlu0 %3312 }
 0xe2f   : > { %v3261_v13 = vmul.f32 %v3229_v39, %v5334_v14  ;;  %v3116_v32 = vpop.f32.mrf.mxu2 }
 0xe30   : > { %v3386_v6 = vsub.f32 1.5, %v3385_v26  ;;  %v3121_v45 = vpack.c.bf16 %v3116_v32, %v3116_v32 }
 0xe31   : > { %v4889_v4 = vpop.eup %4888  ;;  %v6184_v27 = vsub.f32 %v4617_v0, %v3261_v13 }
 0xe32   : > { %v3387_v7 = vmul.f32 %v4887_v63, %v3386_v6  ;;  %v3393_v47 = vmul.f32 %v4889_v4, %v3367_v46  ;;  %vm3399_vm11 = vweird.f32 %v4889_v4 }
 0xe33   : > { %v3293_v3 = vmul.f32 %v6184_v27, %v6184_v27  ;;  %vm3400_vm13 = vmor %vm3398_vm12, %vm3399_vm11 }
 0xe34   : > { %v3394_v54 = vmul.f32 %v4889_v4, %v3393_v47  ;;  %v3391_v10 = vsel %vm3390_vm1, %v4887_v63, %v3387_v7  ;;  %v3267_v47 = vmul.f32 %v3247_v49, %v5334_v14 }
 0xe35   : > { %v3323_v16 = vsel %vm1333_vm0, %v3293_v3, 0.0  ;;  %v3542_v56 = vmul.f32 %v3391_v10, %v6077_v15  ;;  %v3353_v15 = vmul.f32 %v3313_v11, %v5334_v14 }
 0xe36   : > { %v3395_v12 = vmul.f32 0.5, %v3394_v54  ;;  %v3037_v18 = vpop.f32.mrf.mxu3  ;;  %3324 = vadd.xlane.f32.xlu1 %v3323_v16  ;;  %v3250_v40 = vpop.xlane.xlu0 %3249 }
 0xe37   : > { %v3042_v57 = vpack.c.bf16 %v3037_v18, %v3037_v18  ;;  %v3561_v9 = vmul.f32 %v6190_v20, %v3542_v56  ;;  %v3369_v62 = vadd.f32 1e-05, %v3353_v15  ;;  %v3118_v63 = vpop.f32.mrf.mxu2  ;;  %v3268_v18 = vmul.f32 %v3250_v40, %v5334_v14 }
 0xe38   : > { %v3396_v0 = vsub.f32 1.5, %v3395_v12  ;;  %v6223_v12 = vsub.f32 %v4629_v50, %v3267_v47 }
 0xe39   : > { %3046 = vrot.lane.b32.xlu2 %v3042_v57, %s6545_s16  ;;  %v3580_v31 = vadd.f32 %v6197_v30, %v3561_v9  ;;  %4890 = vrsqrt.f32 %v3369_v62  ;;  %vm3418_vm2 = vweird.f32 %v3369_v62 }
 0xe3a   : > { %v3397_v17 = vmul.f32 %v4889_v4, %v3396_v0  ;;  %v3299_v49 = vmul.f32 %v6223_v12, %v6223_v12 }
 0xe3c   : > { %v3401_v24 = vsel %vm3400_vm13, %v4889_v4, %v3397_v17  ;;  %v6232_v17 = vsub.f32 %v4632_v2, %v3268_v18  ;;  %v3266_v2 = vmul.f32 %v6179_v51, %v5334_v14 }
 0xe3d   : > { %v3543_v29 = vmul.f32 %v3401_v24, %v6088_v43  ;;  %v3122_v43 = vpack.c.bf16 %v3118_v63, %v3118_v63 }
 0xe3e   : > { %v3039_v59 = vpop.f32.mrf.mxu3  ;;  %v3319_v46 = vpop.xlane.xlu0 %3318  ;;  %v3300_v15 = vmul.f32 %v6232_v17, %v6232_v17 }
 0xe3f   : > { %v3562_v60 = vmul.f32 %v6190_v20, %v3543_v29  ;;  %v3043_v48 = vpack.c.bf16 %v3039_v59, %v3039_v59  ;;  %v4891_v22 = vpop.eup %4890  ;;  %v6210_v26 = vpop.xlane.xlu1 %3333  ;;  %v3355_v13 = vmul.f32 %v3319_v46, %v5334_v14  ;;  %v3341_v59 = vsel %vm1333_vm0, %v3299_v49, 0.0 }
 0xe40   : > { %v3413_v39 = vmul.f32 %v4891_v22, %v3369_v62  ;;  %v3344_v63 = vsel %vm1333_vm0, %v3300_v15, 0.0 }
 0xe41   : > { %v3581_v33 = vadd.f32 %v6197_v30, %v3562_v60  ;;  %3048 = vrot.lane.b32.xlu0 %v3043_v48, %s6545_s16  ;;  %v6215_v7 = vadd.f32 1e-05, %v3355_v13  ;;  %s6566_s16 = sld [smem:[#allocation20_spill]] }
 0xe42   : > { %v3414_v4 = vmul.f32 %v4891_v22, %v3413_v39  ;;  %v3262_v39 = vmul.f32 %v6194_v23, %v5334_v14 }
 0xe43   : > { %v3596_v55 = vpack.c.bf16 %v3581_v33, %v3580_v31  ;;  %4892 = vrsqrt.f32 %v6215_v7  ;;  %vm3438_vm8 = vweird.f32 %v6215_v7 }
 0xe44   : > { %v3415_v16 = vmul.f32 0.5, %v3414_v4 }
 0xe45   : > { %4448 = vmatmul.msk.bf16.vlgmr.msra.gmra.mxu2 %vm1333_vm0, %v3596_v55 }
 0xe46   : > { %v3416_v57 = vsub.f32 1.5, %v3415_v16 }
 0xe48   : > { %v3417_v24 = vmul.f32 %v4891_v22, %v3416_v57 }
 0xe49   : > { %3127 = vrot.lane.b32.xlu0 %v3122_v43, %s6563_s11  ;;  %v6228_v56 = vpop.eup %4892  ;;  %v6252_v43 = vsub.f32 %v4628_v38, %v3266_v2 }
 0xe4a   : > { %v3433_v9 = vmul.f32 %v6228_v56, %v6215_v7  ;;  %vm3439_vm14 = vweird.f32 %v6228_v56  ;;  %v3269_v7 = vmul.f32 %v6206_v5, %v5334_v14 }
 0xe4b   : > { %v3298_v58 = vmul.f32 %v6252_v43, %v6252_v43  ;;  %vm3440_vm15 = vmor %vm3438_vm8, %vm3439_vm14 }
 0xe4c   : > { %v3434_v48 = vmul.f32 %v6228_v56, %v3433_v9 }
 0xe4f   : > { %3125 = vrot.lane.b32.xlu1 %v3121_v45, %s6563_s11  ;;  %s6572_s11 = sld [smem:[#allocation22_spill]] }
 0xe51   : > { %v2968_v6 = vpop.permute.xlu0 %2967 }
 0xe52   : > { %2973 = vst.msk [vmem:[#allocation2] sm:$0xf] %vm1698_vm5, %v2968_v6 }
 0xe55   : > { %v3310_v3 = vpop.xlane.xlu2 %3309 }
 0xe56   : > { %v3352_v54 = vmul.f32 %v3310_v3, %v5334_v14  ;;  %v2970_v11 = vpop.permute.xlu1 %2969  ;;  %v6265_v3 = vsub.f32 %v4620_v41, %v3262_v39 }
 0xe57   : > { %2974 = vst.msk [vmem:[#allocation2 + $0x4] sm:$0xf] %vm1698_vm5, %v2970_v11  ;;  %vm3419_vm5 = vweird.f32 %v4891_v22 }
 0xe58   : > { %v3368_v10 = vadd.f32 1e-05, %v3352_v54  ;;  %vm6234_vm3 = vmor %vm3418_vm2, %vm3419_vm5  ;;  %v3338_v54 = vsel %vm1333_vm0, %v3298_v58, 0.0  ;;  %v3294_v1 = vmul.f32 %v6265_v3, %v6265_v3 }
 0xe59   : > { %v3421_v40 = vsel %vm6234_vm3, %v4891_v22, %v3417_v24  ;;  %v3435_v22 = vmul.f32 0.5, %v3434_v48  ;;  %v6287_v24 = vsub.f32 %v4633_v52, %v3269_v7 }
 0xe5a   : > { %4894 = vrsqrt.f32 %v3368_v10  ;;  %vm3408_vm4 = vweird.f32 %v3368_v10  ;;  %v3545_v51 = vmul.f32 %v3421_v40, %v6099_v36  ;;  %v3326_v50 = vsel %vm1333_vm0, %v3294_v1, 0.0 }
 0xe5b   : > { %v3436_v36 = vsub.f32 1.5, %v3435_v22 }
 0xe5c   : > { %v3564_v38 = vmul.f32 %v6190_v20, %v3545_v51  ;;  %v3360_v51 = vmul.f32 %v6210_v26, %v5334_v14 }
 0xe5d   : > { %v3235_v0 = vpop.xlane.xlu2 %3234 }
 0xe5e   : > { %v3263_v4 = vmul.f32 %v3235_v0, %v5334_v14  ;;  %v3583_v16 = vadd.f32 %v6197_v30, %v3564_v38  ;;  %v3376_v39 = vadd.f32 1e-05, %v3360_v51 }
 0xe60   : > { %v4895_v32 = vpop.eup %4894  ;;  %vm3488_vm8 = vweird.f32 %v3376_v39 }
 0xe61   : > { %v3403_v29 = vmul.f32 %v4895_v32, %v3368_v10  ;;  %vm3409_vm6 = vweird.f32 %v4895_v32  ;;  %v3437_v10 = vmul.f32 %v6228_v56, %v3436_v36 }
 0xe62   : > { %3342 = vadd.xlane.f32.xlu2 %v3341_v59  ;;  %vm3410_vm7 = vmor %vm3408_vm4, %vm3409_vm6 }
 0xe63   : > { %v3404_v60 = vmul.f32 %v4895_v32, %v3403_v29  ;;  %v3441_v0 = vsel %vm3440_vm15, %v6228_v56, %v3437_v10 }
 0xe64   : > { %v3547_v5 = vmul.f32 %v3441_v0, %v6111_v44 }
 0xe65   : > { %v3405_v31 = vmul.f32 0.5, %v3404_v60  ;;  %v3316_v33 = vpop.xlane.xlu2 %3315  ;;  %v3301_v60 = vmul.f32 %v6287_v24, %v6287_v24 }
 0xe66   : > { %v3354_v62 = vmul.f32 %v3316_v33, %v5334_v14  ;;  %v3566_v21 = vmul.f32 %v6190_v20, %v3547_v5 }
 0xe67   : > { %v3406_v55 = vsub.f32 1.5, %v3405_v31  ;;  %v3347_v44 = vsel %vm1333_vm0, %v3301_v60, 0.0 }
 0xe68   : > { %v3370_v46 = vadd.f32 1e-05, %v3354_v62  ;;  %v3585_v2 = vadd.f32 %v6197_v30, %v3566_v21 }
 0xe69   : > { %v3407_v45 = vmul.f32 %v4895_v32, %v3406_v55 }
 0xe6a   : > { %4896 = vrsqrt.f32 %v3370_v46  ;;  %3345 = vadd.xlane.f32.xlu2 %v3344_v63  ;;  %vm3428_vm1 = vweird.f32 %v3370_v46  ;;  %v4549_v63 = vld [vmem:[%s6566_s16 + $0x8] sm:$0xff] }
 0xe6b   : > { %v3411_v13 = vsel %vm3410_vm7, %v4895_v32, %v3407_v45  ;;  %3164 = vmatpush.bf16.msra.mxu3 %v4549_v63  ;;  %v4548_v45 = vld [vmem:[%s6566_s16] sm:$0xff] }
 0xe6c   : > { %v3544_v6 = vmul.f32 %v3411_v13, %v6132_v8  ;;  %v6271_v8 = vsub.f32 %v4621_v61, %v3263_v4 }
 0xe6d   : > { %v3337_v40 = vpop.xlane.xlu2 %3336 }
 0xe6e   : > { %v3563_v47 = vmul.f32 %v6190_v20, %v3544_v6  ;;  %v3295_v61 = vmul.f32 %v6271_v8, %v6271_v8 }
 0xe6f   : > { %3165 = vmatpush.bf16.msra.mxu3 %v4548_v45 }
 0xe70   : > { %v4897_v23 = vpop.eup %4896  ;;  %v3582_v11 = vadd.f32 %v6197_v30, %v3563_v47  ;;  %v3329_v9 = vsel %vm1333_vm0, %v3295_v61, 0.0 }
 0xe71   : > { %v3423_v18 = vmul.f32 %v4897_v23, %v3370_v46  ;;  %vm3429_vm11 = vweird.f32 %v4897_v23  ;;  %v3361_v46 = vmul.f32 %v3337_v40, %v5334_v14 }
 0xe72   : > { %v3597_v41 = vpack.c.bf16 %v3583_v16, %v3582_v11  ;;  %vm3430_vm12 = vmor %vm3428_vm1, %vm3429_vm11 }
 0xe73   : > { %v3424_v57 = vmul.f32 %v4897_v23, %v3423_v18  ;;  %3339 = vadd.xlane.f32.xlu0 %v3338_v54  ;;  %v3377_v13 = vadd.f32 1e-05, %v3361_v46  ;;  %4648 = vmatpush.bf16.msrb.mxu3 %v6170_v53 }
 0xe74   : > { %4449 = vmatmul.msk.bf16.gmra.mxu2 %vm1333_vm0, %v3597_v41 }
 0xe75   : > { %v3425_v49 = vmul.f32 0.5, %v3424_v57  ;;  %vm3498_vm6 = vweird.f32 %v3377_v13 }
 0xe77   : > { %v3426_v32 = vsub.f32 1.5, %v3425_v49  ;;  %4649 = vmatpush.bf16.msrb.mxu3 %v6175_v34 }
 0xe79   : > { %v3427_v29 = vmul.f32 %v4897_v23, %v3426_v32  ;;  %3327 = vadd.xlane.f32.xlu1 %v3326_v50 }
 0xe7b   : > { %v3431_v59 = vsel %vm3430_vm12, %v4897_v23, %v3427_v29  ;;  %3330 = vadd.xlane.f32.xlu0 %v3329_v9 }
 0xe7c   : > { %v3546_v56 = vmul.f32 %v3431_v59, %v6145_v42  ;;  %v3322_v42 = vpop.xlane.xlu2 %3321 }
 0xe7d   : > { %v3356_v33 = vmul.f32 %v3322_v42, %v5334_v14 }
 0xe7e   : > { %v3565_v52 = vmul.f32 %v6190_v20, %v3546_v56 }
 0xe7f   : > { %v3372_v62 = vadd.f32 1e-05, %v3356_v33 }
 0xe80   : > { %v3584_v15 = vadd.f32 %v6197_v30, %v3565_v52 }
 0xe81   : > { %3348 = vadd.xlane.f32.xlu1 %v3347_v44  ;;  %4898 = vrsqrt.f32 %v3372_v62  ;;  %vm3448_vm13 = vweird.f32 %v3372_v62 }
 0xe82   : > { %v3598_v48 = vpack.c.bf16 %v3585_v2, %v3584_v15  ;;  %4900 = vrsqrt.f32 %v3376_v39 }
 0xe83   : > { %4902 = vrsqrt.f32 %v3377_v13 }
 0xe84   : > { %4450 = vmatmul.msk.bf16.gmra.mxu2 %vm1333_vm0, %v3598_v48 }
 0xe87   : > { %v4899_v55 = vpop.eup %4898 }
 0xe88   : > { %v3443_v22 = vmul.f32 %v4899_v55, %v3372_v62  ;;  %v4901_v47 = vpop.eup %4900  ;;  %vm3449_vm2 = vweird.f32 %v4899_v55 }
 0xe89   : > { %v4903_v23 = vpop.eup %4902  ;;  %vm3450_vm5 = vmor %vm3448_vm13, %vm3449_vm2  ;;  %v3483_v53 = vmul.f32 %v4901_v47, %v3376_v39  ;;  %vm3489_vm14 = vweird.f32 %v4901_v47 }
 0xe8a   : > { %v3444_v6 = vmul.f32 %v4899_v55, %v3443_v22  ;;  %v3493_v18 = vmul.f32 %v4903_v23, %v3377_v13  ;;  %vm3499_vm7 = vweird.f32 %v4903_v23  ;;  %vm3490_vm1 = vmor %vm3488_vm8, %vm3489_vm14 }
 0xe8b   : > { %v3484_v61 = vmul.f32 %v4901_v47, %v3483_v53  ;;  %vm3500_vm15 = vmor %vm3498_vm6, %vm3499_vm7 }
 0xe8c   : > { %v3445_v36 = vmul.f32 0.5, %v3444_v6  ;;  %v3494_v1 = vmul.f32 %v4903_v23, %v3493_v18 }
 0xe8d   : > { %v3485_v50 = vmul.f32 0.5, %v3484_v61 }
 0xe8e   : > { %v3446_v26 = vsub.f32 1.5, %v3445_v36  ;;  %v3495_v5 = vmul.f32 0.5, %v3494_v1 }
 0xe8f   : > { %v3486_v52 = vsub.f32 1.5, %v3485_v50 }
 0xe90   : > { %v3447_v16 = vmul.f32 %v4899_v55, %v3446_v26  ;;  %v3496_v60 = vsub.f32 1.5, %v3495_v5 }
 0xe92   : > { %v3451_v57 = vsel %vm3450_vm5, %v4899_v55, %v3447_v16  ;;  %v3497_v15 = vmul.f32 %v4903_v23, %v3496_v60 }
 0xe93   : > { %v3047_v31 = vpop.permute.xlu2 %3046  ;;  %v3548_v49 = vmul.f32 %v3451_v57, %v6163_v35 }
 0xe94   : > { %3052 = vst.msk [vmem:[#allocation2] sm:$0xf] %vm1778_vm9, %v3047_v31  ;;  %v3501_v48 = vsel %vm3500_vm15, %v4903_v23, %v3497_v15 }
 0xe95   : > { %v3567_v59 = vmul.f32 %v6190_v20, %v3548_v49  ;;  %v3553_v31 = vmul.f32 %v3501_v48, %v6156_v25 }
 0xe97   : > { %v3586_v35 = vadd.f32 %v6197_v30, %v3567_v59  ;;  %v3572_v62 = vmul.f32 %v6190_v20, %v3553_v31 }
 0xe99   : > { %v3591_v63 = vadd.f32 %v6197_v30, %v3572_v62 }
 0xea9   : > { %v3325_v4 = vpop.xlane.xlu1 %3324 }
 0xeaa   : > { %v3357_v58 = vmul.f32 %v3325_v4, %v5334_v14 }
 0xeac   : > { %v3373_v38 = vadd.f32 1e-05, %v3357_v58 }
 0xeae   : > { %4904 = vrsqrt.f32 %v3373_v38  ;;  %vm3458_vm4 = vweird.f32 %v3373_v38 }
 0xeb3   : > { %v3049_v54 = vpop.permute.xlu0 %3048 }
 0xeb4   : > { %v4905_v11 = vpop.eup %4904  ;;  %3053 = vst.msk [vmem:[#allocation2 + $0x4] sm:$0xf] %vm1778_vm9, %v3049_v54 }
 0xeb5   : > { %v3453_v10 = vmul.f32 %v4905_v11, %v3373_v38  ;;  %vm3459_vm3 = vweird.f32 %v4905_v11 }
 0xeb6   : > { %vm3460_vm9 = vmor %vm3458_vm4, %vm3459_vm3 }
 0xeb7   : > { %v3454_v41 = vmul.f32 %v4905_v11, %v3453_v10 }
 0xeb9   : > { %v3455_v7 = vmul.f32 0.5, %v3454_v41 }
 0xebb   : > { %v3456_v34 = vsub.f32 1.5, %v3455_v7  ;;  %v3128_v0 = vpop.permute.xlu0 %3127 }
 0xebc   : > { %3132 = vst.msk [vmem:[#allocation2 + $0x4] sm:$0xf] %vm1858_vm10, %v3128_v0 }
 0xebd   : > { %v3457_v32 = vmul.f32 %v4905_v11, %v3456_v34 }
 0xebf   : > { %v3461_v9 = vsel %vm3460_vm9, %v4905_v11, %v3457_v32 }
 0xec0   : > { %v3549_v29 = vmul.f32 %v3461_v9, %v6184_v27  ;;  %v3487_v27 = vmul.f32 %v4901_v47, %v3486_v52 }
 0xec1   : > { %v3126_v56 = vpop.permute.xlu1 %3125 }
 0xec2   : > { %3131 = vst.msk [vmem:[#allocation2] sm:$0xf] %vm1858_vm10, %v3126_v56  ;;  %v3568_v21 = vmul.f32 %v6190_v20, %v3549_v29  ;;  %v3491_v42 = vsel %vm3490_vm1, %v4901_v47, %v3487_v27 }
 0xec3   : > { %v3552_v33 = vmul.f32 %v3491_v42, %v6121_v19 }
 0xec4   : > { %v3587_v44 = vadd.f32 %v6197_v30, %v3568_v21 }
 0xec5   : > { %v3571_v55 = vmul.f32 %v6190_v20, %v3552_v33 }
 0xec6   : > { %v3599_v2 = vpack.c.bf16 %v3587_v44, %v3586_v35 }
 0xec7   : > { %v3590_v22 = vadd.f32 %v6197_v30, %v3571_v55 }
 0xec8   : > { %4451 = vmatmul.msk.bf16.gmra.mxu2 %vm1333_vm0, %v3599_v2 }
 0xec9   : > { %v4550_v40 = vld [vmem:[#allocation2] sm:$0xff]  ;;  %v3601_v39 = vpack.c.bf16 %v3591_v63, %v3590_v22 }
 0xeca   : > { %4430 = vmatmul.msk.bf16.vlgmr.msra.gmra.mxu3 %vm1333_vm0, %v4550_v40 }
 0xed5   : > { %v3343_v51 = vpop.xlane.xlu2 %3342 }
 0xed6   : > { %v3363_v46 = vmul.f32 %v3343_v51, %v5334_v14 }
 0xed8   : > { %v3379_v45 = vadd.f32 1e-05, %v3363_v46 }
 0xeda   : > { %4906 = vrsqrt.f32 %v3379_v45  ;;  %4453 = vmatmul.msk.bf16.vlgmr.msrb.gmra.mxu3 %vm1333_vm0, %v3601_v39  ;;  %vm3518_vm11 = vweird.f32 %v3379_v45 }
 0xedd   : > { %v3346_v13 = vpop.xlane.xlu2 %3345 }
 0xede   : > { %v3364_v25 = vmul.f32 %v3346_v13, %v5334_v14 }
 0xee0   : > { %v4907_v19 = vpop.eup %4906  ;;  %v3380_v4 = vadd.f32 1e-05, %v3364_v25 }
 0xee1   : > { %v3513_v6 = vmul.f32 %v4907_v19, %v3379_v45  ;;  %vm3519_vm10 = vweird.f32 %v4907_v19 }
 0xee2   : > { %4908 = vrsqrt.f32 %v3380_v4  ;;  %vm3520_vm12 = vmor %vm3518_vm11, %vm3519_vm10  ;;  %vm3528_vm3 = vweird.f32 %v3380_v4 }
 0xee3   : > { %v3514_v58 = vmul.f32 %v4907_v19, %v3513_v6 }
 0xee5   : > { %v3515_v47 = vmul.f32 0.5, %v3514_v58 }
 0xee6   : > { %v3340_v38 = vpop.xlane.xlu0 %3339 }
 0xee7   : > { %v3362_v36 = vmul.f32 %v3340_v38, %v5334_v14  ;;  %v3516_v16 = vsub.f32 1.5, %v3515_v47 }
 0xee8   : > { %v6332_v23 = vpop.eup %4908 }
 0xee9   : > { %v3378_v26 = vadd.f32 1e-05, %v3362_v36  ;;  %v3523_v18 = vmul.f32 %v6332_v23, %v3380_v4  ;;  %v3517_v1 = vmul.f32 %v4907_v19, %v3516_v16  ;;  %vm3529_vm4 = vweird.f32 %v6332_v23 }
 0xeea   : > { %vm6345_vm8 = vmor %vm3528_vm3, %vm3529_vm4 }
 0xeeb   : > { %4910 = vrsqrt.f32 %v3378_v26  ;;  %v3524_v34 = vmul.f32 %v6332_v23, %v3523_v18  ;;  %v3521_v5 = vsel %vm3520_vm12, %v4907_v19, %v3517_v1  ;;  %vm3508_vm2 = vweird.f32 %v3378_v26 }
 0xeec   : > { %v3328_v54 = vpop.xlane.xlu1 %3327  ;;  %v3555_v52 = vmul.f32 %v3521_v5, %v6223_v12 }
 0xeed   : > { %v3358_v11 = vmul.f32 %v3328_v54, %v5334_v14  ;;  %v3525_v29 = vmul.f32 0.5, %v3524_v34  ;;  %v4555_v34 = vld [vmem:[%s5243_s21] sm:$0xff] }
 0xeee   : > { %v3331_v10 = vpop.xlane.xlu0 %3330  ;;  %v3574_v31 = vmul.f32 %v6190_v20, %v3555_v52 }
 0xeef   : > { %v3374_v53 = vadd.f32 1e-05, %v3358_v11  ;;  %v3359_v41 = vmul.f32 %v3331_v10, %v5334_v14  ;;  %v3526_v2 = vsub.f32 1.5, %v3525_v29 }
 0xef0   : > { %v3593_v39 = vadd.f32 %v6197_v30, %v3574_v31 }
 0xef1   : > { %v4911_v57 = vpop.eup %4910  ;;  %4912 = vrsqrt.f32 %v3374_v53  ;;  %v3375_v7 = vadd.f32 1e-05, %v3359_v41  ;;  %v3527_v55 = vmul.f32 %v6332_v23, %v3526_v2  ;;  %vm3468_vm6 = vweird.f32 %v3374_v53 }
 0xef2   : > { %v3503_v61 = vmul.f32 %v4911_v57, %v3378_v26  ;;  %vm3509_vm13 = vweird.f32 %v4911_v57 }
 0xef3   : > { %4914 = vrsqrt.f32 %v3375_v7  ;;  %vm3510_vm5 = vmor %vm3508_vm2, %vm3509_vm13  ;;  %vm3478_vm7 = vweird.f32 %v3375_v7  ;;  %v3531_v58 = vsel %vm6345_vm8, %v6332_v23, %v3527_v55 }
 0xef4   : > { %v3504_v0 = vmul.f32 %v4911_v57, %v3503_v61  ;;  %v3349_v49 = vpop.xlane.xlu1 %3348  ;;  %v3556_v11 = vmul.f32 %v3531_v58, %v6232_v17  ;;  %v4556_v61 = vld [vmem:[%s5243_s21 + $0x8] sm:$0xff] }
 0xef5   : > { %v3365_v32 = vmul.f32 %v3349_v49, %v5334_v14  ;;  %3865 = vmatpush.bf16.msrb.mxu0 %v4556_v61 }
 0xef6   : > { %v3505_v50 = vmul.f32 0.5, %v3504_v0  ;;  %v3575_v41 = vmul.f32 %v6190_v20, %v3556_v11 }
 0xef7   : > { %v4913_v9 = vpop.eup %4912  ;;  %v3381_v59 = vadd.f32 1e-05, %v3365_v32  ;;  %v4766_v32 = vld [vmem:[%s6569_s3] ss:$0 sm:$0xff]  ;;  %s6573_s3 = sld [smem:[#allocation23_spill]] }
 0xef8   : > { %v3506_v56 = vsub.f32 1.5, %v3505_v50  ;;  %v3463_v60 = vmul.f32 %v4913_v9, %v3374_v53  ;;  %vm3469_vm9 = vweird.f32 %v4913_v9 }
 0xef9   : > { %v4915_v21 = vpop.eup %4914  ;;  %4916 = vrsqrt.f32 %v3381_v59  ;;  %vm3470_vm15 = vmor %vm3468_vm6, %vm3469_vm9  ;;  %vm3538_vm11 = vweird.f32 %v3381_v59  ;;  %3866 = vmatpush.bf16.msrb.mxu0 %v4555_v34 }
 0xefa   : > { %v3507_v35 = vmul.f32 %v4911_v57, %v3506_v56  ;;  %v3464_v44 = vmul.f32 %v4913_v9, %v3463_v60  ;;  %v3473_v15 = vmul.f32 %v4915_v21, %v3375_v7  ;;  %vm3479_vm14 = vweird.f32 %v4915_v21  ;;  %v4558_v56 = vld [vmem:[%s6531_s4 + $0x8] sm:$0xff] }
 0xefb   : > { %vm3480_vm1 = vmor %vm3478_vm7, %vm3479_vm14  ;;  %3836 = vmatpush.bf16.msra.mxu3 %v4558_v56 }
 0xefc   : > { %v3511_v27 = vsel %vm3510_vm5, %v4911_v57, %v3507_v35  ;;  %v3465_v40 = vmul.f32 0.5, %v3464_v44  ;;  %v3474_v48 = vmul.f32 %v4915_v21, %v3473_v15  ;;  %v3594_v57 = vadd.f32 %v6197_v30, %v3575_v41  ;;  %v3637_v44 = vpop.f32.mrf.mxu0 }
 0xefd   : > { %v3554_v42 = vmul.f32 %v3511_v27, %v6252_v43  ;;  %v4763_v27 = vld [vmem:[%s6570_s5] ss:$0 sm:$0xff]  ;;  %s6574_s5 = sld [smem:[#allocation26_spill]] }
 0xefe   : > { %v3466_v33 = vsub.f32 1.5, %v3465_v40  ;;  %v3475_v12 = vmul.f32 0.5, %v3474_v48  ;;  %v4557_v40 = vld [vmem:[%s6531_s4] sm:$0xff] }
 0xeff   : > { %v4917_v62 = vpop.eup %4916  ;;  %v3573_v63 = vmul.f32 %v6190_v20, %v3554_v42  ;;  %3837 = vmatpush.bf16.msra.mxu3 %v4557_v40  ;;  %v3638_v42 = vadd.f32 %v4763_v27, %v3637_v44 }
 0xf00   : > { %v3467_v46 = vmul.f32 %v4913_v9, %v3466_v33  ;;  %v3476_v22 = vsub.f32 1.5, %v3475_v12  ;;  %v3533_v43 = vmul.f32 %v4917_v62, %v3381_v59  ;;  %vm3539_vm10 = vweird.f32 %v4917_v62 }
 0xf01   : > { %v3592_v45 = vadd.f32 %v6197_v30, %v3573_v63  ;;  %vm3540_vm12 = vmor %vm3538_vm11, %vm3539_vm10 }
 0xf02   : > { %v3471_v13 = vsel %vm3470_vm15, %v4913_v9, %v3467_v46  ;;  %v3477_v25 = vmul.f32 %v4915_v21, %v3476_v22  ;;  %v3534_v19 = vmul.f32 %v4917_v62, %v3533_v43 }
 0xf03   : > { %v3550_v6 = vmul.f32 %v3471_v13, %v6265_v3  ;;  %v3602_v4 = vpack.c.bf16 %v3593_v39, %v3592_v45 }
 0xf04   : > { %v3481_v38 = vsel %vm3480_vm1, %v4915_v21, %v3477_v25  ;;  %v3535_v36 = vmul.f32 0.5, %v3534_v19  ;;  %v3639_v48 = vpop.f32.mrf.mxu0 }
 0xf05   : > { %v3551_v26 = vmul.f32 %v3481_v38, %v6271_v8  ;;  %4454 = vmatmul.msk.bf16.gmra.mxu3 %vm1333_vm0, %v3602_v4  ;;  %v3569_v47 = vmul.f32 %v6190_v20, %v3550_v6  ;;  %v3640_v31 = vadd.f32 %v4763_v27, %v3639_v48 }
 0xf06   : > { %v3536_v54 = vsub.f32 1.5, %v3535_v36 }
 0xf07   : > { %v3570_v3 = vmul.f32 %v6190_v20, %v3551_v26  ;;  %v3588_v16 = vadd.f32 %v6197_v30, %v3569_v47 }
 0xf08   : > { %v3537_v10 = vmul.f32 %v4917_v62, %v3536_v54 }
 0xf09   : > { %v3589_v23 = vadd.f32 %v6197_v30, %v3570_v3 }
 0xf0a   : > { %v3541_v8 = vsel %vm3540_vm12, %v4917_v62, %v3537_v10 }
 0xf0b   : > { %v3557_v18 = vmul.f32 %v3541_v8, %v6287_v24  ;;  %v3600_v53 = vpack.c.bf16 %v3589_v23, %v3588_v16  ;;  %v3687_v24 = vpop.f32.mrf.mxu2 }
 0xf0c   : > { %v3727_v33 = vadd.f32 %v3687_v24, %v3638_v42 }
 0xf0d   : > { %4452 = vmatmul.msk.bf16.gmra.mxu2 %vm1333_vm0, %v3600_v53  ;;  %v3576_v17 = vmul.f32 %v6190_v20, %v3557_v18 }
 0xf0e   : > { %v3743_v22 = vmul.f32 0.2, %v3727_v33 }
 0xf0f   : > { %v3595_v7 = vadd.f32 %v6197_v30, %v3576_v17 }
 0xf10   : > { %v3759_v36 = vmax.f32 %v3727_v33, %v3743_v22 }
 0xf11   : > { %v3603_v1 = vpack.c.bf16 %v3595_v7, %v3594_v57 }
 0xf13   : > { %v3689_v49 = vpop.f32.mrf.mxu2 }
 0xf14   : > { %v3728_v46 = vadd.f32 %v3689_v49, %v3640_v31 }
 0xf15   : > { %4455 = vmatmul.msk.bf16.gmra.mxu3 %vm1333_vm0, %v3603_v1 }
 0xf16   : > { %v3744_v38 = vmul.f32 0.2, %v3728_v46 }
 0xf18   : > { %v3760_v34 = vmax.f32 %v3728_v46, %v3744_v38 }
 0xf1b   : > { %v3692_v9 = vpop.f32.mrf.mxu2 }
 0xf1c   : > { %v3729_v43 = vadd.f32 %v3692_v9, %v3638_v42 }
 0xf1e   : > { %v3745_v26 = vmul.f32 0.2, %v3729_v43 }
 0xf20   : > { %v3761_v24 = vmax.f32 %v3729_v43, %v3745_v26 }
 0xf23   : > { %v3694_v30 = vpop.f32.mrf.mxu2 }
 0xf24   : > { %v3730_v45 = vadd.f32 %v3694_v30, %v3640_v31 }
 0xf26   : > { %v3746_v47 = vmul.f32 0.2, %v3730_v45 }
 0xf2b   : > { %v3697_v59 = vpop.f32.mrf.mxu2 }
 0xf2c   : > { %v3731_v55 = vadd.f32 %v3697_v59, %v3638_v42 }
 0xf2e   : > { %v3747_v19 = vmul.f32 0.2, %v3731_v55 }
 0xf30   : > { %v3763_v18 = vmax.f32 %v3731_v55, %v3747_v19 }
 0xf32   : > { %v3777_v9 = vsel %vm1333_vm0, %v3763_v18, -inf }
 0xf33   : > { %v3699_v60 = vpop.f32.mrf.mxu2 }
 0xf34   : > { %v3732_v63 = vadd.f32 %v3699_v60, %v3640_v31 }
 0xf36   : > { %v3748_v6 = vmul.f32 0.2, %v3732_v63 }
 0xf38   : > { %v3764_v53 = vmax.f32 %v3732_v63, %v3748_v6 }
 0xf4b   : > { %v3702_v52 = vpop.f32.mrf.mxu2 }
 0xf4c   : > { %v3733_v51 = vadd.f32 %v3702_v52, %v3638_v42  ;;  %v3790_v52 = vsel %vm1333_vm0, %v3760_v34, -inf }
 0xf4d   : > { %v3167_v0 = vpop.f32.mrf.mxu3 }
 0xf4e   : > { %v3168_v50 = vadd.f32 %v4766_v32, %v3167_v0  ;;  %v3749_v4 = vmul.f32 0.2, %v3733_v51  ;;  %v3762_v0 = vmax.f32 %v3730_v45, %v3746_v47 }
 0xf50   : > { %v3765_v41 = vmax.f32 %v3733_v51, %v3749_v4  ;;  %v3791_v44 = vsel %vm1333_vm0, %v3762_v0, -inf }
 0xf52   : > { %v3779_v59 = vsel %vm1333_vm0, %v3765_v41, -inf }
 0xf53   : > { %v3704_v15 = vpop.f32.mrf.mxu2 }
 0xf54   : > { %v3734_v39 = vadd.f32 %v3704_v15, %v3640_v31 }
 0xf55   : > { %v3169_v5 = vpop.f32.mrf.mxu3 }
 0xf56   : > { %v3170_v20 = vadd.f32 %v4766_v32, %v3169_v5  ;;  %v3750_v54 = vmul.f32 0.2, %v3734_v39 }
 0xf58   : > { %v3805_v29 = vpack.c.bf16 %v3170_v20, %v3168_v50  ;;  %v3766_v49 = vmax.f32 %v3734_v39, %v3750_v54  ;;  %v3775_v20 = vsel %vm1333_vm0, %v3759_v36, -inf }
 0xf59   : > { %v3778_v33 = vmax.f32 %v3775_v20, %v3777_v9  ;;  %v4560_v9 = vld [vmem:[%s6571_s6 + $0x8] sm:$0xff] }
 0xf5a   : > { %4473 = vmatmul.msk.bf16.vlgmr.msrb.gmra.mxu0 %vm1333_vm0, %v3805_v29  ;;  %v3792_v29 = vsel %vm1333_vm0, %v3764_v53, -inf  ;;  %v3794_v15 = vsel %vm1333_vm0, %v3766_v49, -inf  ;;  %3967 = vmatpush.bf16.msrb.mxu3 %v4560_v9 }
 0xf5b   : > { %v3795_v43 = vmax.f32 %v3791_v44, %v3794_v15 }
 0xf5d   : > { %v3712_v21 = vpop.f32.mrf.mxu3 }
 0xf5e   : > { %v3737_v13 = vadd.f32 %v3712_v21, %v3638_v42 }
 0xf60   : > { %v3753_v16 = vmul.f32 0.2, %v3737_v13 }
 0xf62   : > { %v3769_v32 = vmax.f32 %v3737_v13, %v3753_v16  ;;  %v4767_v16 = vld [vmem:[%s5253_s24] ss:$0 sm:$0xff] }
 0xf64   : > { %v3783_v27 = vsel %vm1333_vm0, %v3769_v32, -inf }
 0xf65   : > { %v3714_v35 = vpop.f32.mrf.mxu3 }
 0xf66   : > { %v3738_v58 = vadd.f32 %v3714_v35, %v3640_v31  ;;  %v3776_v35 = vsel %vm1333_vm0, %v3761_v24, -inf }
 0xf68   : > { %v3754_v17 = vmul.f32 0.2, %v3738_v58 }
 0xf6a   : > { %v3770_v30 = vmax.f32 %v3738_v58, %v3754_v17 }
 0xf6c   : > { %v3798_v55 = vsel %vm1333_vm0, %v3770_v30, -inf }
 0xf6d   : > { %v3799_v19 = vmax.f32 %v3795_v43, %v3798_v55 }
 0xf88   : > { %v3717_v2 = vpop.f32.mrf.mxu3 }
 0xf89   : > { %v3739_v57 = vadd.f32 %v3717_v2, %v3638_v42 }
 0xf8b   : > { %v3755_v56 = vmul.f32 0.2, %v3739_v57 }
 0xf8d   : > { %v3771_v63 = vmax.f32 %v3739_v57, %v3755_v56  ;;  %v4559_v56 = vld [vmem:[%s6571_s6] sm:$0xff] }
 0xf8e   : > { %3968 = vmatpush.bf16.msrb.mxu3 %v4559_v56 }
 0xf90   : > { %v3707_v12 = vpop.f32.mrf.mxu2  ;;  %v3719_v62 = vpop.f32.mrf.mxu3 }
 0xf91   : > { %v3735_v25 = vadd.f32 %v3707_v12, %v3638_v42  ;;  %v3740_v7 = vadd.f32 %v3719_v62, %v3640_v31  ;;  %v3793_v12 = vmax.f32 %v3790_v52, %v3792_v29  ;;  %v3780_v62 = vmax.f32 %v3776_v35, %v3779_v59 }
 0xf93   : > { %v3751_v10 = vmul.f32 0.2, %v3735_v25  ;;  %v3756_v60 = vmul.f32 0.2, %v3740_v7  ;;  %v3784_v45 = vmax.f32 %v3780_v62, %v3783_v27 }
 0xf95   : > { %v3767_v5 = vmax.f32 %v3735_v25, %v3751_v10  ;;  %v3772_v51 = vmax.f32 %v3740_v7, %v3756_v60 }
 0xf97   : > { %v3781_v40 = vsel %vm1333_vm0, %v3767_v5, -inf  ;;  %v3800_v4 = vsel %vm1333_vm0, %v3772_v51, -inf }
 0xf98   : > { %v3709_v11 = vpop.f32.mrf.mxu2  ;;  %v3722_v3 = vpop.f32.mrf.mxu3  ;;  %v3782_v39 = vmax.f32 %v3778_v33, %v3781_v40 }
 0xf99   : > { %v3736_v23 = vadd.f32 %v3709_v11, %v3640_v31  ;;  %v3741_v8 = vadd.f32 %v3722_v3, %v3638_v42 }
 0xf9b   : > { %v3752_v1 = vmul.f32 0.2, %v3736_v23  ;;  %v3757_v61 = vmul.f32 0.2, %v3741_v8 }
 0xf9d   : > { %v3768_v50 = vmax.f32 %v3736_v23, %v3752_v1  ;;  %v3773_v21 = vmax.f32 %v3741_v8, %v3757_v61 }
 0xf9f   : > { %v3796_v48 = vsel %vm1333_vm0, %v3768_v50, -inf  ;;  %v3787_v46 = vsel %vm1333_vm0, %v3773_v21, -inf }
 0xfa0   : > { %v3724_v2 = vpop.f32.mrf.mxu3  ;;  %v3797_v13 = vmax.f32 %v3793_v12, %v3796_v48  ;;  %v3788_v6 = vmax.f32 %v3784_v45, %v3787_v46 }
 0xfa1   : > { %v3742_v42 = vadd.f32 %v3724_v2, %v3640_v31  ;;  %v3785_v31 = vsel %vm1333_vm0, %v3771_v63, -inf }
 0xfa2   : > { %v3786_v38 = vmax.f32 %v3782_v39, %v3785_v31  ;;  %v3801_v36 = vmax.f32 %v3797_v13, %v3800_v4  ;;  %v4567_v31 = vld [vmem:[%s6574_s5 + $0x30] sm:$0xff]  ;;  %v4566_v4 = vld [vmem:[%s6574_s5 + $0x28] sm:$0xff] }
 0xfa3   : > { %v3758_v22 = vmul.f32 0.2, %v3742_v42 }
 0xfa4   : > { %v3789_v47 = vmax.f32 %v3786_v38, %v3788_v6  ;;  %v4568_v6 = vld [vmem:[%s6574_s5 + $0x38] sm:$0xff] }
 0xfa5   : > { %v3774_v25 = vmax.f32 %v3742_v42, %v3758_v22  ;;  %v4769_v22 = vld [vmem:[%s6573_s3] ss:$0 sm:$0xff]  ;;  %4062 = vmatpush.bf16.msra.mxu0 %v4568_v6  ;;  %v4564_v38 = vld [vmem:[%s6574_s5 + $0x18] sm:$0xff]  ;;  %s1280_s3 = sand.u32 1, %s4990_s23  }
 0xfa6   : > { %s4281_s4 = sshll.u32 %s1280_s3, 4 }
 0xfa7   : > { %v3802_v58 = vsel %vm1333_vm0, %v3774_v25, -inf  ;;  %s1282_s6 = scalar_lea.vmem [#allocation3], %s4281_s4 }
 0xfa8   : > { %v3803_v26 = vmax.f32 %v3799_v19, %v3802_v58  ;;  %v4565_v58 = vld [vmem:[%s6574_s5 + $0x20] sm:$0xff]  ;;  %s4095_s9 = sshll.u32 %s1282_s6, 4  ;;  %s4096_s9 = int_to_ptr.vmem [resolvable:$true] %s4095_s9 }
 0xfa9   : > { %4063 = vmatpush.bf16.msra.mxu0 %v4567_v31 }
 0xfaa   : > { %v3804_v54 = vmax.f32 %v3801_v36, %v3803_v26  ;;  %v4563_v36 = vld [vmem:[%s6574_s5 + $0x10] sm:$0xff]  ;;  %v4562_v26 = vld [vmem:[%s6574_s5 + $0x8] sm:$0xff] }
 0xfac   : > { %v3810_v11 = vpack.c.bf16 %v3804_v54, %v3789_v47  ;;  %v4770_v47 = vld [vmem:[%s6575_s0] ss:$0 sm:$0xff]  ;;  %s6577_s0 = sld [smem:[#allocation34_spill]] }
 0xfad   : > { %4064 = vmatpush.bf16.msra.mxu0 %v4566_v4 }
 0xfae   : > { %4464 = vmatmul.msk.bf16.vlgmr.msra.gmra.mxu3 %vm1333_vm0, %v3810_v11  ;;  %v4561_v11 = vld [vmem:[%s6574_s5] sm:$0xff]  ;;  %s4569_s5 = sshll.u32 %s4998_s28, 4  ;;  %s4081_s28 = scalar_lea.sflag [#allocation4], %s1280_s3 }
 0xfb1   : > { %4065 = vmatpush.bf16.msra.mxu0 %v4565_v58 }
 0xfb2   : > { %s4094_s7 = scalar_lea.hbm %s6577_s0, %s4569_s5  ;;  %s4948_s5 = scalar_lea.hbm %s6577_s0, 32 }
 0xfb3   : > { %s4097_s10 = sshll.u32 %s4094_s7, 4  ;;  %s4098_s10 = int_to_ptr.hbm [resolvable:$true] %s4097_s10 }
 0xfb5   : > { %4066 = vmatpush.bf16.msra.mxu0 %v4564_v38 }
 0xfb9   : > { %4067 = vmatpush.bf16.msra.mxu0 %v4563_v36 }
 0xfbd   : > { %4068 = vmatpush.bf16.msra.mxu0 %v4562_v26 }
 0xfc1   : > { %4069 = vmatpush.bf16.msra.mxu0 %v4561_v11 }
 0xfd7   : > { %v3868_v3 = vpop.f32.mrf.mxu0 }
 0xfdf   : > { %v3870_v41 = vpop.f32.mrf.mxu0 }
0x1031   : > { %v3839_v10 = vpop.f32.mrf.mxu3 }
0x1032   : > { %v3869_v23 = vadd.f32 %v3868_v3, %v3839_v10 }
0x1034   : > { %v3877_v8 = vadd.f32 %v4767_v16, %v3869_v23 }
0x1036   : > { %v6395_v18 = vadd.f32 %v3877_v8, %v5884_v28 }
0x1038   : > { %v3883_v53 = vsel %vm1333_vm0, %v6395_v18, 0.0 }
0x1039   : > { %3884 = vadd.xlane.f32.xlu0 %v3883_v53  ;;  %v3841_v17 = vpop.f32.mrf.mxu3 }
0x103a   : > { %v3871_v57 = vadd.f32 %v3870_v41, %v3841_v17 }
0x103c   : > { %v3878_v7 = vadd.f32 %v4767_v16, %v3871_v57 }
0x103e   : > { %v6400_v1 = vadd.f32 %v3878_v7, %v5890_v37 }
0x1040   : > { %v3886_v61 = vsel %vm1333_vm0, %v6400_v1, 0.0 }
0x1041   : > { %3887 = vadd.xlane.f32.xlu2 %v3886_v61 }
0x10ac   : > { %v3885_v34 = vpop.xlane.xlu0 %3884 }
0x10ad   : > { %v3889_v28 = vmul.f32 %v3885_v34, %v5334_v14 }
0x10af   : > { %v3891_v24 = vsub.f32 %v6395_v18, %v3889_v28 }
0x10b1   : > { %v3893_v0 = vmul.f32 %v3891_v24, %v3891_v24 }
0x10b3   : > { %v3895_v49 = vsel %vm1333_vm0, %v3893_v0, 0.0 }
0x10b4   : > { %3896 = vadd.xlane.f32.xlu1 %v3895_v49  ;;  %v3888_v32 = vpop.xlane.xlu2 %3887 }
0x10b5   : > { %v3890_v5 = vmul.f32 %v3888_v32, %v5334_v14 }
0x10b7   : > { %v3892_v37 = vsub.f32 %v6400_v1, %v3890_v5 }
0x10b9   : > { %v3894_v50 = vmul.f32 %v3892_v37, %v3892_v37 }
0x10bb   : > { %v3898_v20 = vsel %vm1333_vm0, %v3894_v50, 0.0 }
0x10bc   : > { %3899 = vadd.xlane.f32.xlu0 %v3898_v20 }
0x1127   : > { %v3897_v29 = vpop.xlane.xlu1 %3896 }
0x1128   : > { %v3901_v30 = vmul.f32 %v3897_v29, %v5334_v14 }
0x112a   : > { %v3903_v59 = vadd.f32 1e-05, %v3901_v30 }
0x112c   : > { %4918 = vrsqrt.f32 %v3903_v59  ;;  %vm3911_vm2 = vweird.f32 %v3903_v59 }
0x112f   : > { %v3900_v60 = vpop.xlane.xlu0 %3899 }
0x1130   : > { %v3902_v21 = vmul.f32 %v3900_v60, %v5334_v14  ;;  %v4768_v14 = vld [vmem:[%s6572_s11] ss:$0 sm:$0xff]  ;;  %s6576_s11 = sld [smem:[#allocation27_spill]] }
0x1132   : > { %v4919_v52 = vpop.eup %4918  ;;  %v3904_v35 = vadd.f32 1e-05, %v3902_v21 }
0x1133   : > { %v3906_v44 = vmul.f32 %v4919_v52, %v3903_v59  ;;  %vm3912_vm13 = vweird.f32 %v4919_v52 }
0x1134   : > { %4920 = vrsqrt.f32 %v3904_v35  ;;  %vm3913_vm5 = vmor %vm3911_vm2, %vm3912_vm13  ;;  %vm3921_vm4 = vweird.f32 %v3904_v35 }
0x1135   : > { %v3907_v15 = vmul.f32 %v4919_v52, %v3906_v44 }
0x1136   : > { %v4771_v29 = vld [vmem:[%s6576_s11] ss:$0 sm:$0xff]  ;;  %s4942_s11 = sshra.s32 %s4098_s10, 4  ;;  %s4943_s11 = int_to_ptr.hbm [resolvable:$true] %s4942_s11 }
0x1137   : > { %v3908_v2 = vmul.f32 0.5, %v3907_v15  ;;  %s4944_s4 = scalar_lea.hbm %s4943_s11, 16  ;;  %p4949_p1 = scmp.lt.s32.totalorder %s4943_s11, %s6577_s0 }
0x1138   : > { %p4945_p12 = scmp.ne.s32.totalorder %s4943_s11, %s4944_s4  ;;  %p4950_p2 = scmp.lt.s32.totalorder %s4948_s5, %s4944_s4 }
0x1139   : > { %v3909_v27 = vsub.f32 1.5, %v3908_v2 }
0x113a   : > { %v4921_v40 = vpop.eup %4920  ;;  %p4946_p13 = pnand %p4945_p12, %p5300_p4  ;;  %p4951_p3 = por %p4950_p2, %p4949_p1 }
0x113b   : > { %v3910_v48 = vmul.f32 %v4919_v52, %v3909_v27  ;;  %v3916_v42 = vmul.f32 %v4921_v40, %v3904_v35  ;;  %vm3922_vm3 = vweird.f32 %v4921_v40 }
0x113c   : > { %vm3923_vm9 = vmor %vm3921_vm4, %vm3922_vm3  ;;  %p4947_p0 = pneg %p4946_p13 }
0x113d   : > { %v3917_v33 = vmul.f32 %v4921_v40, %v3916_v42  ;;  %v3914_v12 = vsel %vm3913_vm5, %v4919_v52, %v3910_v48 }
0x113e   : > { %v3925_v63 = vmul.f32 %v3914_v12, %v3891_v24  ;;  %p4952_p5 = pnand %p4951_p3, %p4947_p0 }
0x113f   : > { %v3918_v62 = vmul.f32 0.5, %v3917_v33 }
0x1140   : > { %v3930_v43 = vmul.f32 %v4768_v14, %v3925_v63 }
0x1141   : > { %v3919_v55 = vsub.f32 1.5, %v3918_v62 }
0x1142   : > { %v3935_v13 = vadd.f32 %v4769_v22, %v3930_v43 }
0x1143   : > { %v3920_v51 = vmul.f32 %v4921_v40, %v3919_v55 }
0x1145   : > { %v3924_v46 = vsel %vm3923_vm9, %v4921_v40, %v3920_v51 }
0x1146   : > { %v3926_v45 = vmul.f32 %v3924_v46, %v3892_v37 }
0x1148   : > { %v3931_v39 = vmul.f32 %v4768_v14, %v3926_v45 }
0x114a   : > { %v3936_v25 = vadd.f32 %v4769_v22, %v3931_v39 }
0x114c   : > { %v3937_v19 = vpack.c.bf16 %v3936_v25, %v3935_v13 }
0x114e   : > { %4482 = vmatmul.msk.bf16.vlgmr.msrb.gmra.mxu3 %vm1333_vm0, %v3937_v19 }
0x11d1   : > { %v3970_v54 = vpop.f32.mrf.mxu3 }
0x11d2   : > { %v3971_v3 = vadd.f32 %v4770_v47, %v3970_v54 }
0x11d4   : > { %v3975_v16 = vmul.f32 %v3971_v3, %v3971_v3 }
0x11d6   : > { %v3977_v10 = vmul.f32 %v3975_v16, %v3971_v3 }
0x11d8   : > { %v3979_v23 = vmul.f32 0.044715, %v3977_v10 }
0x11d9   : > { %v3972_v8 = vpop.f32.mrf.mxu3 }
0x11da   : > { %v3981_v53 = vadd.f32 %v3979_v23, %v3971_v3  ;;  %v3973_v41 = vadd.f32 %v4770_v47, %v3972_v8 }
0x11dc   : > { %v3983_v17 = vmul.f32 0.7978846, %v3981_v53  ;;  %v3976_v57 = vmul.f32 %v3973_v41, %v3973_v41 }
0x11de   : > { %v3978_v7 = vmul.f32 %v3976_v57, %v3973_v41  ;;  %4922 = vtanh.f32 %v3983_v17 }
0x11e0   : > { %v3980_v61 = vmul.f32 0.044715, %v3978_v7 }
0x11e2   : > { %v3982_v34 = vadd.f32 %v3980_v61, %v3973_v41 }
0x11e4   : > { %v3984_v28 = vmul.f32 0.7978846, %v3982_v34  ;;  %v4923_v24 = vpop.eup %4922 }
0x11e5   : > { %v3987_v0 = vadd.f32 1.0, %v4923_v24 }
0x11e6   : > { %4924 = vtanh.f32 %v3984_v28 }
0x11e7   : > { %v3989_v32 = vmul.f32 0.5, %v3987_v0 }
0x11e9   : > { %v3991_v50 = vmul.f32 %v3989_v32, %v3971_v3 }
0x11ec   : > { %v4925_v49 = vpop.eup %4924 }
0x11ed   : > { %v3988_v5 = vadd.f32 1.0, %v4925_v49 }
0x11ef   : > { %v3990_v37 = vmul.f32 0.5, %v3988_v5 }
0x11f1   : > { %v3992_v20 = vmul.f32 %v3990_v37, %v3973_v41 }
0x11f3   : > { %v3993_v9 = vpack.c.bf16 %v3992_v20, %v3991_v50 }
0x11f5   : > { %4070 = vmatmul.bf16.vlgmr.msra.gmra.mxu0 %v3993_v9 }
0x1272   : > { %v4071_v30 = vpop.f32.mrf.mxu0 }
0x1273   : > { %v4072_v59 = vadd.f32 %v4771_v29, %v4071_v30 }
0x1275   : > { %v4076_v56 = vadd.f32 %v4072_v59, %v6395_v18 }
0x1277   : > { %4078 = vst.msk [vmem:[%s1282_s6] sm:$0xff] %vm1333_vm0, %v4076_v56 }
0x127a   : > { %v4073_v60 = vpop.f32.mrf.mxu0 }
0x127b   : > { %v4074_v21 = vadd.f32 %v4771_v29, %v4073_v60 }
0x127d   : > { %v4077_v52 = vadd.f32 %v4074_v21, %v6400_v1 }
0x127f   : > { %4079 = vst.msk [vmem:[%s1282_s6 + $0x8] sm:$0xff] %vm1333_vm0, %v4077_v52 }
0x1280   : > { %4955 = shalt.err (!%p4952_p5)
}
0x1281   : > { %s5054_s7 = smov 128  }
0x1282   : > { %4650 = dma.vmem_to_hbm [thread:$0]  (%p5300_p4), %s4096_s9, 256, %s4098_s10, %s4081_s28, %s5054_s7, %s5054_s7, %s6561_s8  }
0x1283 PF: > { %p4656_p6 = scmp.ge.s32.totalorder %s5006_s2, 2  ;;  %s4112_s6 = sand.u32 1, %s4986_s22  }
0x1284   : > { %s4113_s3 = scalar_lea.sflag [#allocation4], %s4112_s6 }
0x1285   : > { %p4653_p7 = pnand %p4656_p6, %p5307_p8 }
0x1287   : > { %p4654_p9 = pneg %p4653_p7 }
0x1289   : > { %4981 = dma.done.wait (%p4654_p9), %s4113_s3, 256  }
0x128a   : > { %4983 = vsyncadd (%p4654_p9), %s4113_s3, 4294967040  ;;  %s92_s2 = sadd.s32 1, %s5006_s2   ;;  %s6578_s9 = sld [smem:[#allocation35_spill]] }
0x128b   : > { %p89_p10 = scmp.ge.s32.totalorder %s92_s2, 4   ;;  %s6579_s22 = smov %s4990_s23 }
0x128c   : > { %s6580_s23 = smov %s4994_s26  ;;  %s6581_s26 = smov %s5313_s13 }
0x128d   : > { %s6582_s28 = smov %s5002_s1  ;;  %91 = sbr.rel (!%p89_p10) target bundleno = 80 (0x50), region = 262 }
0x1290   : > { %s6583_s1 = smov %s6578_s9 }
0x1292   :  { %4119 = vsyncpa [#allocation4], 1 }
0x1293   :  { %4121 = vsyncpa [#allocation4 + $0x1], 1 }

</bundles_post_ra>
